<compile_context>
chip_gen: v6e
topology: v6e:2x2x1
jax: 0.10.0
libtpu: 0.0.40
codegen_flags: <defaults>
</compile_context>

<pallas_src>
import math
import functools

import jax
import jax.numpy as jnp
from jax import lax
from jax.experimental import pallas as pl
from jax.experimental.pallas import tpu as pltpu

_BN_EPS = 1e-5

_PARALLEL = getattr(pltpu, "PARALLEL", "parallel")
_ARBITRARY = getattr(pltpu, "ARBITRARY", "arbitrary")
_CORE_PARALLEL = getattr(pltpu, "CORE_PARALLEL", None)


# ----------------------------------------------------------------------------
# One-time probe: can we shard the (outer) batch grid axis across TensorCores
# with CORE_PARALLEL on this runtime?  The probe mirrors the real kernel's
# structure (2-D grid, VMEM scratch carried along the inner "arbitrary" axis,
# pl.when init) and checks numerics, falling back to PARALLEL on any failure.
# ----------------------------------------------------------------------------
@functools.lru_cache(maxsize=None)
def _batch_axis_semantics():
    if _CORE_PARALLEL is None:
        return _PARALLEL

    def probe(x_ref, o_ref, acc_ref):
        @pl.when(pl.program_id(1) == 0)
        def _():
            acc_ref[...] = x_ref[...]
        o_ref[...] = acc_ref[...] + pl.program_id(1).astype(jnp.float32)

    try:
        x = jnp.arange(2 * 8 * 128, dtype=jnp.float32).reshape(2, 8, 128)
        out = pl.pallas_call(
            probe,
            out_shape=jax.ShapeDtypeStruct((2, 2, 8, 128), jnp.float32),
            grid=(2, 2),
            in_specs=[pl.BlockSpec((None, 8, 128), lambda b, q: (b, 0, 0))],
            out_specs=pl.BlockSpec((None, None, 8, 128),
                                   lambda b, q: (b, q, 0, 0)),
            scratch_shapes=[pltpu.VMEM((8, 128), jnp.float32)],
            compiler_params=pltpu.CompilerParams(
                dimension_semantics=(_CORE_PARALLEL, _ARBITRARY)),
        )(x)
        expected = (x[:, None, :, :]
                    + jnp.arange(2, dtype=jnp.float32)[None, :, None, None])
        if bool(jnp.allclose(jax.block_until_ready(out), expected)):
            return _CORE_PARALLEL
    except Exception:
        pass
    return _PARALLEL


# ----------------------------------------------------------------------------
# Fused kernel. Grid = (B, N // tq): one batch element x one query tile.
#   qkv  = W_qkv @ x + b_qkv        (once per batch element, staged in scratch;
#                                    Q rows pre-scaled by 1/sqrt(dh))
#   S    = Q_tile^T K               (head-batched dot_general, no transposes)
#   P    = exp(sc * S - rowmax)
#   inference: msg = (V P^T) * 1/rowsum   (normalization folded after matmul)
#   testing  : W = P / rowsum ; msg = V W^T ; W written out
#   y    = W3 @ relu(W2' @ relu(W1' @ msg + b1') + b2') + b3   (BN folded)
#   out  = x_tile + y
# ----------------------------------------------------------------------------
def _fused_nonlocal_kernel(x_ref, sc_ref, wqkv_ref, bias_ref,
                           w1_ref, w2_ref, w3_ref, *rest,
                           num_heads, emit_weight, use_bf16):
    if emit_weight:
        o_ref, w_out_ref, qkv_ref = rest
    else:
        o_ref, qkv_ref = rest
        w_out_ref = None

    C, N = x_ref.shape
    H = num_heads
    dh = C // H
    Ch = w1_ref.shape[0]
    tq = sc_ref.shape[0]
    qi = pl.program_id(1)

    # Packed biases: rows [0,3C)=QKV | [3C,3C+Ch)=MLP1 | next Ch=MLP2 | last C=MLP3.
    b_qkv = bias_ref[0:3 * C, :]
    b1 = bias_ref[3 * C:3 * C + Ch, :]
    b2 = bias_ref[3 * C + Ch:3 * C + 2 * Ch, :]
    b3 = bias_ref[3 * C + 2 * Ch:3 * C + 2 * Ch + C, :]

    # Q/K/V projection once per batch element (first query tile), staged into
    # VMEM scratch so the (3C, N) slab's live range does not span the attention.
    @pl.when(qi == 0)
    def _():
        qkv = jnp.dot(wqkv_ref[...], x_ref[...],
                      preferred_element_type=jnp.float32) + b_qkv     # (3C, N)
        qkv_ref[...] = qkv.reshape(3, H, dh, N)

    q0 = pl.multiple_of(qi * tq, tq)
    q_t = qkv_ref[0, :, :, pl.ds(q0, tq)]        # (H, dh, tq)  query tile
    k_all = qkv_ref[1]                           # (H, dh, N)
    v_all = qkv_ref[2]                           # (H, dh, N)

    mm_dtype = jnp.bfloat16 if use_bf16 else jnp.float32

    # S[h, q, k] = sum_d Q[h, d, q] * K[h, d, k]  -- head-batched, no transposes.
    s = lax.dot_general(q_t.astype(mm_dtype), k_all.astype(mm_dtype),
                        (((1,), (1,)), ((0,), (0,))),
                        preferred_element_type=jnp.float32)           # (H, tq, N)
    s = sc_ref[...] * s
    s = s - jnp.max(s, axis=-1, keepdims=True)
    p = jnp.exp(s)

    if emit_weight:
        # fp32 + exact reciprocal: preserves the 1e-5 attention-weight tolerance.
        w = p * pl.reciprocal(jnp.sum(p, axis=-1, keepdims=True), approx=False)
        w_out_ref[...] = w
        # msg[h, d, q] = sum_k V[h, d, k] * W[h, q, k]
        msg = lax.dot_general(v_all, w, (((2,), (2,)), ((0,), (0,))),
                              preferred_element_type=jnp.float32)     # (H, dh, tq)
    else:
        # Softmax normalization folded AFTER the P@V matmul: the divide touches
        # the (H, dh, tq) message instead of the (H, tq, N) weights.
        msg = lax.dot_general(v_all.astype(mm_dtype), p.astype(mm_dtype),
                              (((2,), (2,)), ((0,), (0,))),
                              preferred_element_type=jnp.float32)     # (H, dh, tq)
        inv = pl.reciprocal(jnp.sum(p, axis=-1), approx=use_bf16)     # (H, tq)
        msg = msg * inv[:, None, :]

    msg = msg.reshape(C, tq)

    # Message MLP (eval-mode BatchNorm folded into w1/b1, w2/b2) + residual.
    y = jnp.dot(w1_ref[...], msg, preferred_element_type=jnp.float32) + b1
    y = jnp.maximum(y, 0.0)
    y = jnp.dot(w2_ref[...], y, preferred_element_type=jnp.float32) + b2
    y = jnp.maximum(y, 0.0)
    y = jnp.dot(w3_ref[...], y, preferred_element_type=jnp.float32) + b3
    o_ref[...] = (x_ref[:, pl.ds(q0, tq)] + y).astype(o_ref.dtype)


def _fused_nonlocal_call(x, sc, w_qkv, bias, w1, w2, w3,
                         num_heads, emit_weight, use_bf16, batch_sem):
    B, C, N = x.shape
    H = num_heads
    dh = C // H
    Ch = w1.shape[0]
    Rb = bias.shape[0]

    # Query-axis tiling (flash-style row tiles): per-step VMEM is O(N * tq)
    # instead of O(N^2), so large N fits v7x's 64 MiB VMEM.
    tq = 128 if (N % 128 == 0 and N > 128) else N
    nq = N // tq

    kernel = functools.partial(_fused_nonlocal_kernel, num_heads=H,
                               emit_weight=emit_weight, use_bf16=use_bf16)

    # Constant-index blocks (weights/biases, x across q) are not re-fetched
    # between consecutive grid steps; pl.Buffered(1) could halve their buffers
    # but is negligible at this C.
    in_specs = [
        pl.BlockSpec((None, C, N), lambda b, q: (b, 0, 0)),     # x
        pl.BlockSpec((None, tq, N), lambda b, q: (b, q, 0)),    # sc, query-tiled rows
        pl.BlockSpec((3 * C, C), lambda b, q: (0, 0)),          # stacked QKV weights
        pl.BlockSpec((Rb, 1), lambda b, q: (0, 0)),             # all biases, packed
        pl.BlockSpec((Ch, C), lambda b, q: (0, 0)),             # MLP layer 1 (BN folded)
        pl.BlockSpec((Ch, Ch), lambda b, q: (0, 0)),            # MLP layer 2 (BN folded)
        pl.BlockSpec((C, Ch), lambda b, q: (0, 0)),             # MLP layer 3
    ]

    if emit_weight:
        out_shape = (jax.ShapeDtypeStruct((B, C, N), jnp.float32),
                     jax.ShapeDtypeStruct((B, H, N, N), jnp.float32))
        out_specs = (pl.BlockSpec((None, C, tq), lambda b, q: (b, 0, q)),
                     pl.BlockSpec((None, H, tq, N), lambda b, q: (b, 0, q, 0)))
    else:
        out_shape = jax.ShapeDtypeStruct((B, C, N), jnp.float32)
        out_specs = pl.BlockSpec((None, C, tq), lambda b, q: (b, 0, q))

    # Explicit scoped-VMEM limit from a per-step estimate (default is 32 MiB).
    f32b = 4
    est = (2 * C * N + 2 * tq * N + 2 * C * tq                      # x, sc, out (dbl-buf)
           + 2 * (3 * C * C + Ch * C + Ch * Ch + C * Ch + Rb * 128)  # weights/biases
           + 3 * C * N                                               # qkv scratch
           + 6 * H * tq * N) * f32b                                  # attention temporaries
    if emit_weight:
        est += 2 * H * tq * N * f32b
    vmem_limit = int(min(max(2 * est, 32 * 1024 * 1024), 128 * 1024 * 1024))

    return pl.pallas_call(
        kernel,
        out_shape=out_shape,
        grid=(B, nq),
        in_specs=in_specs,
        out_specs=out_specs,
        scratch_shapes=[pltpu.VMEM((3, H, dh, N), jnp.float32)],
        compiler_params=pltpu.CompilerParams(
            dimension_semantics=(batch_sem, _ARBITRARY),
            vmem_limit_bytes=vmem_limit),
    )(x, sc, w_qkv, bias, w1, w2, w3)


# ----------------------------------------------------------------------------
# Forward pass (host-side weight folding + one fused kernel).
# ----------------------------------------------------------------------------
@functools.partial(jax.jit, static_argnames=("num_heads", "testing",
                                             "use_bf16", "batch_sem"))
def _forward_jit(params, x, sc, *, num_heads, testing, use_bf16, batch_sem):
    B, C, N = x.shape
    assert C % num_heads == 0, "num_channels must be divisible by num_heads"
    dh = C // num_heads

    # Fold 1/sqrt(dh) into the Q projection; stack Q/K/V into one weight.
    inv_sqrt_dh = 1.0 / math.sqrt(dh)
    w_qkv = jnp.concatenate(
        [params["wq"] * inv_sqrt_dh, params["wk"], params["wv"]], axis=0)  # (3C, C)
    b_qkv = jnp.concatenate(
        [params["bq"] * inv_sqrt_dh, params["bk"], params["bv"]], axis=0)  # (3C,)

    # Fold eval-mode BatchNorm (including running statistics) into the convs.
    s1 = params["g1"] / jnp.sqrt(params["rv1"] + _BN_EPS)
    w1 = params["w1"] * s1[:, None]
    b1 = (params["b1"] - params["rm1"]) * s1 + params["be1"]
    s2 = params["g2"] / jnp.sqrt(params["rv2"] + _BN_EPS)
    w2 = params["w2"] * s2[:, None]
    b2 = (params["b2"] - params["rm2"]) * s2 + params["be2"]

    # Pack all biases into one (R, 1) input (one small DMA instead of five).
    bias = jnp.concatenate([b_qkv, b1, b2, params["b3"]], axis=0).reshape(-1, 1)

    if testing:
        out, weight = _fused_nonlocal_call(
            x, sc, w_qkv, bias, w1, w2, params["w3"],
            num_heads, emit_weight=True, use_bf16=False, batch_sem=batch_sem)
        w_out = jnp.squeeze(weight, axis=1) if num_heads == 1 else weight
        return out, w_out

    out = _fused_nonlocal_call(
        x, sc, w_qkv, bias, w1, w2, params["w3"],
        num_heads, emit_weight=False, use_bf16=use_bf16, batch_sem=batch_sem)
    return out


def nonlocal_block_forward(params, corr_feat_belief, spatial_compatibility,
                           num_heads, testing=False, use_bf16=True):
    batch_sem = _batch_axis_semantics()   # probed eagerly (outside jit), cached
    return _forward_jit(params, corr_feat_belief, spatial_compatibility,
                        num_heads=num_heads, testing=testing,
                        use_bf16=(use_bf16 and not testing),
                        batch_sem=batch_sem)


# ----------------------------------------------------------------------------
# Pure-JAX reference for verification.
# ----------------------------------------------------------------------------
def ref_forward(params, x, sc, num_heads):
    B, C, N = x.shape
    dh = C // num_heads

    def conv(z, w, b):
        return jnp.einsum("oc,bcn->bon", w, z) + b[None, :, None]

    def bn(z, g, be, rm, rv):
        inv = g / jnp.sqrt(rv + _BN_EPS)
        return (z - rm[None, :, None]) * inv[None, :, None] + be[None, :, None]

    q = conv(x, params["wq"], params["bq"]).reshape(B, num_heads, dh, N)
    k = conv(x, params["wk"], params["bk"]).reshape(B, num_heads, dh, N)
    v = conv(x, params["wv"], params["bv"]).reshape(B, num_heads, dh, N)

    attn = jnp.einsum("bhco,bhci->bhoi", q, k) / math.sqrt(dh)
    weight = jax.nn.softmax(sc[:, None, :, :] * attn, axis=-1)
    msg = jnp.einsum("bhoi,bhci->bhco", weight, v).reshape(B, C, N)

    y = jnp.maximum(bn(conv(msg, params["w1"], params["b1"]),
                       params["g1"], params["be1"], params["rm1"], params["rv1"]), 0.0)
    y = jnp.maximum(bn(conv(y, params["w2"], params["b2"]),
                       params["g2"], params["be2"], params["rm2"], params["rv2"]), 0.0)
    y = conv(y, params["w3"], params["b3"])
    return x + y, weight


# ----------------------------------------------------------------------------
# Deterministic parameter init (synthetic; shapes from the module __init__).
# ----------------------------------------------------------------------------
def init_params(key, num_channels):
    C = num_channels
    Ch = C // 2
    ks = jax.random.split(key, 20)
    n = lambda k, s: jax.random.normal(k, s, jnp.float32) * 0.1
    return {
        # projection_q / projection_k / projection_v : Conv1d(C, C, 1)
        "wq": n(ks[0], (C, C)), "bq": n(ks[1], (C,)),
        "wk": n(ks[2], (C, C)), "bk": n(ks[3], (C,)),
        "wv": n(ks[4], (C, C)), "bv": n(ks[5], (C,)),
        # message_mlp: Conv1d(C,C/2) -> BN -> ReLU -> Conv1d(C/2,C/2) -> BN -> ReLU -> Conv1d(C/2,C)
        "w1": n(ks[6], (Ch, C)), "b1": n(ks[7], (Ch,)),
        "g1": 1.0 + n(ks[8], (Ch,)), "be1": n(ks[9], (Ch,)),
        "rm1": n(ks[10], (Ch,)), "rv1": 1.0 + jnp.abs(n(ks[11], (Ch,))),
        "w2": n(ks[12], (Ch, Ch)), "b2": n(ks[13], (Ch,)),
        "g2": 1.0 + n(ks[14], (Ch,)), "be2": n(ks[15], (Ch,)),
        "rm2": n(ks[16], (Ch,)), "rv2": 1.0 + jnp.abs(n(ks[17], (Ch,))),
        "w3": n(ks[18], (C, Ch)), "b3": n(ks[19], (C,)),
    }


if __name__ == "__main__":
    # batch, num_channels, num_heads, sequence length (N=256 exercises 2 query tiles)
    B, C, H, N = 2, 32, 4, 256

    key = jax.random.PRNGKey(0)
    k_x, k_sc, k_p = jax.random.split(key, 3)

    corr_feat_belief = jax.random.normal(k_x, (B, C, N), jnp.float32)
    spatial_compatibility = jax.random.uniform(k_sc, (B, N, N), jnp.float32)
    params = init_params(k_p, C)

    # Testing path (fp32; also materializes the non-local attention weights).
    out, attn_weight = nonlocal_block_forward(
        params, corr_feat_belief, spatial_compatibility, num_heads=H, testing=True)
    out = jax.block_until_ready(out)
    attn_weight = jax.block_until_ready(attn_weight)

    # Inference path, fp32 matmuls (tight check of the normalization fold).
    out_f32 = jax.block_until_ready(nonlocal_block_forward(
        params, corr_feat_belief, spatial_compatibility, num_heads=H,
        testing=False, use_bf16=False))

    # Inference path, bf16 QK / PV matmul inputs with f32 accumulation (fast path).
    out_bf16 = jax.block_until_ready(nonlocal_block_forward(
        params, corr_feat_belief, spatial_compatibility, num_heads=H,
        testing=False, use_bf16=True))

    ref_out, ref_weight = ref_forward(params, corr_feat_belief, spatial_compatibility, H)

    assert out.shape == (B, C, N)
    assert attn_weight.shape == (B, H, N, N)
    assert jnp.allclose(out, ref_out, atol=1e-4, rtol=1e-4), "testing output mismatch"
    assert jnp.allclose(out_f32, ref_out, atol=1e-4, rtol=1e-4), "fp32 inference mismatch"
    assert jnp.allclose(attn_weight, ref_weight, atol=1e-5, rtol=1e-4), "weight mismatch"
    # bf16 MXU inputs: compare against the fp32 reference with a looser tolerance.
    assert jnp.allclose(out_bf16, ref_out, atol=2e-2, rtol=2e-2), "bf16 inference mismatch"

    print("KERNEL_OK")
</pallas_src>

<mosaic_0001>
module attributes {stable_mosaic.version = 11 : i64} {
  func.func @probe(%arg0: i32, %arg1: i32, %arg2: memref<1x8x128xf32, #tpu.memory_space<vmem>>, %arg3: memref<1x1x8x128xf32, #tpu.memory_space<vmem>>, %arg4: memref<8x128xf32, #tpu.memory_space<vmem>>) attributes {dimension_semantics = [#tpu.dimension_semantics<core_parallel>, #tpu.dimension_semantics<arbitrary>], iteration_bounds = array<i64: 2, 2>, scalar_prefetch = 0 : i64, scratch_operands = 1 : i64, tpu.core_type = #tpu.core_type<tc>, window_params = [{transform_indices = @transform_0, window_bounds = array<i64: 1, 8, 128>}, {transform_indices = @transform_1, window_bounds = array<i64: 1, 1, 8, 128>}]} {
    %c0_i32 = arith.constant 0 : i32
    %0 = arith.cmpi eq, %arg1, %c0_i32 : i32
    %1 = arith.extui %0 : i1 to i32
    %c0_i32_0 = arith.constant 0 : i32
    %2 = arith.cmpi ne, %1, %c0_i32_0 : i32
    scf.if %2 {
      %c0_6 = arith.constant 0 : index
      %c0_7 = arith.constant 0 : index
      %c0_8 = arith.constant 0 : index
      %10 = vector.load %arg2[%c0_6, %c0_7, %c0_8] : memref<1x8x128xf32, #tpu.memory_space<vmem>>, vector<1x8x128xf32>
      %11 = vector.shape_cast %10 : vector<1x8x128xf32> to vector<8x128xf32>
      %c0_9 = arith.constant 0 : index
      %c0_10 = arith.constant 0 : index
      %12 = vector.load %arg4[%c0_9, %c0_10] : memref<8x128xf32, #tpu.memory_space<vmem>>, vector<8x128xf32>
      tpu.vector_store %arg4[%c0_9, %c0_10], %11 {strides = array<i32>} : memref<8x128xf32, #tpu.memory_space<vmem>>, vector<8x128xf32>,
    } else {
    }
    %c0 = arith.constant 0 : index
    %c0_1 = arith.constant 0 : index
    %3 = vector.load %arg4[%c0, %c0_1] : memref<8x128xf32, #tpu.memory_space<vmem>>, vector<8x128xf32>
    %4 = arith.sitofp %arg1 : i32 to f32
    %5 = vector.broadcast %4 : f32 to vector<8x128xf32>
    %6 = arith.addf %3, %5 : vector<8x128xf32>
    %c0_2 = arith.constant 0 : index
    %c0_3 = arith.constant 0 : index
    %c0_4 = arith.constant 0 : index
    %c0_5 = arith.constant 0 : index
    %7 = vector.load %arg3[%c0_2, %c0_3, %c0_4, %c0_5] : memref<1x1x8x128xf32, #tpu.memory_space<vmem>>, vector<1x1x8x128xf32>
    %8 = vector.shape_cast %7 : vector<1x1x8x128xf32> to vector<8x128xf32>
    %9 = vector.shape_cast %6 : vector<8x128xf32> to vector<1x1x8x128xf32>
    tpu.vector_store %arg3[%c0_2, %c0_3, %c0_4, %c0_5], %9 {strides = array<i32>} : memref<1x1x8x128xf32, #tpu.memory_space<vmem>>, vector<1x1x8x128xf32>,
    return
  }
  func.func @transform_0(%arg0: i32, %arg1: i32) -> (i32, i32, i32) {
    %c0_i32 = arith.constant 0 : i32
    %c0_i32_0 = arith.constant 0 : i32
    %c0_i32_1 = arith.constant 0 : i32
    return %arg0, %c0_i32, %c0_i32_0 : i32, i32, i32
  }
  func.func @transform_1(%arg0: i32, %arg1: i32) -> (i32, i32, i32, i32) {
    %c0_i32 = arith.constant 0 : i32
    %c0_i32_0 = arith.constant 0 : i32
    %c0_i32_1 = arith.constant 0 : i32
    return %arg0, %arg1, %c0_i32, %c0_i32_0 : i32, i32, i32, i32
  }
}

module attributes {stable_mosaic.version = 11 : i64} {
  func.func @_fused_nonlocal_kernel(%arg0: i32, %arg1: i32, %arg2: memref<1x32x256xf32, #tpu.memory_space<vmem>>, %arg3: memref<1x128x256xf32, #tpu.memory_space<vmem>>, %arg4: memref<96x32xf32, #tpu.memory_space<vmem>>, %arg5: memref<160x1xf32, #tpu.memory_space<vmem>>, %arg6: memref<16x32xf32, #tpu.memory_space<vmem>>, %arg7: memref<16x16xf32, #tpu.memory_space<vmem>>, %arg8: memref<32x16xf32, #tpu.memory_space<vmem>>, %arg9: memref<1x32x128xf32, #tpu.memory_space<vmem>>, %arg10: memref<1x4x128x256xf32, #tpu.memory_space<vmem>>, %arg11: memref<3x4x8x256xf32, #tpu.memory_space<vmem>>) attributes {dimension_semantics = [#tpu.dimension_semantics<parallel>, #tpu.dimension_semantics<arbitrary>], iteration_bounds = array<i64: 2, 2>, scalar_prefetch = 0 : i64, scratch_operands = 1 : i64, tpu.core_type = #tpu.core_type<tc>, window_params = [{transform_indices = @transform_0, window_bounds = array<i64: 1, 32, 256>}, {transform_indices = @transform_1, window_bounds = array<i64: 1, 128, 256>}, {pipeline_mode = #tpu.pipeline_mode<synchronous>, transform_indices = @transform_2, window_bounds = array<i64: 96, 32>}, {pipeline_mode = #tpu.pipeline_mode<synchronous>, transform_indices = @transform_3, window_bounds = array<i64: 160, 1>}, {pipeline_mode = #tpu.pipeline_mode<synchronous>, transform_indices = @transform_4, window_bounds = array<i64: 16, 32>}, {pipeline_mode = #tpu.pipeline_mode<synchronous>, transform_indices = @transform_5, window_bounds = array<i64: 16, 16>}, {pipeline_mode = #tpu.pipeline_mode<synchronous>, transform_indices = @transform_6, window_bounds = array<i64: 32, 16>}, {transform_indices = @transform_7, window_bounds = array<i64: 1, 32, 128>}, {transform_indices = @transform_8, window_bounds = array<i64: 1, 4, 128, 256>}]} {
    %c0 = arith.constant 0 : index
    %c0_0 = arith.constant 0 : index
    %0 = vector.load %arg5[%c0, %c0_0] : memref<160x1xf32, #tpu.memory_space<vmem>>, vector<96x1xf32>
    %c96 = arith.constant 96 : index
    %c0_1 = arith.constant 0 : index
    %1 = vector.load %arg5[%c96, %c0_1] : memref<160x1xf32, #tpu.memory_space<vmem>>, vector<16x1xf32>
    %c112 = arith.constant 112 : index
    %c0_2 = arith.constant 0 : index
    %2 = vector.load %arg5[%c112, %c0_2] : memref<160x1xf32, #tpu.memory_space<vmem>>, vector<16x1xf32>
    %c128 = arith.constant 128 : index
    %c0_3 = arith.constant 0 : index
    %3 = vector.load %arg5[%c128, %c0_3] : memref<160x1xf32, #tpu.memory_space<vmem>>, vector<32x1xf32>
    %c0_i32 = arith.constant 0 : i32
    %4 = arith.cmpi eq, %arg1, %c0_i32 : i32
    %5 = arith.extui %4 : i1 to i32
    %c0_i32_4 = arith.constant 0 : i32
    %6 = arith.cmpi ne, %5, %c0_i32_4 : i32
    scf.if %6 {
      %c0_40 = arith.constant 0 : index
      %c0_41 = arith.constant 0 : index
      %60 = vector.load %arg4[%c0_40, %c0_41] : memref<96x32xf32, #tpu.memory_space<vmem>>, vector<96x32xf32>
      %c0_42 = arith.constant 0 : index
      %c0_43 = arith.constant 0 : index
      %c0_44 = arith.constant 0 : index
      %61 = vector.load %arg2[%c0_42, %c0_43, %c0_44] : memref<1x32x256xf32, #tpu.memory_space<vmem>>, vector<1x32x256xf32>
      %62 = vector.shape_cast %61 : vector<1x32x256xf32> to vector<32x256xf32>
      %cst_45 = arith.constant dense<0.000000e+00> : vector<96x256xf32>
      %63 = tpu.matmul %60, %62, %cst_45 {dimension_numbers = #tpu.dot_dimension_numbers<[1], [0], [0], [1], [0, 0, 1, 1], [], []>} : vector<96x32xf32>, vector<32x256xf32>, vector<96x256xf32> -> vector<96x256xf32>
      %64 = vector.broadcast %0 : vector<96x1xf32> to vector<96x256xf32>
      %65 = arith.addf %63, %64 : vector<96x256xf32>
      %66 = vector.shape_cast %65 : vector<96x256xf32> to vector<3x4x8x256xf32>
      %c0_46 = arith.constant 0 : index
      %c0_47 = arith.constant 0 : index
      %c0_48 = arith.constant 0 : index
      %c0_49 = arith.constant 0 : index
      %67 = vector.load %arg11[%c0_46, %c0_47, %c0_48, %c0_49] : memref<3x4x8x256xf32, #tpu.memory_space<vmem>>, vector<3x4x8x256xf32>
      tpu.vector_store %arg11[%c0_46, %c0_47, %c0_48, %c0_49], %66 {strides = array<i32>} : memref<3x4x8x256xf32, #tpu.memory_space<vmem>>, vector<3x4x8x256xf32>,
    } else {
    }
    %c128_i32 = arith.constant 128 : i32
    %7 = arith.muli %arg1, %c128_i32 : i32
    %8 = tpu.assume_multiple %7, 128 : i32
    %c0_5 = arith.constant 0 : index
    %c0_6 = arith.constant 0 : index
    %c0_7 = arith.constant 0 : index
    %9 = arith.index_cast %8 : i32 to index
    %10 = vector.load %arg11[%c0_5, %c0_6, %c0_7, %9] : memref<3x4x8x256xf32, #tpu.memory_space<vmem>>, vector<1x4x8x128xf32>
    %11 = vector.shape_cast %10 : vector<1x4x8x128xf32> to vector<4x8x128xf32>
    %c1 = arith.constant 1 : index
    %c0_8 = arith.constant 0 : index
    %c0_9 = arith.constant 0 : index
    %c0_10 = arith.constant 0 : index
    %12 = vector.load %arg11[%c1, %c0_8, %c0_9, %c0_10] : memref<3x4x8x256xf32, #tpu.memory_space<vmem>>, vector<1x4x8x256xf32>
    %13 = vector.shape_cast %12 : vector<1x4x8x256xf32> to vector<4x8x256xf32>
    %c2 = arith.constant 2 : index
    %c0_11 = arith.constant 0 : index
    %c0_12 = arith.constant 0 : index
    %c0_13 = arith.constant 0 : index
    %14 = vector.load %arg11[%c2, %c0_11, %c0_12, %c0_13] : memref<3x4x8x256xf32, #tpu.memory_space<vmem>>, vector<1x4x8x256xf32>
    %15 = vector.shape_cast %14 : vector<1x4x8x256xf32> to vector<4x8x256xf32>
    %cst = arith.constant dense<0.000000e+00> : vector<4x128x256xf32>
    %16 = tpu.matmul %11, %13, %cst {dimension_numbers = #tpu.dot_dimension_numbers<[1], [1], [2], [2], [0, 0, 0, 2, 1, 2], [0], [0]>} : vector<4x8x128xf32>, vector<4x8x256xf32>, vector<4x128x256xf32> -> vector<4x128x256xf32>
    %c0_14 = arith.constant 0 : index
    %c0_15 = arith.constant 0 : index
    %c0_16 = arith.constant 0 : index
    %17 = vector.load %arg3[%c0_14, %c0_15, %c0_16] : memref<1x128x256xf32, #tpu.memory_space<vmem>>, vector<1x128x256xf32>
    %18 = vector.shape_cast %17 : vector<1x128x256xf32> to vector<128x256xf32>
    %19 = vector.shape_cast %18 : vector<128x256xf32> to vector<1x128x256xf32>
    %20 = vector.broadcast %19 : vector<1x128x256xf32> to vector<4x128x256xf32>
    %21 = arith.mulf %20, %16 : vector<4x128x256xf32>
    %cst_17 = arith.constant dense<0xFF800000> : vector<4x128xf32>
    %22 = vector.multi_reduction <maximumf>, %21, %cst_17 [2] : vector<4x128x256xf32> to vector<4x128xf32>
    %23 = vector.shape_cast %22 : vector<4x128xf32> to vector<4x128x1xf32>
    %24 = vector.broadcast %23 : vector<4x128x1xf32> to vector<4x128x256xf32>
    %25 = arith.subf %21, %24 : vector<4x128x256xf32>
    %26 = math.exp %25 : vector<4x128x256xf32>
    %cst_18 = arith.constant dense<0.000000e+00> : vector<4x128xf32>
    %27 = vector.multi_reduction <add>, %26, %cst_18 [2] : vector<4x128x256xf32> to vector<4x128xf32>
    %28 = vector.shape_cast %27 : vector<4x128xf32> to vector<4x128x1xf32>
    %29 = tpu.reciprocal %28 : vector<4x128x1xf32> -> vector<4x128x1xf32>
    %30 = vector.broadcast %29 : vector<4x128x1xf32> to vector<4x128x256xf32>
    %31 = arith.mulf %26, %30 : vector<4x128x256xf32>
    %c0_19 = arith.constant 0 : index
    %c0_20 = arith.constant 0 : index
    %c0_21 = arith.constant 0 : index
    %c0_22 = arith.constant 0 : index
    %32 = vector.load %arg10[%c0_19, %c0_20, %c0_21, %c0_22] : memref<1x4x128x256xf32, #tpu.memory_space<vmem>>, vector<1x4x128x256xf32>
    %33 = vector.shape_cast %32 : vector<1x4x128x256xf32> to vector<4x128x256xf32>
    %34 = vector.shape_cast %31 : vector<4x128x256xf32> to vector<1x4x128x256xf32>
    tpu.vector_store %arg10[%c0_19, %c0_20, %c0_21, %c0_22], %34 {strides = array<i32>} : memref<1x4x128x256xf32, #tpu.memory_space<vmem>>, vector<1x4x128x256xf32>,
    %cst_23 = arith.constant dense<0.000000e+00> : vector<4x8x128xf32>
    %35 = tpu.matmul %15, %31, %cst_23 {dimension_numbers = #tpu.dot_dimension_numbers<[2], [2], [1], [1], [0, 0, 0, 1, 1, 1], [0], [0]>} : vector<4x8x256xf32>, vector<4x128x256xf32>, vector<4x8x128xf32> -> vector<4x8x128xf32>
    %36 = vector.shape_cast %35 : vector<4x8x128xf32> to vector<32x128xf32>
    %c0_24 = arith.constant 0 : index
    %c0_25 = arith.constant 0 : index
    %37 = vector.load %arg6[%c0_24, %c0_25] : memref<16x32xf32, #tpu.memory_space<vmem>>, vector<16x32xf32>
    %cst_26 = arith.constant dense<0.000000e+00> : vector<16x128xf32>
    %38 = tpu.matmul %37, %36, %cst_26 {dimension_numbers = #tpu.dot_dimension_numbers<[1], [0], [0], [1], [0, 0, 1, 1], [], []>} : vector<16x32xf32>, vector<32x128xf32>, vector<16x128xf32> -> vector<16x128xf32>
    %39 = vector.broadcast %1 : vector<16x1xf32> to vector<16x128xf32>
    %40 = arith.addf %38, %39 : vector<16x128xf32>
    %cst_27 = arith.constant 0.000000e+00 : f32
    %41 = vector.broadcast %cst_27 : f32 to vector<16x128xf32>
    %42 = arith.maximumf %40, %41 : vector<16x128xf32>
    %c0_28 = arith.constant 0 : index
    %c0_29 = arith.constant 0 : index
    %43 = vector.load %arg7[%c0_28, %c0_29] : memref<16x16xf32, #tpu.memory_space<vmem>>, vector<16x16xf32>
    %cst_30 = arith.constant dense<0.000000e+00> : vector<16x128xf32>
    %44 = tpu.matmul %43, %42, %cst_30 {dimension_numbers = #tpu.dot_dimension_numbers<[1], [0], [0], [1], [0, 0, 1, 1], [], []>} : vector<16x16xf32>, vector<16x128xf32>, vector<16x128xf32> -> vector<16x128xf32>
    %45 = vector.broadcast %2 : vector<16x1xf32> to vector<16x128xf32>
    %46 = arith.addf %44, %45 : vector<16x128xf32>
    %cst_31 = arith.constant 0.000000e+00 : f32
    %47 = vector.broadcast %cst_31 : f32 to vector<16x128xf32>
    %48 = arith.maximumf %46, %47 : vector<16x128xf32>
    %c0_32 = arith.constant 0 : index
    %c0_33 = arith.constant 0 : index
    %49 = vector.load %arg8[%c0_32, %c0_33] : memref<32x16xf32, #tpu.memory_space<vmem>>, vector<32x16xf32>
    %cst_34 = arith.constant dense<0.000000e+00> : vector<32x128xf32>
    %50 = tpu.matmul %49, %48, %cst_34 {dimension_numbers = #tpu.dot_dimension_numbers<[1], [0], [0], [1], [0, 0, 1, 1], [], []>} : vector<32x16xf32>, vector<16x128xf32>, vector<32x128xf32> -> vector<32x128xf32>
    %51 = vector.broadcast %3 : vector<32x1xf32> to vector<32x128xf32>
    %52 = arith.addf %50, %51 : vector<32x128xf32>
    %c0_35 = arith.constant 0 : index
    %c0_36 = arith.constant 0 : index
    %53 = arith.index_cast %8 : i32 to index
    %54 = vector.load %arg2[%c0_35, %c0_36, %53] : memref<1x32x256xf32, #tpu.memory_space<vmem>>, vector<1x32x128xf32>
    %55 = vector.shape_cast %54 : vector<1x32x128xf32> to vector<32x128xf32>
    %56 = arith.addf %55, %52 : vector<32x128xf32>
    %c0_37 = arith.constant 0 : index
    %c0_38 = arith.constant 0 : index
    %c0_39 = arith.constant 0 : index
    %57 = vector.load %arg9[%c0_37, %c0_38, %c0_39] : memref<1x32x128xf32, #tpu.memory_space<vmem>>, vector<1x32x128xf32>
    %58 = vector.shape_cast %57 : vector<1x32x128xf32> to vector<32x128xf32>
    %59 = vector.shape_cast %56 : vector<32x128xf32> to vector<1x32x128xf32>
    tpu.vector_store %arg9[%c0_37, %c0_38, %c0_39], %59 {strides = array<i32>} : memref<1x32x128xf32, #tpu.memory_space<vmem>>, vector<1x32x128xf32>,
    return
  }
  func.func @transform_0(%arg0: i32, %arg1: i32) -> (i32, i32, i32) {
    %c0_i32 = arith.constant 0 : i32
    %c0_i32_0 = arith.constant 0 : i32
    %c0_i32_1 = arith.constant 0 : i32
    return %arg0, %c0_i32, %c0_i32_0 : i32, i32, i32
  }
  func.func @transform_1(%arg0: i32, %arg1: i32) -> (i32, i32, i32) {
    %c0_i32 = arith.constant 0 : i32
    %c0_i32_0 = arith.constant 0 : i32
    return %arg0, %arg1, %c0_i32 : i32, i32, i32
  }
  func.func @transform_2(%arg0: i32, %arg1: i32) -> (i32, i32) {
    %c0_i32 = arith.constant 0 : i32
    %c0_i32_0 = arith.constant 0 : i32
    %c0_i32_1 = arith.constant 0 : i32
    return %c0_i32, %c0_i32_0 : i32, i32
  }
  func.func @transform_3(%arg0: i32, %arg1: i32) -> (i32, i32) {
    %c0_i32 = arith.constant 0 : i32
    %c0_i32_0 = arith.constant 0 : i32
    %c0_i32_1 = arith.constant 0 : i32
    return %c0_i32, %c0_i32_0 : i32, i32
  }
  func.func @transform_4(%arg0: i32, %arg1: i32) -> (i32, i32) {
    %c0_i32 = arith.constant 0 : i32
    %c0_i32_0 = arith.constant 0 : i32
    %c0_i32_1 = arith.constant 0 : i32
    return %c0_i32, %c0_i32_0 : i32, i32
  }
  func.func @transform_5(%arg0: i32, %arg1: i32) -> (i32, i32) {
    %c0_i32 = arith.constant 0 : i32
    %c0_i32_0 = arith.constant 0 : i32
    %c0_i32_1 = arith.constant 0 : i32
    return %c0_i32, %c0_i32_0 : i32, i32
  }
  func.func @transform_6(%arg0: i32, %arg1: i32) -> (i32, i32) {
    %c0_i32 = arith.constant 0 : i32
    %c0_i32_0 = arith.constant 0 : i32
    %c0_i32_1 = arith.constant 0 : i32
    return %c0_i32, %c0_i32_0 : i32, i32
  }
  func.func @transform_7(%arg0: i32, %arg1: i32) -> (i32, i32, i32) {
    %c0_i32 = arith.constant 0 : i32
    %c0_i32_0 = arith.constant 0 : i32
    return %arg0, %c0_i32, %arg1 : i32, i32, i32
  }
  func.func @transform_8(%arg0: i32, %arg1: i32) -> (i32, i32, i32, i32) {
    %c0_i32 = arith.constant 0 : i32
    %c0_i32_0 = arith.constant 0 : i32
    %c0_i32_1 = arith.constant 0 : i32
    return %arg0, %c0_i32, %arg1, %c0_i32_0 : i32, i32, i32, i32
  }
}

</mosaic_0001>

<bundles_post_ra>
// kernel: _forward_jit.1
= control target key start
LH: loop header
LB: loop body
LE: loop exit
PB: predicated region body
PF: predicated region fallthrough
CT: control target
= control target key end

     0   :  { %s7222_s0 = inlined_call_operand.hbm [shape: f32[2,32,256], index: 0, kind: input, shape index: {}]   ;;  %s7223_s1 = inlined_call_operand.hbm [shape: f32[2,256,256], index: 1, kind: input, shape index: {}]   ;;  %s7224_s2 = inlined_call_operand.vmem [shape: f32[96,32], index: 2, kind: input, shape index: {}]   ;;  %s7225_s3 = inlined_call_operand.vmem [shape: f32[160,1], index: 3, kind: input, shape index: {}]   ;;  %s7226_s4 = inlined_call_operand.vmem [shape: f32[16,32], index: 4, kind: input, shape index: {}]   ;;  %s7227_s5 = inlined_call_operand.vmem [shape: f32[16,16], index: 5, kind: input, shape index: {}]   ;;  %s7228_s6 = inlined_call_operand.vmem [shape: f32[32,16], index: 6, kind: input, shape index: {}]   ;;  %s7229_s7 = inlined_call_operand.hbm [shape: f32[2,32,256], index: 7, kind: output, shape index: {0}]   ;;  %s7230_s8 = inlined_call_operand.hbm [shape: f32[2,4,256,256], index: 8, kind: output, shape index: {1}]  }
   0x1   :  { %7448 = sst [smem:[#allocation130_spill]] %s7222_s0 }
   0x2   :  { %7449 = sst [smem:[#allocation131_spill]] %s7223_s1 }
   0x3   :  { %7450 = sst [smem:[#allocation132_spill]] %s7224_s2 }
   0x4   :  { %7451 = sst [smem:[#allocation133_spill]] %s7225_s3 }
   0x5   :  { %7452 = sst [smem:[#allocation134_spill]] %s7226_s4 }
   0x6   :  { %7453 = sst [smem:[#allocation135_spill]] %s7227_s5 }
   0x7   :  { %7454 = sst [smem:[#allocation136_spill]] %s7228_s6 }
   0x8   :  { %7455 = sst [smem:[#allocation137_spill]] %s7229_s7 }
   0x9   :  { %7456 = sst [smem:[#allocation138_spill]] %s7230_s8 }
   0xa   :  { %14 = vsyncpa [#allocation4], 0 }
   0xb   :  { %16 = vsyncpa [#allocation4 + $0x1], 0 }
   0xc   :  { %17 = vsyncpa [#allocation7], 0 }
   0xd   :  { %19 = vsyncpa [#allocation7 + $0x1], 0 }
   0xe   :  { %20 = vsyncpa [#allocation5], 0 }
   0xf   :  { %22 = vsyncpa [#allocation5 + $0x1], 0 }
  0x10   :  { %23 = vsyncpa [#allocation10], 0 }
  0x11   :  { %25 = vsyncpa [#allocation10 + $0x1], 0  ;;  %s4700_s27 = smov 0   ;;  %s4702_s28 = smov 0  }
  0x12   :  { %s4704_s29 = smov 0   ;;  %s4706_s30 = smov 0  }
  0x13   :  { %s4708_s9 = smov 0   ;;  %s4710_s10 = smov 0  }
  0x14   :  { %s4712_s11 = smov 0   ;;  %s4714_s12 = smov 0  }
  0x15   :  { %s4716_s13 = smov 0   ;;  %s4718_s14 = smov 0  }
  0x16   :  { %s4720_s15 = smov 0  }
  0x17 LB: > { %7457 = sst [smem:[#allocation17_spill]] %s4595_s27  ;;  %s7231_s16 = sadd.s32 4294967295, %s4635_s15   ;;  %s4635_s15 = sphi %s4720_s15, %s31_s15   ;;  %s4631_s14 = sphi %s4718_s14, %s7944_s14   ;;  %s4627_s13 = sphi %s4716_s13, %s7943_s13   ;;  %s4623_s12 = sphi %s4714_s12, %s7942_s12   ;;  %s4619_s11 = sphi %s4712_s11, %s7941_s11   ;;  %s4615_s10 = sphi %s4710_s10, %s7940_s10   ;;  %s4611_s9 = sphi %s4708_s9, %s7939_s9   ;;  %s4607_s30 = sphi %s4706_s30, %s7938_s30   ;;  %s4603_s29 = sphi %s4704_s29, %s7937_s29   ;;  %s4599_s28 = sphi %s4702_s28, %s7936_s28   ;;  %s4595_s27 = sphi %s4700_s27, %s7935_s27  }
  0x18   : > { %7458 = sst [smem:[#allocation18_spill]] %s4619_s11  ;;  %p57_p0 = scmp.ne.s32.totalorder %s4615_s10, %s4611_s9 }
  0x19   : > { %7459 = sst [smem:[#allocation19_spill]] %s4623_s12  ;;  %p58_p1 = scmp.eq.s32.totalorder %s4635_s15, 0 }
  0x1a   : > { %p63_p2 = scmp.ne.s32.totalorder %s4611_s9, %s4607_s30  ;;  %p4762_p3 = scmp.eq.s32.totalorder %s7231_s16, 0 }
  0x1b   : > { %p59_p4 = por %p58_p1, %p57_p0  ;;  %p3958_p5 = scmp.lt.s32.totalorder %s4635_s15, 4 }
  0x1c   : > { %p4771_p6 = por %p4762_p3, %p63_p2  ;;  %s291_s21 = sand.u32 1, %s4615_s10  }
  0x1d   : > { %s3764_s22 = sshll.u32 %s291_s21, 6  ;;  %s3875_s23 = sshll.u32 %s4631_s14, 10 }
  0x1e   : > { %s7462_s0 = sld [smem:[#allocation130_spill]]  ;;  %s295_s30 = scalar_lea.vmem [#allocation3], %s3764_s22 }
  0x1f   : > { %s302_s18 = sshll.u32 %s295_s30, 4  ;;  %p4782_p7 = pnand %p3958_p5, %p59_p4  ;;  %s303_s18 = int_to_ptr.vmem [resolvable:$true] %s302_s18 }
  0x20   : > { %p3772_p8 = scmp.ge.s32.totalorder %s4635_s15, 1  ;;  %s292_s17 = scalar_lea.sflag [#allocation4], %s291_s21 }
  0x21   : > { %p4453_p9 = pneg %p4782_p7  ;;  %s4464_s8 = scalar_lea.vmem %s303_s18, 1024 }
  0x22   : > { %p4465_p10 = scmp.ne.s32.totalorder %s303_s18, %s4464_s8  ;;  %s4637_s7 = smov [#allocation3]  }
  0x23   : > { %s4469_s24 = sshll.u32 %s4637_s7, 4  ;;  %s4470_s24 = int_to_ptr.vmem [resolvable:$false] %s4469_s24 }
  0x24   : > { %s301_s26 = scalar_lea.hbm %s7462_s0, %s3875_s23  ;;  %p4467_p11 = pnand %p4465_p10, %p4453_p9 }
  0x25   : > { %s4471_s22 = scalar_lea.vmem %s4470_s24, 2048  ;;  %p4472_p13 = scmp.lt.s32.totalorder %s303_s18, %s4470_s24 }
  0x26   : > { %p4468_p12 = pneg %p4467_p11  ;;  %p4473_p0 = scmp.lt.s32.totalorder %s4471_s22, %s4464_s8 }
  0x28   : > { %p4474_p2 = por %p4473_p0, %p4472_p13 }
  0x2a   : > { %p4475_p4 = pnand %p4474_p2, %p4468_p12 }
  0x2c   : > { %4478 = shalt.err (!%p4475_p4)
}
  0x2d   : > { %s7233_s23 = smov 256   ;;  %s7234_s7 = smov 16  }
  0x2e   : > { %3947 = dma.hbm_to_vmem [thread:$0]  (!%p4782_p7), %s301_s26, 1024, %s303_s18, %s292_s17, %s7233_s23, %s7233_s23, %s7234_s7  }
  0x2f   : > { %p334_p9 = scmp.lt.s32.totalorder %s4635_s15, 5  ;;  %s3761_s21 = sadd.s32 4294967294, %s4635_s15  }
  0x30   : > { %s40_s25 = sadd.s32 1, %s4627_s13  ;;  %s78_s30 = sadd.s32 1, %s4603_s29 }
  0x31   : > { %p4797_p10 = pnand %p3772_p8, %p334_p9  ;;  %p41_p11 = scmp.ge.s32.totalorder %s40_s25, 2 }
  0x32   : > { %p85_p12 = scmp.ne.s32.totalorder %s4603_s29, %s4599_s28  ;;  %p91_p13 = scmp.ne.s32.totalorder %s4599_s28, %s4595_s27 }
  0x33   : > { %s7946_s25 = smov (%p41_p11, %s40_s25), 0  ;;  %s7466_s16 = sadd.s32 1, %s4631_s14 }
  0x34   : > { %7465 = sst [smem:[#allocation20_spill]] %s7946_s25  ;;  %s7948_s16 = smov (!%p41_p11, %s7466_s16), %s4631_s14 }
  0x35   : > { %s74_s17 = ssub.s32 %s4627_s13, %s7946_s25  ;;  %p4817_p7 = por %p85_p12, %p58_p1 }
  0x36   : > { %p45_p8 = scmp.ge.s32.totalorder %s7948_s16, 2  ;;  %p4823_p0 = por %p91_p13, %p4762_p3 }
  0x37   : > { %s7469_s24 = sadd.s32 4294967295, %s4635_s15   ;;  %p228_p4 = scmp.eq.s32.totalorder %s3761_s21, 3 }
  0x38   : > { %p222_p2 = scmp.eq.s32.totalorder %s7469_s24, 3  ;;  %s7950_s16 = smov (%p45_p8, %s7948_s16), 0 }
  0x39   : > { %7470 = sst [smem:[#allocation21_spill]] %s7950_s16  ;;  %p4835_p1 = por %p228_p4, %p91_p13 }
  0x3a   : > { %p4831_p9 = por %p222_p2, %p85_p12  ;;  %s47_s19 = ssub.s32 %s4631_s14, %s7950_s16 }
  0x3b   : > { %s7473_s23 = scalar_select %p4835_p1, 1, 0 }
  0x3c   : > { %s7471_s22 = scalar_select %p4831_p9, 1, 0 }
  0x3d   : > { %7474 = sst [smem:[#allocation23_spill]] %s7473_s23  ;;  %s312_s7 = sand.u32 1, %s4603_s29  }
  0x3e   : > { %7472 = sst [smem:[#allocation22_spill]] %s7471_s22  ;;  %p48_p3 = scmp.eq.s32.totalorder %s47_s19, 0 }
  0x3f   : > { %s75_s0 = sor.u32 %s74_s17, %s47_s19  ;;  %s7475_s24 = sadd.s32 1, %s4615_s10 }
  0x40   : > { %p76_p11 = scmp.eq.s32.totalorder %s75_s0, 0  ;;  %s3767_s27 = sshll.u32 %s312_s7, 8 }
  0x41   : > { %s4845_s21 = scalar_select %p48_p3, %s4615_s10, %s7475_s24  }
  0x42   : > { %s4848_s25 = scalar_select %p76_p11, %s4603_s29, %s78_s30  }
  0x43   : > { %s3876_s12 = sshll.u32 %s4627_s13, 5  ;;  %s3770_s6 = sshll.u32 %s4631_s14, 6 }
  0x44   : > { %s323_s22 = sadd.s32 %s3876_s12, %s3770_s6  ;;  %s316_s5 = scalar_lea.vmem [#allocation6], %s3767_s27 }
  0x45   : > { %s326_s4 = sshll.u32 %s316_s5, 4  ;;  %s3771_s2 = sshll.u32 %s323_s22, 7  ;;  %s327_s4 = int_to_ptr.vmem [resolvable:$true] %s326_s4 }
  0x46   : > { %s7476_s1 = sld [smem:[#allocation131_spill]]  ;;  %p4859_p12 = pnand %p3958_p5, %p4817_p7 }
  0x47   : > { %s313_s30 = scalar_lea.sflag [#allocation7], %s312_s7  ;;  %s4492_s17 = scalar_lea.vmem %s327_s4, 4096 }
  0x48   : > { %p4481_p13 = pneg %p4859_p12  ;;  %p4493_p8 = scmp.ne.s32.totalorder %s327_s4, %s4492_s17 }
  0x49   : > { %s4640_s5 = smov [#allocation6]  }
  0x4a   : > { %p4495_p2 = pnand %p4493_p8, %p4481_p13  ;;  %s4497_s6 = sshll.u32 %s4640_s5, 4  ;;  %s4498_s6 = int_to_ptr.vmem [resolvable:$false] %s4497_s6 }
  0x4b   : > { %s4499_s27 = scalar_lea.vmem %s4498_s6, 8192  ;;  %p4500_p3 = scmp.lt.s32.totalorder %s327_s4, %s4498_s6 }
  0x4c   : > { %s325_s11 = scalar_lea.hbm %s7476_s1, %s3771_s2  ;;  %p4496_p4 = pneg %p4495_p2 }
  0x4d   : > { %p4501_p11 = scmp.lt.s32.totalorder %s4499_s27, %s4492_s17 }
  0x4f   : > { %p4502_p1 = por %p4501_p11, %p4500_p3 }
  0x51   : > { %p4503_p9 = pnand %p4502_p1, %p4496_p4 }
  0x53   : > { %4506 = shalt.err (!%p4503_p9)
}
  0x54   : > { %s7478_s2 = smov 16   ;;  %s7479_s12 = smov 256  }
  0x55   : > { %3950 = dma.hbm_to_vmem [thread:$0]  (!%p4859_p12), %s325_s11, 4096, %s327_s4, %s313_s30, %s7479_s12, %s7479_s12, %s7478_s2  }
  0x56   : > { %338 = sbr.rel (%p4797_p10) target bundleno = 2094 (0x82e), region = 48 }
  0x5b   : > { %s340_s23 = sand.u32 1, %s4611_s9  }
  0x5c   : > { %s3773_s7 = sshll.u32 %s340_s23, 6  ;;  %s341_s16 = scalar_lea.sflag [#allocation4], %s340_s23 }
  0x5d   : > { %s4873_s18 = scalar_lea.vmem [#allocation3], %s3773_s7 }
  0x5e   : > { %4578 = dma.done.wait (%p4771_p6), %s341_s16, 1024  }
  0x5f   : > { %4580 = vsyncadd (%p4771_p6), %s341_s16, 4294966272  ;;  %s4880_s22 = sand.u32 1, %s4599_s28  }
  0x60   : > { %s3774_s4 = sshll.u32 %s4880_s22, 8  ;;  %s350_s11 = scalar_lea.sflag [#allocation7], %s4880_s22 }
  0x61   : > { %s4884_s8 = scalar_lea.vmem [#allocation6], %s3774_s4 }
  0x62   : > { %4582 = dma.done.wait (%p4823_p0), %s350_s11, 4096  }
  0x63   : > { %4584 = vsyncadd (%p4823_p0), %s350_s11, 4294963200  ;;  %s3775_s19 = sshll.u32 %s4880_s22, 5  ;;  %s3776_s20 = sshll.u32 %s4880_s22, 10 }
  0x64   : > { %s7480_s3 = sld [smem:[#allocation133_spill]]  ;;  %s4990_s23 = scalar_lea.vmem [#allocation8], %s3775_s19 }
  0x65   : > { %s4992_s7 = scalar_lea.vmem [#allocation9], %s3776_s20  ;;  %s7489_s16 = sld [smem:[#allocation18_spill]] }
  0x6a   : > { %v4895_v0 = vld [vmem:[%s7480_s3] sm:$0xff]  ;;  %v4900_v1 = vld [vmem:[%s7480_s3 + $0x8] sm:$0xff]  ;;  %v400_v2 = vld [vmem:[%s7480_s3 + $0x10] sm:$0xff] }
  0x6b   : > { %v4908_v3 = vld [vmem:[%s7480_s3 + $0x18] sm:$0xff]  ;;  %v4913_v4 = vld [vmem:[%s7480_s3 + $0x20] sm:$0xff]  ;;  %v4918_v5 = vld [vmem:[%s7480_s3 + $0x28] sm:$0xff]  ;;  %p3777_p5 = scmp.ne.s32.totalorder %s7489_s16, 0 }
  0x6c   : > { %v4923_v6 = vld [vmem:[%s7480_s3 + $0x30] sm:$0xff]  ;;  %v4928_v7 = vld [vmem:[%s7480_s3 + $0x38] sm:$0xff]  ;;  %v4933_v8 = vld [vmem:[%s7480_s3 + $0x40] sm:$0xff]  ;;  %s7490_s4 = sld [smem:[#allocation132_spill]] (!%p3777_p5) }
  0x6d   : > { %v4938_v9 = vld [vmem:[%s7480_s3 + $0x48] sm:$0xff]  ;;  %v4943_v10 = vld [vmem:[%s7480_s3 + $0x50] sm:$0xff]  ;;  %v4948_v11 = vld [vmem:[%s7480_s3 + $0x58] sm:$0xff] }
  0x6e   : > { %v4953_v12 = vld [vmem:[%s7480_s3 + $0x60] sm:$0xff]  ;;  %v4958_v13 = vld [vmem:[%s7480_s3 + $0x68] sm:$0xff]  ;;  %v4963_v14 = vld [vmem:[%s7480_s3 + $0x70] sm:$0xff]  ;;  %421 = sbr.rel (%p3777_p5) target bundleno = 343 (0x157), region = 60 }
  0x6f   : > { %7481 = vst [vmem:[#allocation24_spill] sm:$0xff] %v4953_v12  ;;  %7482 = vst [vmem:[#allocation25_spill] sm:$0xff] %v4958_v13  ;;  %v4968_v15 = vld [vmem:[%s7480_s3 + $0x78] sm:$0xff]  ;;  %v4973_v16 = vld [vmem:[%s7480_s3 + $0x80] sm:$0xff] }
  0x70   : > { %7483 = vst [vmem:[#allocation26_spill] sm:$0xff] %v4963_v14  ;;  %7484 = vst [vmem:[#allocation27_spill] sm:$0xff] %v4968_v15  ;;  %v4978_v17 = vld [vmem:[%s7480_s3 + $0x88] sm:$0xff]  ;;  %v4983_v18 = vld [vmem:[%s7480_s3 + $0x90] sm:$0xff] }
  0x71   : > { %7485 = vst [vmem:[#allocation28_spill] sm:$0xff] %v4973_v16  ;;  %7486 = vst [vmem:[#allocation29_spill] sm:$0xff] %v4978_v17  ;;  %v4988_v19 = vld [vmem:[%s7480_s3 + $0x98] sm:$0xff] }
  0x72   : > { %7487 = vst [vmem:[#allocation30_spill] sm:$0xff] %v4983_v18  ;;  %7488 = vst [vmem:[#allocation31_spill] sm:$0xff] %v4988_v19 }
  0x73   : > { %v441_v20 = vld [vmem:[%s4873_s18 + $0x38] sm:$0xff]  ;;  %v440_v21 = vld [vmem:[%s4873_s18 + $0x30] sm:$0xff]  ;;  %v439_v22 = vld [vmem:[%s4873_s18 + $0x28] sm:$0xff]  ;;  %vm502_vm0 = vcmask 261120   ;;  %v4641_v30 = vmov 0.0   ;;  %v4642_v33 = vmov 0  }
  0x74   : > { %563 = vmatprep.subr.mxu0 %v441_v20  ;;  %3922 = vmatprep.subr.mxu1 %v441_v20  ;;  %v438_v23 = vld [vmem:[%s4873_s18 + $0x20] sm:$0xff]  ;;  %v437_v24 = vld [vmem:[%s4873_s18 + $0x18] sm:$0xff]  ;;  %v436_v25 = vld [vmem:[%s4873_s18 + $0x10] sm:$0xff] }
  0x75   : > { %564 = vmatpush1.msra.mxu0 %v440_v21  ;;  %3926 = vmatpush1.msra.mxu1 %v440_v21  ;;  %v435_v26 = vld [vmem:[%s4873_s18 + $0x8] sm:$0xff]  ;;  %v434_v27 = vld [vmem:[%s4873_s18] sm:$0xff]  ;;  %v428_v29 = vld [vmem:[%s7490_s4 + $0x30] sm:$0xff] }
  0x76   : > { %565 = vmatprep.subr.mxu0 %v439_v22  ;;  %3923 = vmatprep.subr.mxu1 %v439_v22  ;;  %v422_v28 = vld [vmem:[%s7490_s4] sm:$0xff]  ;;  %v423_v31 = vld [vmem:[%s7490_s4 + $0x8] sm:$0xff]  ;;  %v429_v32 = vld [vmem:[%s7490_s4 + $0x38] sm:$0xff] }
  0x77   : > { %566 = vmatpush1.msra.mxu0 %v438_v23  ;;  %3927 = vmatpush1.msra.mxu1 %v438_v23  ;;  %v424_v34 = vld [vmem:[%s7490_s4 + $0x10] sm:$0xff]  ;;  %v430_v35 = vld [vmem:[%s7490_s4 + $0x40] sm:$0xff]  ;;  %v425_v36 = vld [vmem:[%s7490_s4 + $0x18] sm:$0xff] }
  0x78   : > { %567 = vmatprep.subr.mxu0 %v437_v24  ;;  %3924 = vmatprep.subr.mxu1 %v437_v24  ;;  %v431_v37 = vld [vmem:[%s7490_s4 + $0x48] sm:$0xff]  ;;  %v426_v38 = vld [vmem:[%s7490_s4 + $0x20] sm:$0xff]  ;;  %v432_v39 = vld [vmem:[%s7490_s4 + $0x50] sm:$0xff] }
  0x79   : > { %568 = vmatpush1.msra.mxu0 %v436_v25  ;;  %3928 = vmatpush1.msra.mxu1 %v436_v25  ;;  %v427_v40 = vld [vmem:[%s7490_s4 + $0x28] sm:$0xff]  ;;  %v433_v41 = vld [vmem:[%s7490_s4 + $0x58] sm:$0xff] }
  0x7a   : > { %569 = vmatprep.subr.mxu0 %v435_v26  ;;  %3925 = vmatprep.subr.mxu1 %v435_v26 }
  0x7b   : > { %570 = vmatpush1.msra.mxu0 %v434_v27  ;;  %3929 = vmatpush1.msra.mxu1 %v434_v27 }
  0x7c   : > { %603 = vmatprep.mubr.f32.mxu0 %v4641_v30  ;;  %639 = vmatprep.mubr.f32.mxu1 %v4641_v30 }
  0x7d   : > { %3778 = vmatmul.mubr.msk.f32.vlgmr.msra.gmra.mxu0 %vm502_vm0, %v422_v28  ;;  %3784 = vmatmul.mubr.msk.f32.vlgmr.msra.gmra.mxu1 %vm502_vm0, %v428_v29 }
  0x7e   : > { %609 = vmatprep.mubr.f32.mxu0 %v4641_v30  ;;  %645 = vmatprep.mubr.f32.mxu1 %v4641_v30 }
  0x7f   : > { %4064 = vset.pattern.permute.xlu1 %v4642_v33  ;;  %4063 = vset.pattern.permute.xlu0 %v4642_v33 }
  0x80   : > { %454 = vperm.xlu1 %4064, %v400_v2   ;;  %444 = vperm.xlu0 %4063, %v4895_v0  }
  0x81   : > { %3779 = vmatmul.mubr.msk.f32.gmra.mxu0 %vm502_vm0, %v423_v31  ;;  %3785 = vmatmul.mubr.msk.f32.gmra.mxu1 %vm502_vm0, %v429_v32 }
  0x82   : > { %615 = vmatprep.mubr.f32.mxu0 %v4641_v30  ;;  %651 = vmatprep.mubr.f32.mxu1 %v4641_v30 }
  0x84   : > { %459 = vperm.xlu1 %4064, %v4908_v3   ;;  %449 = vperm.xlu0 %4063, %v4900_v1  }
  0x85   : > { %3780 = vmatmul.mubr.msk.f32.gmra.mxu0 %vm502_vm0, %v424_v34  ;;  %3786 = vmatmul.mubr.msk.f32.gmra.mxu1 %vm502_vm0, %v430_v35 }
  0x86   : > { %621 = vmatprep.mubr.f32.mxu0 %v4641_v30  ;;  %657 = vmatprep.mubr.f32.mxu1 %v4641_v30 }
  0x88   : > { %469 = vperm.xlu1 %4064, %v4918_v5   ;;  %464 = vperm.xlu0 %4063, %v4913_v4  }
  0x89   : > { %3781 = vmatmul.mubr.msk.f32.gmra.mxu0 %vm502_vm0, %v425_v36  ;;  %3787 = vmatmul.mubr.msk.f32.gmra.mxu1 %vm502_vm0, %v431_v37 }
  0x8a   : > { %627 = vmatprep.mubr.f32.mxu0 %v4641_v30  ;;  %663 = vmatprep.mubr.f32.mxu1 %v4641_v30 }
  0x8c   : > { %479 = vperm.xlu1 %4064, %v4928_v7   ;;  %474 = vperm.xlu0 %4063, %v4923_v6  }
  0x8d   : > { %3782 = vmatmul.mubr.msk.f32.gmra.mxu0 %vm502_vm0, %v426_v38  ;;  %3788 = vmatmul.mubr.msk.f32.gmra.mxu1 %vm502_vm0, %v432_v39 }
  0x8e   : > { %633 = vmatprep.mubr.f32.mxu0 %v4641_v30  ;;  %669 = vmatprep.mubr.f32.mxu1 %v4641_v30 }
  0x90   : > { %489 = vperm.xlu1 %4064, %v4938_v9   ;;  %484 = vperm.xlu0 %4063, %v4933_v8  }
  0x91   : > { %3783 = vmatmul.mubr.msk.f32.gmra.mxu0 %vm502_vm0, %v427_v40  ;;  %3789 = vmatmul.mubr.msk.f32.gmra.mxu1 %vm502_vm0, %v433_v41 }
  0x94   : > { %499 = vperm.xlu1 %4064, %v4948_v11   ;;  %494 = vperm.xlu0 %4063, %v4943_v10  }
  0xfb   : > { %v445_v42 = vpop.permute.xlu0 %444  ;;  %v455_v43 = vpop.permute.xlu1 %454 }
  0xff   : > { %v450_v44 = vpop.permute.xlu0 %449  ;;  %v460_v45 = vpop.permute.xlu1 %459 }
 0x103   : > { %v5062_v46 = vpop.permute.xlu0 %464  ;;  %v5064_v47 = vpop.permute.xlu1 %469 }
 0x107   : > { %v475_v48 = vpop.permute.xlu0 %474  ;;  %v480_v55 = vpop.permute.xlu1 %479 }
 0x10b   : > { %v485_v0 = vpop.permute.xlu0 %484  ;;  %v490_v9 = vpop.permute.xlu1 %489 }
 0x10f   : > { %v495_v26 = vpop.permute.xlu0 %494  ;;  %v500_v35 = vpop.permute.xlu1 %499 }
 0x13d   : > { %v605_v49 = vpop.f32.mrf.mxu0  ;;  %v641_v50 = vpop.f32.mrf.mxu1 }
 0x13e   : > { %v606_v51 = vadd.f32 %v605_v49, %v445_v42  ;;  %v642_v52 = vadd.f32 %v641_v50, %v475_v48 }
 0x13f   : > { %v607_v53 = vpop.f32.mrf.mxu0  ;;  %v643_v54 = vpop.f32.mrf.mxu1 }
 0x140   : > { %676 = vst [vmem:[#allocation2] sm:$0xff] %v606_v51  ;;  %688 = vst [vmem:[#allocation2 + $0x60] sm:$0xff] %v642_v52  ;;  %v608_v56 = vadd.f32 %v607_v53, %v445_v42  ;;  %v644_v57 = vadd.f32 %v643_v54, %v475_v48 }
 0x141   : > { %v611_v58 = vpop.f32.mrf.mxu0  ;;  %v647_v59 = vpop.f32.mrf.mxu1 }
 0x142   : > { %677 = vst [vmem:[#allocation2 + $0x8] sm:$0xff] %v608_v56  ;;  %689 = vst [vmem:[#allocation2 + $0x68] sm:$0xff] %v644_v57  ;;  %v612_v60 = vadd.f32 %v611_v58, %v450_v44  ;;  %v648_v61 = vadd.f32 %v647_v59, %v480_v55 }
 0x143   : > { %v613_v62 = vpop.f32.mrf.mxu0  ;;  %v649_v63 = vpop.f32.mrf.mxu1 }
 0x144   : > { %678 = vst [vmem:[#allocation2 + $0x10] sm:$0xff] %v612_v60  ;;  %690 = vst [vmem:[#allocation2 + $0x70] sm:$0xff] %v648_v61  ;;  %v614_v1 = vadd.f32 %v613_v62, %v450_v44  ;;  %v650_v2 = vadd.f32 %v649_v63, %v480_v55 }
 0x145   : > { %v617_v3 = vpop.f32.mrf.mxu0  ;;  %v653_v4 = vpop.f32.mrf.mxu1 }
 0x146   : > { %679 = vst [vmem:[#allocation2 + $0x18] sm:$0xff] %v614_v1  ;;  %691 = vst [vmem:[#allocation2 + $0x78] sm:$0xff] %v650_v2  ;;  %v618_v5 = vadd.f32 %v617_v3, %v455_v43  ;;  %v654_v6 = vadd.f32 %v653_v4, %v485_v0 }
 0x147   : > { %v619_v7 = vpop.f32.mrf.mxu0  ;;  %v655_v8 = vpop.f32.mrf.mxu1 }
 0x148   : > { %680 = vst [vmem:[#allocation2 + $0x20] sm:$0xff] %v618_v5  ;;  %692 = vst [vmem:[#allocation2 + $0x80] sm:$0xff] %v654_v6  ;;  %v620_v10 = vadd.f32 %v619_v7, %v455_v43  ;;  %v656_v11 = vadd.f32 %v655_v8, %v485_v0 }
 0x149   : > { %v623_v20 = vpop.f32.mrf.mxu0  ;;  %v659_v21 = vpop.f32.mrf.mxu1 }
 0x14a   : > { %681 = vst [vmem:[#allocation2 + $0x28] sm:$0xff] %v620_v10  ;;  %693 = vst [vmem:[#allocation2 + $0x88] sm:$0xff] %v656_v11  ;;  %v624_v22 = vadd.f32 %v623_v20, %v460_v45  ;;  %v660_v23 = vadd.f32 %v659_v21, %v490_v9 }
 0x14b   : > { %v625_v24 = vpop.f32.mrf.mxu0  ;;  %v661_v25 = vpop.f32.mrf.mxu1 }
 0x14c   : > { %682 = vst [vmem:[#allocation2 + $0x30] sm:$0xff] %v624_v22  ;;  %694 = vst [vmem:[#allocation2 + $0x90] sm:$0xff] %v660_v23  ;;  %v626_v27 = vadd.f32 %v625_v24, %v460_v45  ;;  %v662_v28 = vadd.f32 %v661_v25, %v490_v9 }
 0x14d   : > { %v629_v29 = vpop.f32.mrf.mxu0  ;;  %v665_v30 = vpop.f32.mrf.mxu1 }
 0x14e   : > { %683 = vst [vmem:[#allocation2 + $0x38] sm:$0xff] %v626_v27  ;;  %695 = vst [vmem:[#allocation2 + $0x98] sm:$0xff] %v662_v28  ;;  %v630_v31 = vadd.f32 %v629_v29, %v5062_v46  ;;  %v666_v32 = vadd.f32 %v665_v30, %v495_v26 }
 0x14f   : > { %v631_v33 = vpop.f32.mrf.mxu0  ;;  %v667_v34 = vpop.f32.mrf.mxu1 }
 0x150   : > { %684 = vst [vmem:[#allocation2 + $0x40] sm:$0xff] %v630_v31  ;;  %696 = vst [vmem:[#allocation2 + $0xa0] sm:$0xff] %v666_v32  ;;  %v632_v36 = vadd.f32 %v631_v33, %v5062_v46  ;;  %v668_v37 = vadd.f32 %v667_v34, %v495_v26 }
 0x151   : > { %v635_v38 = vpop.f32.mrf.mxu0  ;;  %v671_v39 = vpop.f32.mrf.mxu1 }
 0x152   : > { %685 = vst [vmem:[#allocation2 + $0x48] sm:$0xff] %v632_v36  ;;  %697 = vst [vmem:[#allocation2 + $0xa8] sm:$0xff] %v668_v37  ;;  %v636_v40 = vadd.f32 %v635_v38, %v5064_v47  ;;  %v672_v41 = vadd.f32 %v671_v39, %v500_v35 }
 0x153   : > { %v637_v42 = vpop.f32.mrf.mxu0  ;;  %v673_v43 = vpop.f32.mrf.mxu1 }
 0x154   : > { %686 = vst [vmem:[#allocation2 + $0x50] sm:$0xff] %v636_v40  ;;  %698 = vst [vmem:[#allocation2 + $0xb0] sm:$0xff] %v672_v41  ;;  %v638_v44 = vadd.f32 %v637_v42, %v5064_v47  ;;  %v674_v45 = vadd.f32 %v673_v43, %v500_v35 }
 0x156   : > { %687 = vst [vmem:[#allocation2 + $0x58] sm:$0xff] %v638_v44  ;;  %699 = vst [vmem:[#allocation2 + $0xb8] sm:$0xff] %v674_v45 }
 0x157 PF: > { %s7491_s27 = sld [smem:[#allocation18_spill]]  ;;  %v4643_v49 = vmov 0.0   ;;  %v717_v52 = vld [vmem:[#allocation2 + $0x78] sm:$0xff]  ;;  %v710_v53 = vld [vmem:[#allocation2 + $0x40] sm:$0xff]  ;;  %v715_v56 = vld [vmem:[#allocation2 + $0x68] sm:$0xff]  ;;  %vm759_vm1 = vcmask 64512  }
 0x158   : > { %1113 = vmatprep.mubr.f32.mxu1 %v4643_v49  ;;  %872 = vmatprep.mubr.f32.mxu0 %v4643_v49  ;;  %v716_v57 = vld [vmem:[#allocation2 + $0x70] sm:$0xff]  ;;  %v714_v30 = vld [vmem:[#allocation2 + $0x60] sm:$0xff]  ;;  %s7912_s11 = sld [smem:[#allocation134_spill]]  ;;  %vm3232_vm2 = vcmask 261120   ;;  %vm3328_vm3 = vcmask 130048  }
 0x159   : > { %v711_v51 = vld [vmem:[#allocation2 + $0x48] sm:$0xff]  ;;  %v5384_v14 = vld [vmem:[%s4884_s8 + $0x40] sm:$0xff]  ;;  %s7922_s6 = sld [smem:[#allocation135_spill]] }
 0x15a   : > { %838 = vmatprep.subr.mxu0 %v711_v51  ;;  %s7923_s20 = sld [smem:[#allocation136_spill]] }
 0x15b   : > { %v712_v48 = vld [vmem:[#allocation2 + $0x50] sm:$0xff]  ;;  %839 = vmatpush1.msra.mxu0 %v710_v53  ;;  %s7926_s5 = sld [smem:[#allocation137_spill]] }
 0x15c   : > { %1320 = vmatprep.subr.mxu0 %v715_v56 }
 0x15d   : > { %s3790_s2 = sshll.u32 %s7491_s27, 7  ;;  %v713_v46 = vld [vmem:[#allocation2 + $0x58] sm:$0xff] }
 0x15e   : > { %s5071_s12 = sshra.s32 %s3790_s2, 7  ;;  %1079 = vmatprep.subr.mxu1 %v713_v46  ;;  %s7913_s24 = smov %s7912_s11 }
 0x15f   : > { %s3791_s16 = sshll.u32 %s5071_s12, 3  ;;  %1080 = vmatpush1.msra.mxu1 %v712_v48 }
 0x160   : > { %s704_s19 = scalar_lea.vmem [#allocation2], %s3791_s16  ;;  %1561 = vmatprep.subr.mxu1 %v717_v52 }
 0x161   : > { %v706_v47 = vld [vmem:[%s704_s19 + $0x10] sm:$0xff]  ;;  %v705_v54 = vld [vmem:[%s704_s19] sm:$0xff] }
 0x162   : > { %v708_v50 = vld [vmem:[%s704_s19 + $0x30] sm:$0xff]  ;;  %969 = vxpose.xlu0.b32.start.end [1/1] (short) %v706_v47, 128  ;;  %v707_v55 = vld [vmem:[%s704_s19 + $0x20] sm:$0xff]  ;;  %s3534_s19 = scalar_lea.vmem %s4873_s18, %s3791_s16 [#allocation3]  ;;  %s7925_s18 = sld [smem:[#allocation22_spill]] }
 0x163   : > { %1451 = vxpose.xlu1.b32.start.end [1/1] (short) %v708_v50, 128  ;;  %s3567_s16 = sshll.u32 %s4990_s23, 4  ;;  %s7137_s16 = int_to_ptr.vmem [resolvable:$true] %s3567_s16 }
 0x168   : > { %p7927_p10 = scmp.ne.s32.totalorder %s7925_s18, 0 }
 0x19f   : > { %727 = vxpose.xlu0.b32.start.end [1/1] (short) %v705_v54, 128 }
 0x1a0   : > { %1210 = vxpose.xlu1.b32.start.end [1/1] (short) %v707_v55, 128 }
 0x1de   : > { %v985_v58 = vpop.trf.xlu0 }
 0x1df   : > { %3808 = vmatmul.mubr.msk.f32.vlgmr.msra.gmra.mxu1 %vm759_vm1, %v985_v58  ;;  %v1467_v59 = vpop.trf.xlu1 }
 0x1e0   : > { %1119 = vmatprep.mubr.f32.mxu1 %v4643_v49  ;;  %1562 = vmatpush1.msra.mxu1 %v716_v57 }
 0x1e2   : > { %v986_v60 = vpop.trf.xlu0 }
 0x1e3   : > { %3809 = vmatmul.mubr.msk.f32.gmra.mxu1 %vm759_vm1, %v986_v60  ;;  %v1468_v62 = vpop.trf.xlu1 }
 0x1e4   : > { %1125 = vmatprep.mubr.f32.mxu1 %v4643_v49 }
 0x1e6   : > { %v987_v61 = vpop.trf.xlu0 }
 0x1e7   : > { %3810 = vmatmul.mubr.msk.f32.gmra.mxu1 %vm759_vm1, %v987_v61  ;;  %v1469_v0 = vpop.trf.xlu1 }
 0x1e8   : > { %1131 = vmatprep.mubr.f32.mxu1 %v4643_v49 }
 0x1ea   : > { %v988_v63 = vpop.trf.xlu0 }
 0x1eb   : > { %3811 = vmatmul.mubr.msk.f32.gmra.mxu1 %vm759_vm1, %v988_v63  ;;  %v1470_v3 = vpop.trf.xlu1 }
 0x1ec   : > { %1137 = vmatprep.mubr.f32.mxu1 %v4643_v49 }
 0x1ee   : > { %v989_v1 = vpop.trf.xlu0 }
 0x1ef   : > { %3812 = vmatmul.mubr.msk.f32.gmra.mxu1 %vm759_vm1, %v989_v1  ;;  %v1471_v5 = vpop.trf.xlu1 }
 0x1f0   : > { %1143 = vmatprep.mubr.f32.mxu1 %v4643_v49 }
 0x1f2   : > { %v990_v2 = vpop.trf.xlu0 }
 0x1f3   : > { %3813 = vmatmul.mubr.msk.f32.gmra.mxu1 %vm759_vm1, %v990_v2  ;;  %v1472_v8 = vpop.trf.xlu1 }
 0x1f4   : > { %1149 = vmatprep.mubr.f32.mxu1 %v4643_v49 }
 0x1f6   : > { %v991_v4 = vpop.trf.xlu0 }
 0x1f7   : > { %3814 = vmatmul.mubr.msk.f32.gmra.mxu1 %vm759_vm1, %v991_v4  ;;  %v1473_v10 = vpop.trf.xlu1 }
 0x1f8   : > { %1155 = vmatprep.mubr.f32.mxu1 %v4643_v49 }
 0x1fa   : > { %v992_v6 = vpop.trf.xlu0 }
 0x1fb   : > { %3815 = vmatmul.mubr.msk.f32.gmra.mxu1 %vm759_vm1, %v992_v6  ;;  %v1474_v21 = vpop.trf.xlu1 }
 0x1fc   : > { %1161 = vmatprep.mubr.f32.mxu1 %v4643_v49 }
 0x1fe   : > { %v993_v7 = vpop.trf.xlu0 }
 0x1ff   : > { %3816 = vmatmul.mubr.msk.f32.gmra.mxu1 %vm759_vm1, %v993_v7  ;;  %v1475_v23 = vpop.trf.xlu1 }
 0x200   : > { %1167 = vmatprep.mubr.f32.mxu1 %v4643_v49 }
 0x202   : > { %v994_v9 = vpop.trf.xlu0 }
 0x203   : > { %3817 = vmatmul.mubr.msk.f32.gmra.mxu1 %vm759_vm1, %v994_v9  ;;  %v1476_v26 = vpop.trf.xlu1 }
 0x204   : > { %1173 = vmatprep.mubr.f32.mxu1 %v4643_v49 }
 0x206   : > { %v995_v11 = vpop.trf.xlu0 }
 0x207   : > { %3818 = vmatmul.mubr.msk.f32.gmra.mxu1 %vm759_vm1, %v995_v11  ;;  %v1477_v28 = vpop.trf.xlu1 }
 0x208   : > { %1179 = vmatprep.mubr.f32.mxu1 %v4643_v49 }
 0x20a   : > { %v996_v20 = vpop.trf.xlu0 }
 0x20b   : > { %3819 = vmatmul.mubr.msk.f32.gmra.mxu1 %vm759_vm1, %v996_v20  ;;  %v1478_v32 = vpop.trf.xlu1 }
 0x20c   : > { %1185 = vmatprep.mubr.f32.mxu1 %v4643_v49 }
 0x20e   : > { %v997_v22 = vpop.trf.xlu0 }
 0x20f   : > { %3820 = vmatmul.mubr.msk.f32.gmra.mxu1 %vm759_vm1, %v997_v22  ;;  %v1479_v34 = vpop.trf.xlu1 }
 0x210   : > { %1191 = vmatprep.mubr.f32.mxu1 %v4643_v49 }
 0x212   : > { %v998_v24 = vpop.trf.xlu0 }
 0x213   : > { %3821 = vmatmul.mubr.msk.f32.gmra.mxu1 %vm759_vm1, %v998_v24  ;;  %v1480_v37 = vpop.trf.xlu1  ;;  %v5229_v24 = vld [vmem:[%s4884_s8 + $0x60] sm:$0xff] }
 0x214   : > { %1197 = vmatprep.mubr.f32.mxu1 %v4643_v49  ;;  %7492 = vst [vmem:[#allocation32_spill] sm:$0xff] %v5229_v24 }
 0x216   : > { %v999_v25 = vpop.trf.xlu0 }
 0x217   : > { %3822 = vmatmul.mubr.msk.f32.gmra.mxu1 %vm759_vm1, %v999_v25  ;;  %v1481_v39 = vpop.trf.xlu1  ;;  %v5232_v25 = vld [vmem:[%s4884_s8 + $0x68] sm:$0xff] }
 0x218   : > { %1203 = vmatprep.mubr.f32.mxu1 %v4643_v49  ;;  %7493 = vst [vmem:[#allocation33_spill] sm:$0xff] %v5232_v25 }
 0x21a   : > { %v1000_v27 = vpop.trf.xlu0 }
 0x21b   : > { %3823 = vmatmul.mubr.msk.f32.gmra.mxu1 %vm759_vm1, %v1000_v27  ;;  %v1482_v42 = vpop.trf.xlu1 }
 0x21c   : > { %1595 = vmatprep.mubr.f32.mxu1 %v4643_v49 }
 0x21e   : > { %v743_v29 = vpop.trf.xlu0 }
 0x21f   : > { %3792 = vmatmul.mubr.msk.f32.vlgmr.msra.gmra.mxu0 %vm759_vm1, %v743_v29  ;;  %3840 = vmatmul.mubr.msk.f32.vlgmr.msra.gmra.mxu1 %vm759_vm1, %v1467_v59  ;;  %v1226_v44 = vpop.trf.xlu1 }
 0x220   : > { %878 = vmatprep.mubr.f32.mxu0 %v4643_v49  ;;  %1601 = vmatprep.mubr.f32.mxu1 %v4643_v49 }
 0x221   : > { %1321 = vmatpush1.msra.mxu0 %v714_v30  ;;  %v5241_v30 = vld [vmem:[%s4884_s8 + $0x70] sm:$0xff] }
 0x222   : > { %v744_v31 = vpop.trf.xlu0 }
 0x223   : > { %3793 = vmatmul.mubr.msk.f32.gmra.mxu0 %vm759_vm1, %v744_v31  ;;  %3841 = vmatmul.mubr.msk.f32.gmra.mxu1 %vm759_vm1, %v1468_v62  ;;  %v1227_v46 = vpop.trf.xlu1  ;;  %v5244_v31 = vld [vmem:[%s4884_s8 + $0x78] sm:$0xff] }
 0x224   : > { %884 = vmatprep.mubr.f32.mxu0 %v4643_v49  ;;  %1607 = vmatprep.mubr.f32.mxu1 %v4643_v49 }
 0x226   : > { %v745_v33 = vpop.trf.xlu0 }
 0x227   : > { %3794 = vmatmul.mubr.msk.f32.gmra.mxu0 %vm759_vm1, %v745_v33  ;;  %3842 = vmatmul.mubr.msk.f32.gmra.mxu1 %vm759_vm1, %v1469_v0  ;;  %v1228_v50 = vpop.trf.xlu1 }
 0x228   : > { %890 = vmatprep.mubr.f32.mxu0 %v4643_v49  ;;  %1613 = vmatprep.mubr.f32.mxu1 %v4643_v49 }
 0x22a   : > { %v746_v35 = vpop.trf.xlu0 }
 0x22b   : > { %3795 = vmatmul.mubr.msk.f32.gmra.mxu0 %vm759_vm1, %v746_v35  ;;  %3843 = vmatmul.mubr.msk.f32.gmra.mxu1 %vm759_vm1, %v1470_v3  ;;  %v1229_v52 = vpop.trf.xlu1 }
 0x22c   : > { %896 = vmatprep.mubr.f32.mxu0 %v4643_v49  ;;  %1619 = vmatprep.mubr.f32.mxu1 %v4643_v49 }
 0x22e   : > { %v747_v36 = vpop.trf.xlu0 }
 0x22f   : > { %3796 = vmatmul.mubr.msk.f32.gmra.mxu0 %vm759_vm1, %v747_v36  ;;  %3844 = vmatmul.mubr.msk.f32.gmra.mxu1 %vm759_vm1, %v1471_v5  ;;  %v1230_v55 = vpop.trf.xlu1 }
 0x230   : > { %902 = vmatprep.mubr.f32.mxu0 %v4643_v49  ;;  %1625 = vmatprep.mubr.f32.mxu1 %v4643_v49 }
 0x232   : > { %v748_v38 = vpop.trf.xlu0 }
 0x233   : > { %3797 = vmatmul.mubr.msk.f32.gmra.mxu0 %vm759_vm1, %v748_v38  ;;  %3845 = vmatmul.mubr.msk.f32.gmra.mxu1 %vm759_vm1, %v1472_v8  ;;  %v1231_v57 = vpop.trf.xlu1  ;;  %v5258_v38 = vld [vmem:[%s4884_s8 + $0x88] sm:$0xff] }
 0x234   : > { %908 = vmatprep.mubr.f32.mxu0 %v4643_v49  ;;  %1631 = vmatprep.mubr.f32.mxu1 %v4643_v49 }
 0x236   : > { %v749_v40 = vpop.trf.xlu0 }
 0x237   : > { %3798 = vmatmul.mubr.msk.f32.gmra.mxu0 %vm759_vm1, %v749_v40  ;;  %3846 = vmatmul.mubr.msk.f32.gmra.mxu1 %vm759_vm1, %v1473_v10  ;;  %v1232_v58 = vpop.trf.xlu1 }
 0x238   : > { %914 = vmatprep.mubr.f32.mxu0 %v4643_v49  ;;  %1637 = vmatprep.mubr.f32.mxu1 %v4643_v49 }
 0x23a   : > { %v750_v41 = vpop.trf.xlu0 }
 0x23b   : > { %3799 = vmatmul.mubr.msk.f32.gmra.mxu0 %vm759_vm1, %v750_v41  ;;  %3847 = vmatmul.mubr.msk.f32.gmra.mxu1 %vm759_vm1, %v1474_v21  ;;  %v1233_v59 = vpop.trf.xlu1 }
 0x23c   : > { %920 = vmatprep.mubr.f32.mxu0 %v4643_v49  ;;  %1643 = vmatprep.mubr.f32.mxu1 %v4643_v49 }
 0x23e   : > { %v751_v43 = vpop.trf.xlu0 }
 0x23f   : > { %3800 = vmatmul.mubr.msk.f32.gmra.mxu0 %vm759_vm1, %v751_v43  ;;  %3848 = vmatmul.mubr.msk.f32.gmra.mxu1 %vm759_vm1, %v1475_v23  ;;  %v1234_v60 = vpop.trf.xlu1 }
 0x240   : > { %926 = vmatprep.mubr.f32.mxu0 %v4643_v49  ;;  %1649 = vmatprep.mubr.f32.mxu1 %v4643_v49 }
 0x242   : > { %v752_v45 = vpop.trf.xlu0 }
 0x243   : > { %3801 = vmatmul.mubr.msk.f32.gmra.mxu0 %vm759_vm1, %v752_v45  ;;  %3849 = vmatmul.mubr.msk.f32.gmra.mxu1 %vm759_vm1, %v1476_v26  ;;  %v1235_v61 = vpop.trf.xlu1  ;;  %v5272_v45 = vld [vmem:[%s4884_s8 + $0x98] sm:$0xff] }
 0x244   : > { %932 = vmatprep.mubr.f32.mxu0 %v4643_v49  ;;  %1655 = vmatprep.mubr.f32.mxu1 %v4643_v49 }
 0x246   : > { %v753_v48 = vpop.trf.xlu0 }
 0x247   : > { %3802 = vmatmul.mubr.msk.f32.gmra.mxu0 %vm759_vm1, %v753_v48  ;;  %3850 = vmatmul.mubr.msk.f32.gmra.mxu1 %vm759_vm1, %v1477_v28  ;;  %v1236_v62 = vpop.trf.xlu1 }
 0x248   : > { %938 = vmatprep.mubr.f32.mxu0 %v4643_v49  ;;  %1661 = vmatprep.mubr.f32.mxu1 %v4643_v49 }
 0x24a   : > { %v754_v47 = vpop.trf.xlu0 }
 0x24b   : > { %3803 = vmatmul.mubr.msk.f32.gmra.mxu0 %vm759_vm1, %v754_v47  ;;  %3851 = vmatmul.mubr.msk.f32.gmra.mxu1 %vm759_vm1, %v1478_v32  ;;  %v1237_v63 = vpop.trf.xlu1 }
 0x24c   : > { %944 = vmatprep.mubr.f32.mxu0 %v4643_v49  ;;  %1667 = vmatprep.mubr.f32.mxu1 %v4643_v49 }
 0x24e   : > { %v755_v51 = vpop.trf.xlu0 }
 0x24f   : > { %3804 = vmatmul.mubr.msk.f32.gmra.mxu0 %vm759_vm1, %v755_v51  ;;  %3852 = vmatmul.mubr.msk.f32.gmra.mxu1 %vm759_vm1, %v1479_v34  ;;  %v1238_v0 = vpop.trf.xlu1 }
 0x250   : > { %950 = vmatprep.mubr.f32.mxu0 %v4643_v49  ;;  %1673 = vmatprep.mubr.f32.mxu1 %v4643_v49 }
 0x252   : > { %v756_v53 = vpop.trf.xlu0 }
 0x253   : > { %3805 = vmatmul.mubr.msk.f32.gmra.mxu0 %vm759_vm1, %v756_v53  ;;  %3853 = vmatmul.mubr.msk.f32.gmra.mxu1 %vm759_vm1, %v1480_v37  ;;  %v1239_v1 = vpop.trf.xlu1  ;;  %v5255_v37 = vld [vmem:[%s4884_s8 + $0x80] sm:$0xff]  ;;  %v5286_v53 = vld [vmem:[%s4884_s8 + $0xa8] sm:$0xff] }
 0x254   : > { %1679 = vmatprep.mubr.f32.mxu1 %v4643_v49  ;;  %956 = vmatprep.mubr.f32.mxu0 %v4643_v49 }
 0x256   : > { %v757_v54 = vpop.trf.xlu0 }
 0x257   : > { %3854 = vmatmul.mubr.msk.f32.gmra.mxu1 %vm759_vm1, %v1481_v39  ;;  %3806 = vmatmul.mubr.msk.f32.gmra.mxu0 %vm759_vm1, %v757_v54  ;;  %v1240_v2 = vpop.trf.xlu1 }
 0x258   : > { %1685 = vmatprep.mubr.f32.mxu1 %v4643_v49  ;;  %962 = vmatprep.mubr.f32.mxu0 %v4643_v49 }
 0x25a   : > { %v758_v56 = vpop.trf.xlu0 }
 0x25b   : > { %3855 = vmatmul.mubr.msk.f32.gmra.mxu1 %vm759_vm1, %v1482_v42  ;;  %3807 = vmatmul.mubr.msk.f32.gmra.mxu0 %vm759_vm1, %v758_v56  ;;  %v1241_v3 = vpop.trf.xlu1 }
 0x25c   : > { %1354 = vmatprep.mubr.f32.mxu0 %v4643_v49 }
 0x25f   : > { %3824 = vmatmul.mubr.msk.f32.vlgmr.msra.gmra.mxu0 %vm759_vm1, %v1226_v44  ;;  %v5269_v44 = vld [vmem:[%s4884_s8 + $0x90] sm:$0xff] }
 0x260   : > { %1360 = vmatprep.mubr.f32.mxu0 %v4643_v49 }
 0x263   : > { %3825 = vmatmul.mubr.msk.f32.gmra.mxu0 %vm759_vm1, %v1227_v46 }
 0x264   : > { %1366 = vmatprep.mubr.f32.mxu0 %v4643_v49 }
 0x267   : > { %3826 = vmatmul.mubr.msk.f32.gmra.mxu0 %vm759_vm1, %v1228_v50 }
 0x268   : > { %1372 = vmatprep.mubr.f32.mxu0 %v4643_v49 }
 0x26b   : > { %3827 = vmatmul.mubr.msk.f32.gmra.mxu0 %vm759_vm1, %v1229_v52  ;;  %v5283_v52 = vld [vmem:[%s4884_s8 + $0xa0] sm:$0xff] }
 0x26c   : > { %1378 = vmatprep.mubr.f32.mxu0 %v4643_v49 }
 0x26f   : > { %3828 = vmatmul.mubr.msk.f32.gmra.mxu0 %vm759_vm1, %v1230_v55 }
 0x270   : > { %1384 = vmatprep.mubr.f32.mxu0 %v4643_v49 }
 0x273   : > { %3829 = vmatmul.mubr.msk.f32.gmra.mxu0 %vm759_vm1, %v1231_v57 }
 0x274   : > { %1390 = vmatprep.mubr.f32.mxu0 %v4643_v49 }
 0x277   : > { %3830 = vmatmul.mubr.msk.f32.gmra.mxu0 %vm759_vm1, %v1232_v58 }
 0x278   : > { %1396 = vmatprep.mubr.f32.mxu0 %v4643_v49 }
 0x27b   : > { %3831 = vmatmul.mubr.msk.f32.gmra.mxu0 %vm759_vm1, %v1233_v59  ;;  %v5297_v59 = vld [vmem:[%s4884_s8 + $0xb0] sm:$0xff] }
 0x27c   : > { %1402 = vmatprep.mubr.f32.mxu0 %v4643_v49 }
 0x27f   : > { %3832 = vmatmul.mubr.msk.f32.gmra.mxu0 %vm759_vm1, %v1234_v60  ;;  %v5300_v60 = vld [vmem:[%s4884_s8 + $0xb8] sm:$0xff] }
 0x280   : > { %1408 = vmatprep.mubr.f32.mxu0 %v4643_v49 }
 0x283   : > { %3833 = vmatmul.mubr.msk.f32.gmra.mxu0 %vm759_vm1, %v1235_v61 }
 0x284   : > { %1414 = vmatprep.mubr.f32.mxu0 %v4643_v49 }
 0x287   : > { %3834 = vmatmul.mubr.msk.f32.gmra.mxu0 %vm759_vm1, %v1236_v62 }
 0x288   : > { %1420 = vmatprep.mubr.f32.mxu0 %v4643_v49 }
 0x28b   : > { %3835 = vmatmul.mubr.msk.f32.gmra.mxu0 %vm759_vm1, %v1237_v63 }
 0x28c   : > { %1426 = vmatprep.mubr.f32.mxu0 %v4643_v49 }
 0x28f   : > { %3836 = vmatmul.mubr.msk.f32.gmra.mxu0 %vm759_vm1, %v1238_v0 }
 0x290   : > { %1432 = vmatprep.mubr.f32.mxu0 %v4643_v49 }
 0x293   : > { %3837 = vmatmul.mubr.msk.f32.gmra.mxu0 %vm759_vm1, %v1239_v1 }
 0x294   : > { %1438 = vmatprep.mubr.f32.mxu0 %v4643_v49 }
 0x297   : > { %3838 = vmatmul.mubr.msk.f32.gmra.mxu0 %vm759_vm1, %v1240_v2  ;;  %v5311_v2 = vld [vmem:[%s4884_s8 + $0xc0] sm:$0xff] }
 0x298   : > { %1444 = vmatprep.mubr.f32.mxu0 %v4643_v49 }
 0x29b   : > { %3839 = vmatmul.mubr.msk.f32.gmra.mxu0 %vm759_vm1, %v1241_v3  ;;  %v5314_v3 = vld [vmem:[%s4884_s8 + $0xc8] sm:$0xff] }
 0x29f   : > { %v5204_v4 = vpop.f32.mrf.mxu1 }
 0x2a1   : > { %v5206_v5 = vpop.f32.mrf.mxu1 }
 0x2a3   : > { %v5208_v6 = vpop.f32.mrf.mxu1 }
 0x2a5   : > { %v5210_v7 = vpop.f32.mrf.mxu1 }
 0x2a7   : > { %v5212_v8 = vpop.f32.mrf.mxu1 }
 0x2a9   : > { %v5214_v9 = vpop.f32.mrf.mxu1 }
 0x2ab   : > { %v5216_v10 = vpop.f32.mrf.mxu1 }
 0x2ad   : > { %v5218_v49 = vpop.f32.mrf.mxu1 }
 0x2af   : > { %v5220_v11 = vpop.f32.mrf.mxu1 }
 0x2b1   : > { %v5222_v20 = vpop.f32.mrf.mxu1 }
 0x2b3   : > { %v5224_v21 = vpop.f32.mrf.mxu1 }
 0x2b5   : > { %v5226_v22 = vpop.f32.mrf.mxu1 }
 0x2b7   : > { %v1151_v23 = vpop.f32.mrf.mxu1 }
 0x2b8   : > { %v5235_v27 = vmul.f32 %v5229_v24, %v1151_v23 }
 0x2b9   : > { %v1153_v26 = vpop.f32.mrf.mxu1 }
 0x2ba   : > { %7494 = vst [vmem:[#allocation34_spill] sm:$0xff] %v5235_v27  ;;  %v5238_v28 = vmul.f32 %v5232_v25, %v1153_v26 }
 0x2bb   : > { %v1157_v29 = vpop.f32.mrf.mxu1 }
 0x2bc   : > { %7495 = vst [vmem:[#allocation35_spill] sm:$0xff] %v5238_v28  ;;  %v1918_v32 = vmax.f32 %v5235_v27, %v5238_v28  ;;  %v5249_v34 = vmul.f32 %v5241_v30, %v1157_v29  ;;  %v5397_v28 = vld [vmem:[%s4884_s8 + $0x38] sm:$0xff]  ;;  %v5405_v27 = vmul.f32 %v5384_v14, %v5220_v11 }
 0x2bd   : > { %v1159_v33 = vpop.f32.mrf.mxu1 }
 0x2be   : > { %7496 = vst [vmem:[#allocation36_spill] sm:$0xff] %v5249_v34  ;;  %v5252_v35 = vmul.f32 %v5244_v31, %v1159_v33  ;;  %1919 = vmax.xlane.f32.xlu0 %v1918_v32  ;;  %7517 = vst [vmem:[#allocation57_spill] sm:$0xff] %v5405_v27 }
 0x2bf   : > { %v1163_v36 = vpop.f32.mrf.mxu1 }
 0x2c0   : > { %7497 = vst [vmem:[#allocation37_spill] sm:$0xff] %v5252_v35  ;;  %v1921_v39 = vmax.f32 %v5249_v34, %v5252_v35  ;;  %v5263_v41 = vmul.f32 %v5255_v37, %v1163_v36  ;;  %v5325_v36 = vld [vmem:[%s4884_s8 + $0xd0] sm:$0xff] }
 0x2c1   : > { %v1165_v40 = vpop.f32.mrf.mxu1  ;;  %v5408_v35 = vld [vmem:[%s4884_s8 + $0x30] sm:$0xff] }
 0x2c2   : > { %7498 = vst [vmem:[#allocation38_spill] sm:$0xff] %v5263_v41  ;;  %v5266_v42 = vmul.f32 %v5258_v38, %v1165_v40  ;;  %1922 = vmax.xlane.f32.xlu0 %v1921_v39  ;;  %v5328_v39 = vld [vmem:[%s4884_s8 + $0xd8] sm:$0xff] }
 0x2c3   : > { %v1169_v43 = vpop.f32.mrf.mxu1 }
 0x2c4   : > { %7499 = vst [vmem:[#allocation39_spill] sm:$0xff] %v5266_v42  ;;  %v1924_v46 = vmax.f32 %v5263_v41, %v5266_v42  ;;  %v5277_v47 = vmul.f32 %v5269_v44, %v1169_v43  ;;  %v5421_v42 = vld [vmem:[%s4884_s8 + $0x28] sm:$0xff]  ;;  %v5429_v41 = vmul.f32 %v5408_v35, %v5216_v10 }
 0x2c5   : > { %v1171_v48 = vpop.f32.mrf.mxu1 }
 0x2c6   : > { %7500 = vst [vmem:[#allocation40_spill] sm:$0xff] %v5277_v47  ;;  %v5280_v50 = vmul.f32 %v5272_v45, %v1171_v48  ;;  %1925 = vmax.xlane.f32.xlu0 %v1924_v46  ;;  %7521 = vst [vmem:[#allocation61_spill] sm:$0xff] %v5429_v41 }
 0x2c7   : > { %v1175_v51 = vpop.f32.mrf.mxu1 }
 0x2c8   : > { %7501 = vst [vmem:[#allocation41_spill] sm:$0xff] %v5280_v50  ;;  %v1927_v54 = vmax.f32 %v5277_v47, %v5280_v50  ;;  %v5291_v56 = vmul.f32 %v5283_v52, %v1175_v51  ;;  %v5432_v50 = vld [vmem:[%s4884_s8 + $0x20] sm:$0xff] }
 0x2c9   : > { %v1177_v55 = vpop.f32.mrf.mxu1 }
 0x2ca   : > { %7502 = vst [vmem:[#allocation42_spill] sm:$0xff] %v5291_v56  ;;  %v5294_v57 = vmul.f32 %v5286_v53, %v1177_v55  ;;  %1928 = vmax.xlane.f32.xlu0 %v1927_v54 }
 0x2cb   : > { %v1181_v58 = vpop.f32.mrf.mxu1 }
 0x2cc   : > { %7503 = vst [vmem:[#allocation43_spill] sm:$0xff] %v5294_v57  ;;  %v1930_v61 = vmax.f32 %v5291_v56, %v5294_v57  ;;  %v5305_v63 = vmul.f32 %v5297_v59, %v1181_v58  ;;  %v5445_v57 = vld [vmem:[%s4884_s8 + $0x18] sm:$0xff]  ;;  %v5453_v56 = vmul.f32 %v5432_v50, %v5212_v8 }
 0x2cd   : > { %v1183_v62 = vpop.f32.mrf.mxu1 }
 0x2ce   : > { %v5308_v0 = vmul.f32 %v5300_v60, %v1183_v62  ;;  %1931 = vmax.xlane.f32.xlu0 %v1930_v61  ;;  %v5345_v61 = vld [vmem:[%s4884_s8 + $0xf0] sm:$0xff]  ;;  %v5348_v62 = vld [vmem:[%s4884_s8 + $0xf8] sm:$0xff]  ;;  %7525 = vst [vmem:[#allocation65_spill] sm:$0xff] %v5453_v56 }
 0x2cf   : > { %v1187_v1 = vpop.f32.mrf.mxu1 }
 0x2d0   : > { %v1933_v23 = vmax.f32 %v5305_v63, %v5308_v0  ;;  %v5319_v29 = vmul.f32 %v5311_v2, %v1187_v1  ;;  %v5351_v1 = vld [vmem:[%s4884_s8 + $0x58] sm:$0xff] }
 0x2d1   : > { %v1189_v26 = vpop.f32.mrf.mxu1  ;;  %v5368_v19 = vmul.f32 %v5351_v1, %v5226_v22 }
 0x2d2   : > { %7504 = vst [vmem:[#allocation44_spill] sm:$0xff] %v5319_v29  ;;  %v5322_v32 = vmul.f32 %v5314_v3, %v1189_v26  ;;  %1934 = vmax.xlane.f32.xlu0 %v1933_v23 }
 0x2d3   : > { %v1193_v33 = vpop.f32.mrf.mxu1  ;;  %7511 = vst [vmem:[#allocation51_spill] sm:$0xff] %v5368_v19 }
 0x2d4   : > { %7505 = vst [vmem:[#allocation45_spill] sm:$0xff] %v5322_v32  ;;  %v1936_v40 = vmax.f32 %v5319_v29, %v5322_v32  ;;  %v5333_v46 = vmul.f32 %v5325_v36, %v1193_v33  ;;  %v5480_v32 = vld [vmem:[%s4884_s8] sm:$0xff] }
 0x2d5   : > { %v1195_v43 = vpop.f32.mrf.mxu1 }
 0x2d6   : > { %7506 = vst [vmem:[#allocation46_spill] sm:$0xff] %v5333_v46  ;;  %v5336_v48 = vmul.f32 %v5328_v39, %v1195_v43  ;;  %1937 = vmax.xlane.f32.xlu0 %v1936_v40  ;;  %v5360_v40 = vld [vmem:[%s4884_s8 + $0x50] sm:$0xff] }
 0x2d7   : > { %v5338_v51 = vpop.f32.mrf.mxu1  ;;  %v5381_v16 = vmul.f32 %v5360_v40, %v5224_v21 }
 0x2d8   : > { %7507 = vst [vmem:[#allocation47_spill] sm:$0xff] %v5336_v48  ;;  %v1939_v54 = vmax.f32 %v5333_v46, %v5336_v48  ;;  %v5469_v48 = vld [vmem:[%s4884_s8 + $0x8] sm:$0xff] }
 0x2d9   : > { %v5342_v55 = vpop.f32.mrf.mxu1  ;;  %7513 = vst [vmem:[#allocation53_spill] sm:$0xff] %v5381_v16  ;;  %v1915_v12 = vmax.f32 %v5381_v16, %v5368_v19  ;;  %v5416_v19 = vmul.f32 %v5397_v28, %v5218_v49 }
 0x2da   : > { %1940 = vmax.xlane.f32.xlu0 %v1939_v54 }
 0x2db   : > { %v1205_v58 = vpop.f32.mrf.mxu1  ;;  %7519 = vst [vmem:[#allocation59_spill] sm:$0xff] %v5416_v19 }
 0x2dc   : > { %v5354_v26 = vmul.f32 %v5345_v61, %v1205_v58  ;;  %v5373_v58 = vld [vmem:[%s4884_s8 + $0x48] sm:$0xff] }
 0x2dd   : > { %v1207_v23 = vpop.f32.mrf.mxu1  ;;  %v5392_v13 = vmul.f32 %v5373_v58, %v5222_v20 }
 0x2de   : > { %7508 = vst [vmem:[#allocation48_spill] sm:$0xff] %v5354_v26  ;;  %v5357_v33 = vmul.f32 %v5348_v62, %v1207_v23 }
 0x2df   : > { %v5362_v43 = vpop.f32.mrf.mxu0  ;;  %v5364_v54 = vpop.f32.mrf.mxu1  ;;  %7515 = vst [vmem:[#allocation55_spill] sm:$0xff] %v5392_v13  ;;  %v1912_v16 = vmax.f32 %v5405_v27, %v5392_v13  ;;  %v5440_v13 = vmul.f32 %v5421_v42, %v5214_v9  ;;  %v1909_v27 = vmax.f32 %v5429_v41, %v5416_v19  ;;  %v5464_v19 = vmul.f32 %v5445_v57, %v5210_v7 }
 0x2e0   : > { %7509 = vst [vmem:[#allocation49_spill] sm:$0xff] %v5357_v33  ;;  %7510 = vst [vmem:[#allocation50_spill] sm:$0xff] %v5364_v54  ;;  %v1945_v18 = vmax.f32 %v5354_v26, %v5357_v33  ;;  %v5456_v33 = vld [vmem:[%s4884_s8 + $0x10] sm:$0xff] }
 0x2e1   : > { %v5375_v17 = vpop.f32.mrf.mxu0  ;;  %v5377_v23 = vpop.f32.mrf.mxu1  ;;  %7523 = vst [vmem:[#allocation63_spill] sm:$0xff] %v5440_v13  ;;  %7527 = vst [vmem:[#allocation67_spill] sm:$0xff] %v5464_v19  ;;  %v1906_v41 = vmax.f32 %v5453_v56, %v5440_v13  ;;  %v5488_v13 = vmul.f32 %v5469_v48, %v5206_v5 }
 0x2e2   : > { %7512 = vst [vmem:[#allocation52_spill] sm:$0xff] %v5377_v23  ;;  %1946 = vmax.xlane.f32.xlu0 %v1945_v18 }
 0x2e3   : > { %v5386_v22 = vpop.f32.mrf.mxu0  ;;  %v5388_v15 = vpop.f32.mrf.mxu1  ;;  %7531 = vst [vmem:[#allocation71_spill] sm:$0xff] %v5488_v13 }
 0x2e4   : > { %7514 = vst [vmem:[#allocation54_spill] sm:$0xff] %v5388_v15 }
 0x2e5   : > { %v5399_v21 = vpop.f32.mrf.mxu0  ;;  %v5401_v18 = vpop.f32.mrf.mxu1 }
 0x2e6   : > { %7516 = vst [vmem:[#allocation56_spill] sm:$0xff] %v5401_v18  ;;  %1916 = vmax.xlane.f32.xlu0 %v1915_v12 }
 0x2e7   : > { %v5410_v20 = vpop.f32.mrf.mxu0  ;;  %v5412_v34 = vpop.f32.mrf.mxu1 }
 0x2e8   : > { %7518 = vst [vmem:[#allocation58_spill] sm:$0xff] %v5412_v34 }
 0x2e9   : > { %v5423_v11 = vpop.f32.mrf.mxu0  ;;  %v5425_v12 = vpop.f32.mrf.mxu1 }
 0x2ea   : > { %7520 = vst [vmem:[#allocation60_spill] sm:$0xff] %v5425_v12  ;;  %1913 = vmax.xlane.f32.xlu0 %v1912_v16 }
 0x2eb   : > { %v5434_v49 = vpop.f32.mrf.mxu0  ;;  %v5436_v47 = vpop.f32.mrf.mxu1 }
 0x2ec   : > { %7522 = vst [vmem:[#allocation62_spill] sm:$0xff] %v5436_v47 }
 0x2ed   : > { %v5447_v10 = vpop.f32.mrf.mxu0  ;;  %v5449_v16 = vpop.f32.mrf.mxu1 }
 0x2ee   : > { %7524 = vst [vmem:[#allocation64_spill] sm:$0xff] %v5449_v16  ;;  %1910 = vmax.xlane.f32.xlu0 %v1909_v27  ;;  %v5477_v27 = vmul.f32 %v5456_v33, %v5208_v6  ;;  %v5498_v6 = vmul.f32 %v5480_v32, %v5204_v4 }
 0x2ef   : > { %v5458_v26 = vpop.f32.mrf.mxu0  ;;  %v5460_v9 = vpop.f32.mrf.mxu1 }
 0x2f0   : > { %7526 = vst [vmem:[#allocation66_spill] sm:$0xff] %v5460_v9  ;;  %7529 = vst [vmem:[#allocation69_spill] sm:$0xff] %v5477_v27  ;;  %v1903_v56 = vmax.f32 %v5477_v27, %v5464_v19  ;;  %v1900_v15 = vmax.f32 %v5498_v6, %v5488_v13 }
 0x2f1   : > { %v5471_v46 = vpop.f32.mrf.mxu0  ;;  %v5473_v8 = vpop.f32.mrf.mxu1  ;;  %7533 = vst [vmem:[#allocation73_spill] sm:$0xff] %v5498_v6 }
 0x2f2   : > { %7528 = vst [vmem:[#allocation68_spill] sm:$0xff] %v5473_v8  ;;  %1907 = vmax.xlane.f32.xlu0 %v1906_v41 }
 0x2f3   : > { %v5482_v29 = vpop.f32.mrf.mxu0  ;;  %v5484_v7 = vpop.f32.mrf.mxu1 }
 0x2f4   : > { %7530 = vst [vmem:[#allocation70_spill] sm:$0xff] %v5484_v7 }
 0x2f5   : > { %v5492_v23 = vpop.f32.mrf.mxu0  ;;  %v5494_v54 = vpop.f32.mrf.mxu1 }
 0x2f6   : > { %7532 = vst [vmem:[#allocation72_spill] sm:$0xff] %v5494_v54  ;;  %1904 = vmax.xlane.f32.xlu0 %v1903_v56 }
 0x2f7   : > { %v910_v41 = vpop.f32.mrf.mxu0  ;;  %v5500_v18 = vpop.f32.mrf.mxu1 }
 0x2f8   : > { %7534 = vst [vmem:[#allocation74_spill] sm:$0xff] %v5500_v18  ;;  %v5507_v19 = vmul.f32 %v5229_v24, %v910_v41 }
 0x2f9   : > { %v912_v5 = vpop.f32.mrf.mxu0  ;;  %v5504_v12 = vpop.f32.mrf.mxu1 }
 0x2fa   : > { %7535 = vst [vmem:[#allocation75_spill] sm:$0xff] %v5504_v12  ;;  %7536 = vst [vmem:[#allocation76_spill] sm:$0xff] %v5507_v19  ;;  %v5510_v27 = vmul.f32 %v5232_v25, %v912_v5  ;;  %1901 = vmax.xlane.f32.xlu0 %v1900_v15 }
 0x2fb   : > { %v916_v34 = vpop.f32.mrf.mxu0  ;;  %v5512_v4 = vpop.f32.mrf.mxu1 }
 0x2fc   : > { %7537 = vst [vmem:[#allocation77_spill] sm:$0xff] %v5510_v27  ;;  %v1870_v56 = vmax.f32 %v5507_v19, %v5510_v27  ;;  %v5519_v13 = vmul.f32 %v5241_v30, %v916_v34 }
 0x2fd   : > { %v918_v16 = vpop.f32.mrf.mxu0  ;;  %v5516_v47 = vpop.f32.mrf.mxu1 }
 0x2fe   : > { %7538 = vst [vmem:[#allocation78_spill] sm:$0xff] %v5519_v13  ;;  %v5522_v6 = vmul.f32 %v5244_v31, %v918_v16  ;;  %1871 = vmax.xlane.f32.xlu1 %v1870_v56 }
 0x2ff   : > { %v922_v41 = vpop.f32.mrf.mxu0  ;;  %v5524_v5 = vpop.f32.mrf.mxu1 }
 0x300   : > { %7539 = vst [vmem:[#allocation79_spill] sm:$0xff] %v5522_v6  ;;  %v1873_v15 = vmax.f32 %v5519_v13, %v5522_v6  ;;  %v5531_v27 = vmul.f32 %v5255_v37, %v922_v41 }
 0x301   : > { %v924_v8 = vpop.f32.mrf.mxu0  ;;  %v5528_v9 = vpop.f32.mrf.mxu1 }
 0x302   : > { %7540 = vst [vmem:[#allocation80_spill] sm:$0xff] %v5531_v27  ;;  %v5534_v19 = vmul.f32 %v5258_v38, %v924_v8  ;;  %1874 = vmax.xlane.f32.xlu1 %v1873_v15 }
 0x303   : > { %v928_v34 = vpop.f32.mrf.mxu0  ;;  %v1651_v16 = vpop.f32.mrf.mxu1 }
 0x304   : > { %7541 = vst [vmem:[#allocation81_spill] sm:$0xff] %v5534_v19  ;;  %v5537_v56 = vmul.f32 %v5269_v44, %v1651_v16  ;;  %v1876_v54 = vmax.f32 %v5531_v27, %v5534_v19  ;;  %v5542_v13 = vmul.f32 %v5269_v44, %v928_v34 }
 0x305   : > { %v930_v7 = vpop.f32.mrf.mxu0  ;;  %v1653_v6 = vpop.f32.mrf.mxu1 }
 0x306   : > { %7542 = vst [vmem:[#allocation82_spill] sm:$0xff] %v5537_v56  ;;  %7543 = vst [vmem:[#allocation83_spill] sm:$0xff] %v5542_v13  ;;  %v5545_v41 = vmul.f32 %v5272_v45, %v930_v7  ;;  %v5548_v8 = vmul.f32 %v5272_v45, %v1653_v6  ;;  %1877 = vmax.xlane.f32.xlu1 %v1876_v54 }
 0x307   : > { %v934_v15 = vpop.f32.mrf.mxu0  ;;  %v1657_v25 = vpop.f32.mrf.mxu1 }
 0x308   : > { %7544 = vst [vmem:[#allocation84_spill] sm:$0xff] %v5545_v41  ;;  %7545 = vst [vmem:[#allocation85_spill] sm:$0xff] %v5548_v8  ;;  %v5551_v16 = vmul.f32 %v5283_v52, %v1657_v25  ;;  %v2023_v19 = vmax.f32 %v5537_v56, %v5548_v8  ;;  %v1879_v27 = vmax.f32 %v5542_v13, %v5545_v41 }
 0x309   : > { %v936_v34 = vpop.f32.mrf.mxu0  ;;  %v1659_v12 = vpop.f32.mrf.mxu1  ;;  %v5558_v7 = vmul.f32 %v5283_v52, %v934_v15 }
 0x30a   : > { %7546 = vst [vmem:[#allocation86_spill] sm:$0xff] %v5551_v16  ;;  %v5561_v6 = vmul.f32 %v5286_v53, %v936_v34  ;;  %v5564_v54 = vmul.f32 %v5286_v53, %v1659_v12  ;;  %2024 = vmax.xlane.f32.xlu0 %v2023_v19  ;;  %1880 = vmax.xlane.f32.xlu1 %v1879_v27 }
 0x30b   : > { %7547 = vst [vmem:[#allocation87_spill] sm:$0xff] %v5558_v7  ;;  %v940_v25 = vpop.f32.mrf.mxu0  ;;  %v1663_v24 = vpop.f32.mrf.mxu1 }
 0x30c   : > { %7548 = vst [vmem:[#allocation88_spill] sm:$0xff] %v5561_v6  ;;  %7549 = vst [vmem:[#allocation89_spill] sm:$0xff] %v5564_v54  ;;  %v5567_v8 = vmul.f32 %v5297_v59, %v1663_v24  ;;  %v2026_v56 = vmax.f32 %v5551_v16, %v5564_v54  ;;  %v1882_v15 = vmax.f32 %v5558_v7, %v5561_v6 }
 0x30d   : > { %v942_v41 = vpop.f32.mrf.mxu0  ;;  %v1665_v13 = vpop.f32.mrf.mxu1  ;;  %v5574_v34 = vmul.f32 %v5297_v59, %v940_v25 }
 0x30e   : > { %7550 = vst [vmem:[#allocation90_spill] sm:$0xff] %v5567_v8  ;;  %v5577_v12 = vmul.f32 %v5300_v60, %v942_v41  ;;  %v5580_v19 = vmul.f32 %v5300_v60, %v1665_v13  ;;  %2027 = vmax.xlane.f32.xlu0 %v2026_v56  ;;  %1883 = vmax.xlane.f32.xlu1 %v1882_v15 }
 0x30f   : > { %7551 = vst [vmem:[#allocation91_spill] sm:$0xff] %v5574_v34  ;;  %v946_v24 = vpop.f32.mrf.mxu0  ;;  %v1669_v27 = vpop.f32.mrf.mxu1 }
 0x310   : > { %7552 = vst [vmem:[#allocation92_spill] sm:$0xff] %v5577_v12  ;;  %7553 = vst [vmem:[#allocation93_spill] sm:$0xff] %v5580_v19  ;;  %v2029_v54 = vmax.f32 %v5567_v8, %v5580_v19  ;;  %v5585_v16 = vmul.f32 %v5311_v2, %v946_v24  ;;  %v5588_v25 = vmul.f32 %v5311_v2, %v1669_v27 }
 0x311   : > { %v1885_v41 = vmax.f32 %v5574_v34, %v5577_v12  ;;  %v948_v13 = vpop.f32.mrf.mxu0  ;;  %v1671_v6 = vpop.f32.mrf.mxu1  ;;  %v5609_v12 = vld [vmem:[%s4884_s8 + $0xe8] sm:$0xff] }
 0x312   : > { %7554 = vst [vmem:[#allocation94_spill] sm:$0xff] %v5585_v16  ;;  %7555 = vst [vmem:[#allocation95_spill] sm:$0xff] %v5588_v25  ;;  %v5593_v56 = vmul.f32 %v5314_v3, %v948_v13  ;;  %v5596_v15 = vmul.f32 %v5314_v3, %v1671_v6  ;;  %2030 = vmax.xlane.f32.xlu0 %v2029_v54  ;;  %v5612_v54 = vld [vmem:[%s4884_s8 + $0xe0] sm:$0xff] }
 0x313   : > { %1886 = vmax.xlane.f32.xlu1 %v1885_v41  ;;  %v952_v19 = vpop.f32.mrf.mxu0  ;;  %v1675_v24 = vpop.f32.mrf.mxu1 }
 0x314   : > { %7556 = vst [vmem:[#allocation96_spill] sm:$0xff] %v5593_v56  ;;  %7557 = vst [vmem:[#allocation97_spill] sm:$0xff] %v5596_v15  ;;  %v2032_v27 = vmax.f32 %v5588_v25, %v5596_v15  ;;  %v5601_v8 = vmul.f32 %v5325_v36, %v952_v19  ;;  %v5604_v7 = vmul.f32 %v5325_v36, %v1675_v24 }
 0x315   : > { %v1888_v13 = vmax.f32 %v5585_v16, %v5593_v56  ;;  %v954_v6 = vpop.f32.mrf.mxu0  ;;  %v1677_v34 = vpop.f32.mrf.mxu1  ;;  %v5622_v25 = vmul.f32 %v5609_v12, %v5342_v55 }
 0x316   : > { %7558 = vst [vmem:[#allocation98_spill] sm:$0xff] %v5601_v8  ;;  %7559 = vst [vmem:[#allocation99_spill] sm:$0xff] %v5604_v7  ;;  %v5615_v41 = vmul.f32 %v5328_v39, %v954_v6  ;;  %v5618_v15 = vmul.f32 %v5328_v39, %v1677_v34  ;;  %2033 = vmax.xlane.f32.xlu0 %v2032_v27  ;;  %v5633_v34 = vmul.f32 %v5612_v54, %v5338_v51 }
 0x317   : > { %1889 = vmax.xlane.f32.xlu1 %v1888_v13  ;;  %v1681_v19 = vpop.f32.mrf.mxu1  ;;  %v958_v24 = vpop.f32.mrf.mxu0  ;;  %7562 = vst [vmem:[#allocation102_spill] sm:$0xff] %v5622_v25 }
 0x318   : > { %7560 = vst [vmem:[#allocation100_spill] sm:$0xff] %v5615_v41  ;;  %7561 = vst [vmem:[#allocation101_spill] sm:$0xff] %v5618_v15  ;;  %v2035_v56 = vmax.f32 %v5604_v7, %v5618_v15  ;;  %v5627_v16 = vmul.f32 %v5612_v54, %v1681_v19  ;;  %v1891_v6 = vmax.f32 %v5601_v8, %v5615_v41 }
 0x319   : > { %v1683_v27 = vpop.f32.mrf.mxu1  ;;  %v960_v13 = vpop.f32.mrf.mxu0  ;;  %v5639_v55 = vmul.f32 %v5612_v54, %v958_v24 }
 0x31a   : > { %7563 = vst [vmem:[#allocation103_spill] sm:$0xff] %v5627_v16  ;;  %v5636_v18 = vmul.f32 %v5609_v12, %v1683_v27  ;;  %2036 = vmax.xlane.f32.xlu0 %v2035_v56  ;;  %v5642_v19 = vmul.f32 %v5609_v12, %v960_v13  ;;  %v1942_v27 = vmax.f32 %v5633_v34, %v5622_v25 }
 0x31b   : > { %1892 = vmax.xlane.f32.xlu1 %v1891_v6  ;;  %v1687_v15 = vpop.f32.mrf.mxu1  ;;  %v964_v7 = vpop.f32.mrf.mxu0 }
 0x31c   : > { %7564 = vst [vmem:[#allocation104_spill] sm:$0xff] %v5636_v18  ;;  %v2038_v41 = vmax.f32 %v5627_v16, %v5636_v18  ;;  %v5647_v51 = vmul.f32 %v5345_v61, %v1687_v15  ;;  %v5652_v56 = vmul.f32 %v5345_v61, %v964_v7  ;;  %v1894_v15 = vmax.f32 %v5639_v55, %v5642_v19 }
 0x31d   : > { %v1689_v8 = vpop.f32.mrf.mxu1  ;;  %v966_v24 = vpop.f32.mrf.mxu0 }
 0x31e   : > { %7565 = vst [vmem:[#allocation105_spill] sm:$0xff] %v5647_v51  ;;  %7566 = vst [vmem:[#allocation106_spill] sm:$0xff] %v5652_v56  ;;  %v5655_v6 = vmul.f32 %v5348_v62, %v1689_v8  ;;  %2039 = vmax.xlane.f32.xlu0 %v2038_v41  ;;  %v5658_v13 = vmul.f32 %v5348_v62, %v966_v24  ;;  %v5674_v41 = vmul.f32 %v5351_v1, %v5492_v23 }
 0x31f   : > { %1943 = vmax.xlane.f32.xlu1 %v1942_v27  ;;  %v5662_v18 = vpop.f32.mrf.mxu0  ;;  %v5680_v24 = vmul.f32 %v5360_v40, %v5482_v29  ;;  %v5694_v23 = vmul.f32 %v5384_v14, %v5458_v26  ;;  %v5700_v29 = vmul.f32 %v5397_v28, %v5447_v10  ;;  %v5714_v26 = vmul.f32 %v5421_v42, %v5423_v11 }
 0x320   : > { %7567 = vst [vmem:[#allocation107_spill] sm:$0xff] %v5655_v6  ;;  %7568 = vst [vmem:[#allocation108_spill] sm:$0xff] %v5658_v13  ;;  %v2041_v16 = vmax.f32 %v5647_v51, %v5655_v6  ;;  %v1897_v8 = vmax.f32 %v5652_v56, %v5658_v13  ;;  %v5708_v56 = vmul.f32 %v5408_v35, %v5434_v49 }
 0x321   : > { %v5666_v25 = vpop.f32.mrf.mxu0  ;;  %7569 = vst [vmem:[#allocation109_spill] sm:$0xff] %v5674_v41  ;;  %7570 = vst [vmem:[#allocation110_spill] sm:$0xff] %v5680_v24  ;;  %v5728_v49 = vmul.f32 %v5445_v57, %v5399_v21 }
 0x322   : > { %2042 = vmax.xlane.f32.xlu0 %v2041_v16  ;;  %v5686_v16 = vmul.f32 %v5373_v58, %v5471_v46  ;;  %7572 = vst [vmem:[#allocation112_spill] sm:$0xff] %v5694_v23  ;;  %7573 = vst [vmem:[#allocation113_spill] sm:$0xff] %v5700_v29  ;;  %v1861_v10 = vmax.f32 %v5708_v56, %v5700_v29  ;;  %v5736_v29 = vmul.f32 %v5456_v33, %v5386_v22 }
 0x323   : > { %1895 = vmax.xlane.f32.xlu1 %v1894_v15  ;;  %v5670_v7 = vpop.f32.mrf.mxu0  ;;  %v1867_v15 = vmax.f32 %v5680_v24, %v5674_v41  ;;  %7574 = vst [vmem:[#allocation114_spill] sm:$0xff] %v5708_v56  ;;  %7575 = vst [vmem:[#allocation115_spill] sm:$0xff] %v5714_v26  ;;  %v5756_v22 = vmul.f32 %v5241_v30, %v5512_v4  ;;  %v5774_v4 = vmul.f32 %v5258_v38, %v5528_v9 }
 0x324   : > { %7571 = vst [vmem:[#allocation111_spill] sm:$0xff] %v5686_v16  ;;  %v1864_v46 = vmax.f32 %v5694_v23, %v5686_v16  ;;  %v5722_v16 = vmul.f32 %v5432_v50, %v5410_v20  ;;  %7577 = vst [vmem:[#allocation117_spill] sm:$0xff] %v5728_v49  ;;  %v5742_v20 = vmul.f32 %v5469_v48, %v5375_v17 }
 0x325   : > { %v5676_v27 = vpop.f32.mrf.mxu0  ;;  %7578 = vst [vmem:[#allocation118_spill] sm:$0xff] %v5736_v29  ;;  %v1855_v21 = vmax.f32 %v5736_v29, %v5728_v49  ;;  %7580 = vst [vmem:[#allocation120_spill] sm:$0xff] %v5756_v22  ;;  %v5760_v17 = vmul.f32 %v5244_v31, %v5516_v47 }
 0x326   : > { %7576 = vst [vmem:[#allocation116_spill] sm:$0xff] %v5722_v16  ;;  %v1858_v11 = vmax.f32 %v5722_v16, %v5714_v26  ;;  %7579 = vst [vmem:[#allocation119_spill] sm:$0xff] %v5742_v20  ;;  %v5750_v26 = vmul.f32 %v5480_v32, %v5362_v43 }
 0x327   : > { %1898 = vmax.xlane.f32.xlu1 %v1897_v8  ;;  %v5682_v6 = vpop.f32.mrf.mxu0  ;;  %7581 = vst [vmem:[#allocation121_spill] sm:$0xff] %v5760_v17  ;;  %v2017_v43 = vmax.f32 %v5756_v22, %v5760_v17  ;;  %7583 = vst [vmem:[#allocation123_spill] sm:$0xff] %v5774_v4 }
 0x329   : > { %v5690_v51 = vpop.f32.mrf.mxu0 }
 0x32b   : > { %1868 = vmax.xlane.f32.xlu1 %v1867_v15  ;;  %v5696_v13 = vpop.f32.mrf.mxu0 }
 0x32d   : > { %v5704_v8 = vpop.f32.mrf.mxu0 }
 0x32f   : > { %1865 = vmax.xlane.f32.xlu1 %v1864_v46  ;;  %v5710_v41 = vpop.f32.mrf.mxu0 }
 0x331   : > { %v5718_v15 = vpop.f32.mrf.mxu0 }
 0x333   : > { %1862 = vmax.xlane.f32.xlu1 %v1861_v10  ;;  %v5724_v23 = vpop.f32.mrf.mxu0 }
 0x335   : > { %v5732_v46 = vpop.f32.mrf.mxu0 }
 0x337   : > { %1859 = vmax.xlane.f32.xlu1 %v1858_v11  ;;  %v5738_v56 = vpop.f32.mrf.mxu0  ;;  %v1852_v11 = vmax.f32 %v5750_v26, %v5742_v20 }
 0x339   : > { %v5746_v10 = vpop.f32.mrf.mxu0 }
 0x33b   : > { %1856 = vmax.xlane.f32.xlu1 %v1855_v21  ;;  %v5752_v16 = vpop.f32.mrf.mxu0  ;;  %v5770_v21 = vmul.f32 %v5255_v37, %v5524_v5 }
 0x33d   : > { %v5764_v49 = vpop.f32.mrf.mxu0  ;;  %7582 = vst [vmem:[#allocation122_spill] sm:$0xff] %v5770_v21  ;;  %v2020_v17 = vmax.f32 %v5770_v21, %v5774_v4 }
 0x33f   : > { %1853 = vmax.xlane.f32.xlu1 %v1852_v11  ;;  %v1404_v29 = vpop.f32.mrf.mxu0 }
 0x340   : > { %v5777_v24 = vmul.f32 %v5255_v37, %v1404_v29 }
 0x341   : > { %v1406_v47 = vpop.f32.mrf.mxu0 }
 0x342   : > { %7584 = vst [vmem:[#allocation124_spill] sm:$0xff] %v5777_v24  ;;  %v5780_v20 = vmul.f32 %v5258_v38, %v1406_v47 }
 0x343   : > { %2018 = vmax.xlane.f32.xlu1 %v2017_v43  ;;  %v1410_v11 = vpop.f32.mrf.mxu0 }
 0x344   : > { %7585 = vst [vmem:[#allocation125_spill] sm:$0xff] %v5780_v20  ;;  %v1972_v5 = vmax.f32 %v5777_v24, %v5780_v20  ;;  %v5787_v9 = vmul.f32 %v5269_v44, %v1410_v11 }
 0x345   : > { %v1412_v22 = vpop.f32.mrf.mxu0 }
 0x346   : > { %7586 = vst [vmem:[#allocation126_spill] sm:$0xff] %v5787_v9  ;;  %v5790_v43 = vmul.f32 %v5272_v45, %v1412_v22 }
 0x347   : > { %2021 = vmax.xlane.f32.xlu1 %v2020_v17  ;;  %v5792_v37 = vpop.xlane.xlu0 %1919  ;;  %v1416_v29 = vpop.f32.mrf.mxu0 }
 0x348   : > { %7587 = vst [vmem:[#allocation127_spill] sm:$0xff] %v5790_v43  ;;  %v1975_v47 = vmax.f32 %v5787_v9, %v5790_v43  ;;  %v5797_v4 = vmul.f32 %v5283_v52, %v1416_v29 }
 0x349   : > { %v1418_v38 = vpop.f32.mrf.mxu0 }
 0x34a   : > { %7588 = vst [vmem:[#allocation128_spill] sm:$0xff] %v5797_v4  ;;  %v5800_v21 = vmul.f32 %v5286_v53, %v1418_v38 }
 0x34b   : > { %1973 = vmax.xlane.f32.xlu1 %v1972_v5  ;;  %v5802_v17 = vpop.xlane.xlu0 %1922  ;;  %v1422_v44 = vpop.f32.mrf.mxu0 }
 0x34c   : > { %7589 = vst [vmem:[#allocation129_spill] sm:$0xff] %v5800_v21  ;;  %v1978_v45 = vmax.f32 %v5797_v4, %v5800_v21  ;;  %v5807_v22 = vmul.f32 %v5297_v59, %v1422_v44 }
 0x34d   : > { %v1424_v11 = vpop.f32.mrf.mxu0 }
 0x34e   : > { %v5810_v20 = vmul.f32 %v5300_v60, %v1424_v11 }
 0x34f   : > { %1976 = vmax.xlane.f32.xlu1 %v1975_v47  ;;  %v5812_v5 = vpop.xlane.xlu0 %1925  ;;  %v1428_v52 = vpop.f32.mrf.mxu0 }
 0x350   : > { %v1981_v53 = vmax.f32 %v5807_v22, %v5810_v20  ;;  %v5817_v38 = vmul.f32 %v5311_v2, %v1428_v52 }
 0x351   : > { %v1430_v29 = vpop.f32.mrf.mxu0 }
 0x352   : > { %v5820_v24 = vmul.f32 %v5314_v3, %v1430_v29 }
 0x353   : > { %1979 = vmax.xlane.f32.xlu1 %v1978_v45  ;;  %v5822_v47 = vpop.xlane.xlu0 %1928  ;;  %v1434_v59 = vpop.f32.mrf.mxu0 }
 0x354   : > { %v1984_v60 = vmax.f32 %v5817_v38, %v5820_v24  ;;  %v5827_v11 = vmul.f32 %v5325_v36, %v1434_v59 }
 0x355   : > { %v1436_v44 = vpop.f32.mrf.mxu0 }
 0x356   : > { %v5830_v43 = vmul.f32 %v5328_v39, %v1436_v44 }
 0x357   : > { %1982 = vmax.xlane.f32.xlu1 %v1981_v53  ;;  %v5832_v45 = vpop.xlane.xlu0 %1931  ;;  %v1440_v2 = vpop.f32.mrf.mxu0 }
 0x358   : > { %v5835_v3 = vmul.f32 %v5612_v54, %v1440_v2  ;;  %v1987_v29 = vmax.f32 %v5827_v11, %v5830_v43 }
 0x359   : > { %v1442_v52 = vpop.f32.mrf.mxu0 }
 0x35a   : > { %v5840_v9 = vmul.f32 %v5609_v12, %v1442_v52  ;;  %v5860_v12 = vmul.f32 %v5244_v31, %v5764_v49  ;;  %v7591_v52 = vld [vmem:[#allocation32_spill] sm:$0xff] }
 0x35b   : > { %1985 = vmax.xlane.f32.xlu1 %v1984_v60  ;;  %v1935_v53 = vpop.xlane.xlu0 %1934  ;;  %v1446_v36 = vpop.f32.mrf.mxu0  ;;  %v5876_v31 = vmul.f32 %v7591_v52, %v5738_v56 }
 0x35c   : > { %v2098_v59 = vsub.f32 %v5305_v63, %v1935_v53  ;;  %v2099_v39 = vsub.f32 %v5308_v0, %v1935_v53  ;;  %v1990_v44 = vmax.f32 %v5835_v3, %v5840_v9  ;;  %v5847_v4 = vmul.f32 %v5345_v61, %v1446_v36  ;;  %v7590_v61 = vld [vmem:[#allocation74_spill] sm:$0xff] }
 0x35d   : > { %v1448_v21 = vpop.f32.mrf.mxu0  ;;  %v5856_v0 = vmul.f32 %v5241_v30, %v5752_v16 }
 0x35e   : > { %v2280_v54 = vmul.f32 1.442695, %v2098_v59  ;;  %v2282_v2 = vmul.f32 1.442695, %v2099_v39  ;;  %v5850_v60 = vmul.f32 %v5348_v62, %v1448_v21  ;;  %v7592_v62 = vld [vmem:[#allocation75_spill] sm:$0xff]  ;;  %v7593_v21 = vld [vmem:[#allocation33_spill] sm:$0xff] }
 0x35f   : > { %1988 = vmax.xlane.f32.xlu1 %v1987_v29  ;;  %v5864_v29 = vmul.f32 %v7591_v52, %v7590_v61  ;;  %v5868_v53 = vmul.f32 %v7593_v21, %v7592_v62  ;;  %v1969_v36 = vmax.f32 %v5856_v0, %v5860_v12  ;;  %v5880_v16 = vmul.f32 %v7593_v21, %v5746_v10  ;;  %v7596_v62 = vld [vmem:[#allocation66_spill] sm:$0xff] }
 0x360   : > { %4067 = vpow2.f32 %v2280_v54  ;;  %v1993_v63 = vmax.f32 %v5847_v4, %v5850_v60  ;;  %v5902_v61 = vmul.f32 %v5360_v40, %v5724_v23  ;;  %v5906_v52 = vmul.f32 %v5351_v1, %v5732_v46  ;;  %v7600_v46 = vld [vmem:[#allocation62_spill] sm:$0xff] }
 0x361   : > { %4069 = vpow2.f32 %v2282_v2  ;;  %v2014_v30 = vmax.f32 %v5864_v29, %v5868_v53  ;;  %v7595_v2 = vld [vmem:[#allocation72_spill] sm:$0xff]  ;;  %v1966_v10 = vmax.f32 %v5876_v31, %v5880_v16  ;;  %v5910_v21 = vmul.f32 %v5384_v14, %v7596_v62  ;;  %v7604_v62 = vld [vmem:[#allocation58_spill] sm:$0xff] }
 0x362   : > { %v5894_v56 = vmul.f32 %v5351_v1, %v7595_v2  ;;  %v5922_v1 = vmul.f32 %v5384_v14, %v5710_v41  ;;  %v5926_v23 = vmul.f32 %v5373_v58, %v5718_v15  ;;  %v7602_v2 = vld [vmem:[#allocation64_spill] sm:$0xff]  ;;  %v5946_v41 = vmul.f32 %v5397_v28, %v5704_v8 }
 0x363   : > { %1991 = vmax.xlane.f32.xlu1 %v1990_v44  ;;  %v7594_v44 = vld [vmem:[#allocation70_spill] sm:$0xff]  ;;  %7597 = vst [vmem:[#allocation74_spill] sm:$0xff] %v5910_v21  ;;  %v5965_v8 = vmul.f32 %v5432_v50, %v5682_v6 }
 0x364   : > { %v5890_v54 = vmul.f32 %v5360_v40, %v7594_v44  ;;  %v5930_v44 = vmul.f32 %v5408_v35, %v7600_v46 }
 0x366   : > { %7601 = vst [vmem:[#allocation75_spill] sm:$0xff] %v5930_v44 }
 0x367   : > { %1994 = vmax.xlane.f32.xlu1 %v1993_v63  ;;  %v2011_v63 = vmax.f32 %v5890_v54, %v5894_v56 }
 0x36b   : > { %1970 = vmax.xlane.f32.xlu1 %v1969_v36  ;;  %v7598_v36 = vld [vmem:[#allocation68_spill] sm:$0xff] }
 0x36d   : > { %v5882_v49 = vpop.eup %4067 }
 0x36e   : > { %v5884_v59 = vpop.eup %4069 }
 0x36f   : > { %2015 = vmax.xlane.f32.xlu1 %v2014_v30  ;;  %v2509_v39 = vadd.f32 %v5884_v59, %v5882_v49  ;;  %v5914_v30 = vmul.f32 %v5373_v58, %v7598_v36  ;;  %v5942_v58 = vmul.f32 %v5408_v35, %v5696_v13  ;;  %v5950_v36 = vmul.f32 %v5432_v50, %v7604_v62  ;;  %v7608_v35 = vld [vmem:[#allocation76_spill] sm:$0xff] }
 0x371   : > { %2510 = vadd.xlane.f32.xlu0 %v2509_v39  ;;  %7599 = vst [vmem:[#allocation32_spill] sm:$0xff] %v5914_v30  ;;  %v1963_v39 = vmax.f32 %v5902_v61, %v5906_v52  ;;  %v2008_v40 = vmax.f32 %v5910_v21, %v5914_v30  ;;  %7605 = vst [vmem:[#allocation70_spill] sm:$0xff] %v5950_v36  ;;  %v1957_v46 = vmax.f32 %v5942_v58, %v5946_v41 }
 0x373   : > { %1967 = vmax.xlane.f32.xlu1 %v1966_v10  ;;  %v5934_v10 = vmul.f32 %v5397_v28, %v7602_v2 }
 0x375   : > { %7603 = vst [vmem:[#allocation33_spill] sm:$0xff] %v5934_v10  ;;  %v2005_v14 = vmax.f32 %v5930_v44, %v5934_v10  ;;  %v7612_v44 = vld [vmem:[#allocation56_spill] sm:$0xff] }
 0x377   : > { %2012 = vmax.xlane.f32.xlu1 %v2011_v63  ;;  %v1960_v63 = vmax.f32 %v5922_v1, %v5926_v23 }
 0x37b   : > { %1964 = vmax.xlane.f32.xlu1 %v1963_v39  ;;  %v7606_v39 = vld [vmem:[#allocation60_spill] sm:$0xff] }
 0x37f   : > { %2009 = vmax.xlane.f32.xlu1 %v2008_v40  ;;  %v5954_v40 = vmul.f32 %v5421_v42, %v7606_v39 }
 0x381   : > { %7607 = vst [vmem:[#allocation72_spill] sm:$0xff] %v5954_v40  ;;  %v2002_v28 = vmax.f32 %v5950_v36, %v5954_v40  ;;  %v5980_v40 = vmul.f32 %v5445_v57, %v7612_v44  ;;  %v7616_v44 = vld [vmem:[#allocation50_spill] sm:$0xff]  ;;  %v7625_v36 = vld [vmem:[#allocation92_spill] sm:$0xff] }
 0x383   : > { %1961 = vmax.xlane.f32.xlu1 %v1960_v63  ;;  %v5969_v63 = vmul.f32 %v5421_v42, %v5690_v51  ;;  %7613 = vst [vmem:[#allocation68_spill] sm:$0xff] %v5980_v40 }
 0x385   : > { %v1954_v50 = vmax.f32 %v5965_v8, %v5969_v63 }
 0x387   : > { %2006 = vmax.xlane.f32.xlu1 %v2005_v14  ;;  %v1872_v15 = vpop.xlane.xlu1 %1871  ;;  %v7609_v14 = vld [vmem:[#allocation77_spill] sm:$0xff] }
 0x388   : > { %v2056_v13 = vsub.f32 %v7608_v35, %v1872_v15  ;;  %v2057_v62 = vsub.f32 %v7609_v14, %v1872_v15  ;;  %v7610_v35 = vld [vmem:[#allocation54_spill] sm:$0xff]  ;;  %v5990_v15 = vmul.f32 %v5456_v33, %v5670_v7  ;;  %v7618_v14 = vld [vmem:[#allocation52_spill] sm:$0xff] }
 0x389   : > { %v5976_v10 = vmul.f32 %v5456_v33, %v7610_v35  ;;  %v7620_v7 = vld [vmem:[#allocation44_spill] sm:$0xff] }
 0x38a   : > { %v2196_v39 = vmul.f32 1.442695, %v2056_v13  ;;  %v2198_v6 = vmul.f32 1.442695, %v2057_v62  ;;  %7614 = vst [vmem:[#allocation62_spill] sm:$0xff] %v5990_v15  ;;  %v5994_v13 = vmul.f32 %v5445_v57, %v5676_v27  ;;  %v6002_v62 = vmul.f32 %v5469_v48, %v7618_v14  ;;  %v7621_v27 = vld [vmem:[#allocation45_spill] sm:$0xff] }
 0x38b   : > { %1958 = vmax.xlane.f32.xlu1 %v1957_v46  ;;  %v5959_v2 = vpop.xlane.xlu1 %1874  ;;  %7611 = vst [vmem:[#allocation66_spill] sm:$0xff] %v5976_v10  ;;  %v1999_v51 = vmax.f32 %v5976_v10, %v5980_v40  ;;  %v6018_v14 = vmul.f32 %v5469_v48, %v5666_v25  ;;  %v7624_v40 = vld [vmem:[#allocation91_spill] sm:$0xff]  ;;  %v7628_v25 = vld [vmem:[#allocation96_spill] sm:$0xff] }
 0x38c   : > { %4071 = vpow2.f32 %v2196_v39  ;;  %7615 = vst [vmem:[#allocation64_spill] sm:$0xff] %v5994_v13  ;;  %7619 = vst [vmem:[#allocation60_spill] sm:$0xff] %v6002_v62  ;;  %v1938_v39 = vpop.xlane.xlu0 %1937  ;;  %v1951_v33 = vmax.f32 %v5990_v15, %v5994_v13 }
 0x38d   : > { %4073 = vpow2.f32 %v2198_v6  ;;  %v2101_v6 = vsub.f32 %v7621_v27, %v1938_v39  ;;  %7623 = vst [vmem:[#allocation77_spill] sm:$0xff] %v6018_v14 }
 0x38f   : > { %2003 = vmax.xlane.f32.xlu1 %v2002_v28  ;;  %v5972_v46 = vpop.xlane.xlu1 %1877  ;;  %v5998_v28 = vmul.f32 %v5480_v32, %v7616_v44  ;;  %v6014_v44 = vmul.f32 %v5480_v32, %v5662_v18  ;;  %v7627_v18 = vld [vmem:[#allocation94_spill] sm:$0xff] }
 0x391   : > { %7617 = vst [vmem:[#allocation58_spill] sm:$0xff] %v5998_v28  ;;  %v1996_v57 = vmax.f32 %v5998_v28, %v6002_v62  ;;  %7622 = vst [vmem:[#allocation76_spill] sm:$0xff] %v6014_v44  ;;  %v2286_v62 = vmul.f32 1.442695, %v2101_v6  ;;  %v1941_v28 = vpop.xlane.xlu0 %1940  ;;  %v1948_v32 = vmax.f32 %v6014_v44, %v6018_v14 }
 0x393   : > { %1955 = vmax.xlane.f32.xlu1 %v1954_v50  ;;  %v5984_v42 = vpop.xlane.xlu1 %1880  ;;  %v2100_v50 = vsub.f32 %v7620_v7, %v1938_v39 }
 0x395   : > { %v2284_v7 = vmul.f32 1.442695, %v2100_v50  ;;  %v7631_v50 = vld [vmem:[#allocation47_spill] sm:$0xff]  ;;  %v1947_v14 = vpop.xlane.xlu0 %1946 }
 0x397   : > { %2000 = vmax.xlane.f32.xlu1 %v1999_v51  ;;  %v6004_v35 = vpop.xlane.xlu1 %1883 }
 0x399   : > { %v6022_v27 = vpop.eup %4071 }
 0x39a   : > { %7626 = vst [vmem:[#allocation54_spill] sm:$0xff] %v6022_v27 }
 0x39b   : > { %1952 = vmax.xlane.f32.xlu1 %v1951_v33 }
 0x39c   : > { %v1887_v51 = vpop.xlane.xlu1 %1886 }
 0x39d   : > { %v2066_v10 = vsub.f32 %v7624_v40, %v1887_v51  ;;  %v2067_v13 = vsub.f32 %v7625_v36, %v1887_v51  ;;  %v6028_v40 = vpop.eup %4073 }
 0x39e   : > { %7629 = vst [vmem:[#allocation56_spill] sm:$0xff] %v6028_v40 }
 0x39f   : > { %v2216_v33 = vmul.f32 1.442695, %v2066_v10  ;;  %v2218_v15 = vmul.f32 1.442695, %v2067_v13  ;;  %1997 = vmax.xlane.f32.xlu1 %v1996_v57  ;;  %v7630_v10 = vld [vmem:[#allocation46_spill] sm:$0xff]  ;;  %v2103_v57 = vsub.f32 %v7631_v50, %v1941_v28 }
 0x3a0   : > { %v1890_v39 = vpop.xlane.xlu1 %1889  ;;  %v2102_v36 = vsub.f32 %v7630_v10, %v1941_v28  ;;  %v7634_v50 = vld [vmem:[#allocation102_spill] sm:$0xff] }
 0x3a1   : > { %4075 = vpow2.f32 %v2216_v33  ;;  %v2068_v48 = vsub.f32 %v7627_v18, %v1890_v39  ;;  %v2069_v30 = vsub.f32 %v7628_v25, %v1890_v39  ;;  %v2446_v33 = vadd.f32 %v6028_v40, %v6022_v27  ;;  %v7632_v39 = vld [vmem:[#allocation98_spill] sm:$0xff] }
 0x3a2   : > { %4077 = vpow2.f32 %v2218_v15  ;;  %v2288_v18 = vmul.f32 1.442695, %v2102_v36  ;;  %v2290_v15 = vmul.f32 1.442695, %v2103_v57 }
 0x3a3   : > { %4079 = vpow2.f32 %v2284_v7  ;;  %v2220_v13 = vmul.f32 1.442695, %v2068_v48  ;;  %1949 = vmax.xlane.f32.xlu1 %v1948_v32  ;;  %v2222_v6 = vmul.f32 1.442695, %v2069_v30  ;;  %v7633_v7 = vld [vmem:[#allocation100_spill] sm:$0xff]  ;;  %v6037_v30 = vpop.xlane.xlu0 %1916 }
 0x3a4   : > { %4081 = vpow2.f32 %v2286_v62  ;;  %v1893_v51 = vpop.xlane.xlu1 %1892 }
 0x3a5   : > { %4083 = vpow2.f32 %v2220_v13  ;;  %v2070_v25 = vsub.f32 %v7632_v39, %v1893_v51  ;;  %v2071_v10 = vsub.f32 %v7633_v7, %v1893_v51  ;;  %v7639_v7 = vld [vmem:[#allocation48_spill] sm:$0xff] }
 0x3a6   : > { %4085 = vpow2.f32 %v2222_v6 }
 0x3a7   : > { %2447 = vadd.xlane.f32.xlu1 %v2446_v33  ;;  %4087 = vpow2.f32 %v2288_v18  ;;  %v2224_v62 = vmul.f32 1.442695, %v2070_v25  ;;  %v2226_v32 = vmul.f32 1.442695, %v2071_v10  ;;  %v2106_v10 = vsub.f32 %v7639_v7, %v1947_v14  ;;  %v7644_v7 = vld [vmem:[#allocation109_spill] sm:$0xff] }
 0x3a8   : > { %v1944_v48 = vpop.xlane.xlu1 %1943  ;;  %4089 = vpow2.f32 %v2290_v15 }
 0x3a9   : > { %v2104_v28 = vsub.f32 %v5633_v34, %v1944_v48  ;;  %v2105_v27 = vsub.f32 %v7634_v50, %v1944_v48  ;;  %4091 = vpow2.f32 %v2224_v62  ;;  %v6053_v48 = vpop.xlane.xlu0 %1913  ;;  %v2296_v44 = vmul.f32 1.442695, %v2106_v10  ;;  %v7649_v10 = vld [vmem:[#allocation112_spill] sm:$0xff] }
 0x3aa   : > { %4093 = vpow2.f32 %v2226_v32 }
 0x3ab   : > { %v2292_v57 = vmul.f32 1.442695, %v2104_v28  ;;  %v2294_v33 = vmul.f32 1.442695, %v2105_v27  ;;  %v7641_v28 = vld [vmem:[#allocation49_spill] sm:$0xff] }
 0x3ac   : > { %v1896_v36 = vpop.xlane.xlu1 %1895  ;;  %v2107_v32 = vsub.f32 %v7641_v28, %v1947_v14  ;;  %v7647_v28 = vld [vmem:[#allocation108_spill] sm:$0xff] }
 0x3ad   : > { %v2072_v6 = vsub.f32 %v5639_v55, %v1896_v36  ;;  %v2073_v34 = vsub.f32 %v5642_v19, %v1896_v36  ;;  %4095 = vpow2.f32 %v2292_v57  ;;  %v7645_v57 = vld [vmem:[#allocation106_spill] sm:$0xff] }
 0x3ae   : > { %v6040_v13 = vpop.eup %4075  ;;  %4097 = vpow2.f32 %v2294_v33  ;;  %v2298_v33 = vmul.f32 1.442695, %v2107_v32 }
 0x3af   : > { %7635 = vst [vmem:[#allocation50_spill] sm:$0xff] %v6040_v13  ;;  %v6042_v39 = vpop.eup %4077  ;;  %v2228_v62 = vmul.f32 1.442695, %v2072_v6  ;;  %v2230_v27 = vmul.f32 1.442695, %v2073_v34  ;;  %v6067_v34 = vpop.xlane.xlu0 %1910 }
 0x3b0   : > { %7636 = vst [vmem:[#allocation52_spill] sm:$0xff] %v6042_v39  ;;  %v6045_v51 = vpop.eup %4079  ;;  %v1899_v18 = vpop.xlane.xlu1 %1898  ;;  %v2461_v25 = vadd.f32 %v6042_v39, %v6040_v13  ;;  %v7643_v13 = vld [vmem:[#allocation110_spill] sm:$0xff] }
 0x3b1   : > { %7637 = vst [vmem:[#allocation44_spill] sm:$0xff] %v6045_v51  ;;  %v6050_v15 = vpop.eup %4081  ;;  %4099 = vpow2.f32 %v2228_v62  ;;  %v2074_v6 = vsub.f32 %v7645_v57, %v1899_v18 }
 0x3b2   : > { %7638 = vst [vmem:[#allocation45_spill] sm:$0xff] %v6050_v15  ;;  %2462 = vadd.xlane.f32.xlu0 %v2461_v25  ;;  %v6055_v55 = vpop.eup %4083  ;;  %v2512_v50 = vadd.f32 %v6050_v15, %v6045_v51  ;;  %4101 = vpow2.f32 %v2230_v27  ;;  %v2075_v51 = vsub.f32 %v7647_v28, %v1899_v18  ;;  %v7653_v28 = vld [vmem:[#allocation43_spill] sm:$0xff] }
 0x3b3   : > { %7640 = vst [vmem:[#allocation91_spill] sm:$0xff] %v6055_v55  ;;  %v6060_v36 = vpop.eup %4085  ;;  %v2232_v32 = vmul.f32 1.442695, %v2074_v6 }
 0x3b4   : > { %v1869_v19 = vpop.xlane.xlu1 %1868  ;;  %7642 = vst [vmem:[#allocation92_spill] sm:$0xff] %v6060_v36  ;;  %v6065_v14 = vpop.eup %4087 }
 0x3b5   : > { %v2054_v39 = vsub.f32 %v7643_v13, %v1869_v19  ;;  %v2055_v40 = vsub.f32 %v7644_v7, %v1869_v19  ;;  %7646 = vst [vmem:[#allocation94_spill] sm:$0xff] %v6065_v14  ;;  %v2464_v13 = vadd.f32 %v6060_v36, %v6055_v55  ;;  %v6072_v19 = vpop.eup %4089  ;;  %v2097_v55 = vsub.f32 %v7653_v28, %v5832_v45 }
 0x3b6   : > { %2513 = vadd.xlane.f32.xlu0 %v2512_v50  ;;  %7648 = vst [vmem:[#allocation96_spill] sm:$0xff] %v6072_v19  ;;  %v7650_v50 = vld [vmem:[#allocation111_spill] sm:$0xff]  ;;  %v6078_v57 = vpop.eup %4091 }
 0x3b7   : > { %v2192_v25 = vmul.f32 1.442695, %v2054_v39  ;;  %v2194_v21 = vmul.f32 1.442695, %v2055_v40  ;;  %v7651_v40 = vld [vmem:[#allocation42_spill] sm:$0xff]  ;;  %7652 = vst [vmem:[#allocation46_spill] sm:$0xff] %v6078_v57 }
 0x3b8   : > { %v1866_v15 = vpop.xlane.xlu1 %1865  ;;  %v2096_v7 = vsub.f32 %v7651_v40, %v5832_v45  ;;  %v7657_v45 = vld [vmem:[#allocation87_spill] sm:$0xff]  ;;  %v2278_v28 = vmul.f32 1.442695, %v2097_v55  ;;  %v7664_v55 = vld [vmem:[#allocation41_spill] sm:$0xff] }
 0x3b9   : > { %4103 = vpow2.f32 %v2192_v25  ;;  %v2052_v62 = vsub.f32 %v7649_v10, %v1866_v15  ;;  %v2053_v39 = vsub.f32 %v7650_v50, %v1866_v15  ;;  %v2234_v25 = vmul.f32 1.442695, %v2075_v51  ;;  %v6084_v10 = vpop.eup %4093  ;;  %v6088_v50 = vpop.xlane.xlu0 %1907 }
 0x3ba   : > { %4105 = vpow2.f32 %v2194_v21  ;;  %2465 = vadd.xlane.f32.xlu0 %v2464_v13  ;;  %v2515_v15 = vadd.f32 %v6072_v19, %v6065_v14  ;;  %7654 = vst [vmem:[#allocation47_spill] sm:$0xff] %v6084_v10  ;;  %v7655_v21 = vld [vmem:[#allocation114_spill] sm:$0xff]  ;;  %v6092_v40 = vpop.eup %4095 }
 0x3bb   : > { %4107 = vpow2.f32 %v2296_v44  ;;  %v2188_v27 = vmul.f32 1.442695, %v2052_v62  ;;  %v2190_v18 = vmul.f32 1.442695, %v2053_v39  ;;  %v7656_v44 = vld [vmem:[#allocation113_spill] sm:$0xff]  ;;  %7658 = vst [vmem:[#allocation98_spill] sm:$0xff] %v6092_v40 }
 0x3bc   : > { %4109 = vpow2.f32 %v2298_v33  ;;  %v1863_v36 = vpop.xlane.xlu1 %1862  ;;  %v2276_v62 = vmul.f32 1.442695, %v2096_v7  ;;  %v2064_v33 = vsub.f32 %v7657_v45, %v6004_v35  ;;  %v6098_v7 = vpop.eup %4097  ;;  %v2095_v45 = vsub.f32 %v7664_v55, %v5822_v47 }
 0x3bd   : > { %4111 = vpow2.f32 %v2188_v27  ;;  %v2050_v13 = vsub.f32 %v7655_v21, %v1863_v36  ;;  %v2051_v6 = vsub.f32 %v7656_v44, %v1863_v36  ;;  %v7659_v27 = vld [vmem:[#allocation88_spill] sm:$0xff]  ;;  %v2467_v36 = vadd.f32 %v6084_v10, %v6078_v57  ;;  %7660 = vst [vmem:[#allocation100_spill] sm:$0xff] %v6098_v7  ;;  %v7662_v44 = vld [vmem:[#allocation115_spill] sm:$0xff] }
 0x3be   : > { %4113 = vpow2.f32 %v2190_v18  ;;  %2516 = vadd.xlane.f32.xlu0 %v2515_v15  ;;  %v2065_v14 = vsub.f32 %v7659_v27, %v6004_v35  ;;  %v7661_v18 = vld [vmem:[#allocation116_spill] sm:$0xff]  ;;  %v2212_v35 = vmul.f32 1.442695, %v2064_v33  ;;  %v6106_v57 = vpop.eup %4099 }
 0x3bf   : > { %4115 = vpow2.f32 %v2232_v32  ;;  %v2184_v51 = vmul.f32 1.442695, %v2050_v13  ;;  %v2186_v39 = vmul.f32 1.442695, %v2051_v6  ;;  %v7663_v13 = vld [vmem:[#allocation40_spill] sm:$0xff]  ;;  %7665 = vst [vmem:[#allocation102_spill] sm:$0xff] %v6106_v57 }
 0x3c0   : > { %4117 = vpow2.f32 %v2234_v25  ;;  %v1860_v21 = vpop.xlane.xlu1 %1859  ;;  %v2094_v6 = vsub.f32 %v7663_v13, %v5822_v47  ;;  %v7667_v47 = vld [vmem:[#allocation118_spill] sm:$0xff] }
 0x3c1   : > { %4119 = vpow2.f32 %v2184_v51  ;;  %v2048_v15 = vsub.f32 %v7661_v18, %v1860_v21  ;;  %v2049_v32 = vsub.f32 %v7662_v44, %v1860_v21  ;;  %v6108_v51 = vpop.xlane.xlu0 %1904  ;;  %v2214_v18 = vmul.f32 1.442695, %v2065_v14  ;;  %v6112_v44 = vpop.eup %4101  ;;  %v7671_v14 = vld [vmem:[#allocation83_spill] sm:$0xff] }
 0x3c2   : > { %4121 = vpow2.f32 %v2186_v39  ;;  %2468 = vadd.xlane.f32.xlu0 %v2467_v36  ;;  %v2518_v21 = vadd.f32 %v6098_v7, %v6092_v40  ;;  %7666 = vst [vmem:[#allocation48_spill] sm:$0xff] %v6112_v44  ;;  %v7668_v36 = vld [vmem:[#allocation117_spill] sm:$0xff]  ;;  %v2062_v13 = vsub.f32 %v7671_v14, %v5984_v42 }
 0x3c3   : > { %4123 = vpow2.f32 %v2276_v62  ;;  %v2180_v25 = vmul.f32 1.442695, %v2048_v15  ;;  %v2182_v27 = vmul.f32 1.442695, %v2049_v32  ;;  %v2272_v15 = vmul.f32 1.442695, %v2094_v6 }
 0x3c4   : > { %4125 = vpow2.f32 %v2278_v28  ;;  %v1857_v10 = vpop.xlane.xlu1 %1856  ;;  %v2274_v32 = vmul.f32 1.442695, %v2095_v45  ;;  %v2470_v45 = vadd.f32 %v6112_v44, %v6106_v57 }
 0x3c5   : > { %4127 = vpow2.f32 %v2180_v25  ;;  %v2046_v39 = vsub.f32 %v7667_v47, %v1857_v10  ;;  %v2047_v62 = vsub.f32 %v7668_v36, %v1857_v10  ;;  %v7673_v25 = vld [vmem:[#allocation84_spill] sm:$0xff] }
 0x3c6   : > { %v6116_v33 = vpop.eup %4103  ;;  %4129 = vpow2.f32 %v2182_v27  ;;  %2519 = vadd.xlane.f32.xlu0 %v2518_v21  ;;  %v2063_v47 = vsub.f32 %v7673_v25, %v5984_v42  ;;  %v7675_v21 = vld [vmem:[#allocation119_spill] sm:$0xff]  ;;  %v6140_v25 = vpop.xlane.xlu0 %1901 }
 0x3c7   : > { %7669 = vst [vmem:[#allocation49_spill] sm:$0xff] %v6116_v33  ;;  %v6118_v28 = vpop.eup %4105  ;;  %4131 = vpow2.f32 %v2212_v35  ;;  %v2176_v55 = vmul.f32 1.442695, %v2046_v39  ;;  %v2178_v40 = vmul.f32 1.442695, %v2047_v62  ;;  %v7677_v62 = vld [vmem:[#allocation38_spill] sm:$0xff] }
 0x3c8   : > { %7670 = vst [vmem:[#allocation110_spill] sm:$0xff] %v6118_v28  ;;  %v6122_v7 = vpop.eup %4107  ;;  %4133 = vpow2.f32 %v2214_v18  ;;  %v1854_v10 = vpop.xlane.xlu1 %1853  ;;  %v2443_v6 = vadd.f32 %v6118_v28, %v6116_v33  ;;  %v2092_v42 = vsub.f32 %v7677_v62, %v5812_v5  ;;  %v7678_v18 = vld [vmem:[#allocation39_spill] sm:$0xff] }
 0x3c9   : > { %7672 = vst [vmem:[#allocation109_spill] sm:$0xff] %v6122_v7  ;;  %v6130_v27 = vpop.eup %4109  ;;  %4135 = vpow2.f32 %v2176_v55  ;;  %v2044_v35 = vsub.f32 %v5750_v26, %v1854_v10  ;;  %v2045_v39 = vsub.f32 %v7675_v21, %v1854_v10  ;;  %v2093_v14 = vsub.f32 %v7678_v18, %v5812_v5  ;;  %v7686_v18 = vld [vmem:[#allocation81_spill] sm:$0xff] }
 0x3ca   : > { %7674 = vst [vmem:[#allocation106_spill] sm:$0xff] %v6130_v27  ;;  %v6134_v36 = vpop.eup %4111  ;;  %4137 = vpow2.f32 %v2178_v40  ;;  %2444 = vadd.xlane.f32.xlu1 %v2443_v6  ;;  %2471 = vadd.xlane.f32.xlu0 %v2470_v45  ;;  %v2208_v55 = vmul.f32 1.442695, %v2062_v13  ;;  %v2210_v21 = vmul.f32 1.442695, %v2063_v47  ;;  %v2521_v40 = vadd.f32 %v6130_v27, %v6122_v7 }
 0x3cb   : > { %7676 = vst [vmem:[#allocation108_spill] sm:$0xff] %v6134_v36  ;;  %v6142_v57 = vpop.eup %4113  ;;  %4139 = vpow2.f32 %v2272_v15  ;;  %v2172_v26 = vmul.f32 1.442695, %v2044_v35  ;;  %v2174_v44 = vmul.f32 1.442695, %v2045_v39  ;;  %v6156_v15 = vpop.xlane.xlu0 %2024  ;;  %v7684_v35 = vld [vmem:[#allocation80_spill] sm:$0xff] }
 0x3cc   : > { %7679 = vst [vmem:[#allocation112_spill] sm:$0xff] %v6142_v57  ;;  %v6144_v10 = vpop.eup %4115  ;;  %4141 = vpow2.f32 %v2274_v32  ;;  %v6146_v33 = vpop.xlane.xlu1 %2018  ;;  %v2440_v5 = vadd.f32 %v6142_v57, %v6134_v36  ;;  %v2268_v13 = vmul.f32 1.442695, %v2092_v42  ;;  %v2270_v47 = vmul.f32 1.442695, %v2093_v14 }
 0x3cd   : > { %7680 = vst [vmem:[#allocation111_spill] sm:$0xff] %v6144_v10  ;;  %v6152_v6 = vpop.eup %4117  ;;  %4143 = vpow2.f32 %v2172_v26  ;;  %v2060_v39 = vsub.f32 %v7684_v35, %v5972_v46  ;;  %v2061_v26 = vsub.f32 %v7686_v18, %v5972_v46 }
 0x3ce   : > { %7681 = vst [vmem:[#allocation42_spill] sm:$0xff] %v6152_v6  ;;  %v6154_v45 = vpop.eup %4119  ;;  %4145 = vpow2.f32 %v2174_v44  ;;  %2441 = vadd.xlane.f32.xlu1 %v2440_v5  ;;  %2522 = vadd.xlane.f32.xlu0 %v2521_v40  ;;  %v2473_v5 = vadd.f32 %v6152_v6, %v6144_v10  ;;  %v7690_v40 = vld [vmem:[#allocation36_spill] sm:$0xff] }
 0x3cf   : > { %7682 = vst [vmem:[#allocation43_spill] sm:$0xff] %v6154_v45  ;;  %v6158_v32 = vpop.eup %4121  ;;  %4147 = vpow2.f32 %v2208_v55  ;;  %v2090_v46 = vsub.f32 %v7690_v40, %v5802_v17  ;;  %v2204_v18 = vmul.f32 1.442695, %v2060_v39  ;;  %v2206_v10 = vmul.f32 1.442695, %v2061_v26  ;;  %v6184_v6 = vpop.xlane.xlu0 %2027  ;;  %v7696_v39 = vld [vmem:[#allocation78_spill] sm:$0xff] }
 0x3d0   : > { %7683 = vst [vmem:[#allocation114_spill] sm:$0xff] %v6158_v32  ;;  %v6162_v62 = vpop.eup %4123  ;;  %4149 = vpow2.f32 %v2210_v21  ;;  %v6166_v7 = vpop.xlane.xlu1 %2021  ;;  %v2437_v44 = vadd.f32 %v6158_v32, %v6154_v45  ;;  %v7691_v21 = vld [vmem:[#allocation37_spill] sm:$0xff]  ;;  %v2058_v26 = vsub.f32 %v7696_v39, %v5959_v2 }
 0x3d1   : > { %7685 = vst [vmem:[#allocation113_spill] sm:$0xff] %v6162_v62  ;;  %v6172_v42 = vpop.eup %4125  ;;  %v2091_v35 = vsub.f32 %v7691_v21, %v5802_v17  ;;  %4151 = vpow2.f32 %v2268_v13  ;;  %v2264_v13 = vmul.f32 1.442695, %v2090_v46 }
 0x3d2   : > { %7687 = vst [vmem:[#allocation87_spill] sm:$0xff] %v6172_v42  ;;  %v6174_v14 = vpop.eup %4127  ;;  %2438 = vadd.xlane.f32.xlu1 %v2437_v44  ;;  %2474 = vadd.xlane.f32.xlu0 %v2473_v5  ;;  %4153 = vpow2.f32 %v2270_v47  ;;  %v2506_v5 = vadd.f32 %v6172_v42, %v6162_v62 }
 0x3d3   : > { %7688 = vst [vmem:[#allocation88_spill] sm:$0xff] %v6174_v14  ;;  %v6176_v55 = vpop.eup %4129  ;;  %v2266_v47 = vmul.f32 1.442695, %v2091_v35  ;;  %4155 = vpow2.f32 %v2204_v18  ;;  %v6214_v39 = vpop.xlane.xlu0 %2030 }
 0x3d4   : > { %7689 = vst [vmem:[#allocation116_spill] sm:$0xff] %v6176_v55  ;;  %v6182_v45 = vpop.eup %4131  ;;  %v6186_v32 = vpop.xlane.xlu1 %1973  ;;  %v2434_v44 = vadd.f32 %v6176_v55, %v6174_v14  ;;  %v7698_v14 = vld [vmem:[#allocation79_spill] sm:$0xff]  ;;  %4157 = vpow2.f32 %v2206_v10 }
 0x3d5   : > { %7692 = vst [vmem:[#allocation115_spill] sm:$0xff] %v6182_v45  ;;  %v6192_v40 = vpop.eup %4133  ;;  %v2059_v55 = vsub.f32 %v7698_v14, %v5959_v2  ;;  %v7702_v2 = vld [vmem:[#allocation34_spill] sm:$0xff]  ;;  %v7703_v14 = vld [vmem:[#allocation35_spill] sm:$0xff]  ;;  %4159 = vpow2.f32 %v2264_v13 }
 0x3d6   : > { %7693 = vst [vmem:[#allocation40_spill] sm:$0xff] %v6192_v40  ;;  %v6194_v27 = vpop.eup %4135  ;;  %2435 = vadd.xlane.f32.xlu1 %v2434_v44  ;;  %2507 = vadd.xlane.f32.xlu0 %v2506_v5  ;;  %v2458_v5 = vadd.f32 %v6192_v40, %v6182_v45  ;;  %v2088_v10 = vsub.f32 %v7702_v2, %v5792_v37  ;;  %4161 = vpow2.f32 %v2266_v47  ;;  %v7708_v47 = vld [vmem:[#allocation51_spill] sm:$0xff] }
 0x3d7   : > { %7694 = vst [vmem:[#allocation41_spill] sm:$0xff] %v6194_v27  ;;  %v6196_v17 = vpop.eup %4137  ;;  %v2089_v42 = vsub.f32 %v7703_v14, %v5792_v37  ;;  %v2202_v45 = vmul.f32 1.442695, %v2059_v55  ;;  %v7706_v37 = vld [vmem:[#allocation53_spill] sm:$0xff]  ;;  %v2087_v14 = vsub.f32 %v7708_v47, %v6037_v30 }
 0x3d8   : > { %7695 = vst [vmem:[#allocation118_spill] sm:$0xff] %v6196_v17  ;;  %v6200_v21 = vpop.eup %4139  ;;  %v6204_v62 = vpop.xlane.xlu1 %1976  ;;  %v2431_v44 = vadd.f32 %v6196_v17, %v6194_v27  ;;  %v2200_v27 = vmul.f32 1.442695, %v2058_v26  ;;  %v2260_v2 = vmul.f32 1.442695, %v2088_v10  ;;  %v2086_v13 = vsub.f32 %v7706_v37, %v6037_v30 }
 0x3d9   : > { %7697 = vst [vmem:[#allocation117_spill] sm:$0xff] %v6200_v21  ;;  %v6210_v46 = vpop.eup %4141  ;;  %v2262_v55 = vmul.f32 1.442695, %v2089_v42  ;;  %v2258_v30 = vmul.f32 1.442695, %v2087_v14 }
 0x3da   : > { %7699 = vst [vmem:[#allocation83_spill] sm:$0xff] %v6210_v46  ;;  %v6212_v35 = vpop.eup %4143  ;;  %2432 = vadd.xlane.f32.xlu1 %v2431_v44  ;;  %2459 = vadd.xlane.f32.xlu0 %v2458_v5  ;;  %v2503_v5 = vadd.f32 %v6210_v46, %v6200_v21  ;;  %4163 = vpow2.f32 %v2200_v27  ;;  %v2256_v10 = vmul.f32 1.442695, %v2086_v13  ;;  %v7710_v27 = vld [vmem:[#allocation57_spill] sm:$0xff] }
 0x3db   : > { %7700 = vst [vmem:[#allocation84_spill] sm:$0xff] %v6212_v35  ;;  %v6216_v18 = vpop.eup %4145  ;;  %4165 = vpow2.f32 %v2202_v45  ;;  %v2084_v37 = vsub.f32 %v7710_v27, %v6053_v48  ;;  %v7712_v45 = vld [vmem:[#allocation55_spill] sm:$0xff] }
 0x3dc   : > { %7701 = vst [vmem:[#allocation119_spill] sm:$0xff] %v6216_v18  ;;  %v6222_v17 = vpop.eup %4147  ;;  %v6224_v40 = vpop.xlane.xlu1 %1979  ;;  %v2428_v44 = vadd.f32 %v6216_v18, %v6212_v35  ;;  %4167 = vpow2.f32 %v2260_v2  ;;  %v2085_v47 = vsub.f32 %v7712_v45, %v6053_v48  ;;  %v7714_v2 = vld [vmem:[#allocation61_spill] sm:$0xff] }
 0x3dd   : > { %7704 = vst [vmem:[#allocation38_spill] sm:$0xff] %v6222_v17  ;;  %v6230_v36 = vpop.eup %4149  ;;  %v6238_v35 = vpop.xlane.xlu0 %2033  ;;  %4169 = vpow2.f32 %v2262_v55  ;;  %v2082_v13 = vsub.f32 %v7714_v2, %v6067_v34  ;;  %v2252_v55 = vmul.f32 1.442695, %v2084_v37  ;;  %v7716_v48 = vld [vmem:[#allocation65_spill] sm:$0xff] }
 0x3de   : > { %7705 = vst [vmem:[#allocation39_spill] sm:$0xff] %v6230_v36  ;;  %2429 = vadd.xlane.f32.xlu1 %v2428_v44  ;;  %2504 = vadd.xlane.f32.xlu0 %v2503_v5  ;;  %v6234_v26 = vpop.eup %4151  ;;  %v2455_v44 = vadd.f32 %v6230_v36, %v6222_v17  ;;  %4171 = vpow2.f32 %v2256_v10  ;;  %v2080_v14 = vsub.f32 %v7716_v48, %v6088_v50  ;;  %v7720_v48 = vld [vmem:[#allocation67_spill] sm:$0xff] }
 0x3df   : > { %7707 = vst [vmem:[#allocation80_spill] sm:$0xff] %v6234_v26  ;;  %v6244_v5 = vpop.eup %4153  ;;  %4173 = vpow2.f32 %v2258_v30  ;;  %v2079_v19 = vsub.f32 %v7720_v48, %v6108_v51 }
 0x3e0   : > { %v6240_v18 = vpop.xlane.xlu1 %1982  ;;  %7709 = vst [vmem:[#allocation81_spill] sm:$0xff] %v6244_v5  ;;  %v6248_v42 = vpop.eup %4155  ;;  %v2500_v17 = vadd.f32 %v6244_v5, %v6234_v26  ;;  %v2254_v26 = vmul.f32 1.442695, %v2085_v47  ;;  %v7718_v5 = vld [vmem:[#allocation63_spill] sm:$0xff]  ;;  %4175 = vpow2.f32 %v2252_v55  ;;  %v2244_v30 = vmul.f32 1.442695, %v2080_v14 }
 0x3e1   : > { %7711 = vst [vmem:[#allocation36_spill] sm:$0xff] %v6248_v42  ;;  %v6256_v36 = vpop.eup %4157  ;;  %v6262_v46 = vpop.xlane.xlu0 %2036  ;;  %v2081_v57 = vsub.f32 %v7718_v5, %v6088_v50  ;;  %v7722_v5 = vld [vmem:[#allocation73_spill] sm:$0xff]  ;;  %v2242_v55 = vmul.f32 1.442695, %v2079_v19 }
 0x3e2   : > { %2456 = vadd.xlane.f32.xlu0 %v2455_v44  ;;  %7713 = vst [vmem:[#allocation37_spill] sm:$0xff] %v6256_v36  ;;  %v7715_v44 = vld [vmem:[#allocation59_spill] sm:$0xff]  ;;  %v6266_v45 = vpop.eup %4159  ;;  %v2452_v2 = vadd.f32 %v6256_v36, %v6248_v42  ;;  %4177 = vpow2.f32 %v2254_v26  ;;  %v2076_v42 = vsub.f32 %v7722_v5, %v6140_v25 }
 0x3e3   : > { %v2083_v27 = vsub.f32 %v7715_v44, %v6067_v34  ;;  %7717 = vst [vmem:[#allocation78_spill] sm:$0xff] %v6266_v45  ;;  %v6272_v34 = vpop.eup %4161  ;;  %v2248_v44 = vmul.f32 1.442695, %v2082_v13  ;;  %v2246_v50 = vmul.f32 1.442695, %v2081_v57 }
 0x3e4   : > { %v6252_v21 = vpop.xlane.xlu1 %1985  ;;  %v2236_v14 = vmul.f32 1.442695, %v2076_v42 }
 0x3e5   : > { %v2250_v37 = vmul.f32 1.442695, %v2083_v27  ;;  %v6282_v36 = vpop.xlane.xlu0 %2039  ;;  %4179 = vpow2.f32 %v2248_v44  ;;  %v7723_v44 = vld [vmem:[#allocation71_spill] sm:$0xff] }
 0x3e6   : > { %2501 = vadd.xlane.f32.xlu0 %v2500_v17  ;;  %v7719_v17 = vld [vmem:[#allocation69_spill] sm:$0xff]  ;;  %v2077_v19 = vsub.f32 %v7723_v44, %v6140_v25 }
 0x3e7   : > { %v2078_v10 = vsub.f32 %v7719_v17, %v6108_v51  ;;  %v6278_v47 = vpop.eup %4163  ;;  %v2497_v17 = vadd.f32 %v6272_v34, %v6266_v45  ;;  %4181 = vpow2.f32 %v2250_v37 }
 0x3e8   : > { %v1989_v28 = vpop.xlane.xlu1 %1988  ;;  %7721 = vst [vmem:[#allocation79_spill] sm:$0xff] %v6278_v47  ;;  %v6286_v27 = vpop.eup %4165  ;;  %4183 = vpow2.f32 %v2244_v30  ;;  %v2238_v25 = vmul.f32 1.442695, %v2077_v19 }
 0x3e9   : > { %v2240_v51 = vmul.f32 1.442695, %v2078_v10  ;;  %v6289_v57 = vpop.eup %4167  ;;  %4185 = vpow2.f32 %v2246_v50  ;;  %v2449_v5 = vadd.f32 %v6286_v27, %v6278_v47  ;;  %v2043_v37 = vpop.xlane.xlu0 %2042  ;;  %v2134_v42 = vsub.f32 %v5827_v11, %v1989_v28 }
 0x3ea   : > { %2453 = vadd.xlane.f32.xlu0 %v2452_v2  ;;  %v6294_v45 = vpop.eup %4169 }
 0x3eb   : > { %4187 = vpow2.f32 %v2240_v51 }
 0x3ec   : > { %v1992_v13 = vpop.xlane.xlu1 %1991  ;;  %4189 = vpow2.f32 %v2242_v55  ;;  %v7724_v55 = vld [vmem:[#allocation105_spill] sm:$0xff] }
 0x3ed   : > { %v2136_v26 = vsub.f32 %v5835_v3, %v1992_v13  ;;  %v2137_v2 = vsub.f32 %v5840_v9, %v1992_v13  ;;  %v2135_v9 = vsub.f32 %v5830_v43, %v1989_v28  ;;  %4191 = vpow2.f32 %v2236_v14 }
 0x3ee   : > { %2498 = vadd.xlane.f32.xlu0 %v2497_v17  ;;  %v6302_v17 = vpop.eup %4171  ;;  %v2170_v11 = vsub.f32 %v7724_v55, %v2043_v37  ;;  %v2352_v28 = vmul.f32 1.442695, %v2134_v42 }
 0x3ef   : > { %v2356_v30 = vmul.f32 1.442695, %v2136_v26  ;;  %v2358_v51 = vmul.f32 1.442695, %v2137_v2  ;;  %v2132_v26 = vsub.f32 %v5817_v38, %v6252_v21  ;;  %v2354_v14 = vmul.f32 1.442695, %v2135_v9 }
 0x3f0   : > { %v1995_v48 = vpop.xlane.xlu1 %1994  ;;  %v2424_v38 = vmul.f32 1.442695, %v2170_v11  ;;  %v7729_v9 = vld [vmem:[#allocation104_spill] sm:$0xff] }
 0x3f1   : > { %v2138_v10 = vsub.f32 %v5847_v4, %v1995_v48  ;;  %v2139_v3 = vsub.f32 %v5850_v60, %v1995_v48  ;;  %v2494_v4 = vadd.f32 %v6294_v45, %v6289_v57  ;;  %v6308_v60 = vpop.eup %4173  ;;  %v7725_v48 = vld [vmem:[#allocation107_spill] sm:$0xff] }
 0x3f2   : > { %2450 = vadd.xlane.f32.xlu0 %v2449_v5  ;;  %v2171_v43 = vsub.f32 %v7725_v48, %v2043_v37  ;;  %v6314_v2 = vpop.eup %4175  ;;  %v2133_v5 = vsub.f32 %v5820_v24, %v6252_v21  ;;  %v2491_v19 = vadd.f32 %v6308_v60, %v6302_v17  ;;  %v2130_v21 = vsub.f32 %v5807_v22, %v6240_v18 }
 0x3f3   : > { %v2360_v50 = vmul.f32 1.442695, %v2138_v10  ;;  %v2362_v13 = vmul.f32 1.442695, %v2139_v3  ;;  %7726 = vst [vmem:[#allocation34_spill] sm:$0xff] %v6314_v2  ;;  %v6322_v10 = vpop.eup %4177  ;;  %v7727_v3 = vld [vmem:[#allocation103_spill] sm:$0xff] }
 0x3f4   : > { %v6304_v47 = vpop.xlane.xlu1 %1970  ;;  %v2168_v37 = vsub.f32 %v7727_v3, %v6282_v36  ;;  %v6326_v42 = vpop.eup %4179  ;;  %v2350_v55 = vmul.f32 1.442695, %v2133_v5  ;;  %v7737_v5 = vld [vmem:[#allocation128_spill] sm:$0xff] }
 0x3f5   : > { %4193 = vpow2.f32 %v2360_v50  ;;  %7728 = vst [vmem:[#allocation35_spill] sm:$0xff] %v6326_v42  ;;  %v2426_v50 = vmul.f32 1.442695, %v2171_v43  ;;  %v6330_v24 = vpop.eup %4181  ;;  %v7733_v43 = vld [vmem:[#allocation99_spill] sm:$0xff]  ;;  %v2128_v3 = vsub.f32 %v7737_v5, %v6224_v40 }
 0x3f6   : > { %4195 = vpow2.f32 %v2362_v13  ;;  %2495 = vadd.xlane.f32.xlu0 %v2494_v4  ;;  %7730 = vst [vmem:[#allocation53_spill] sm:$0xff] %v6330_v24  ;;  %v2348_v13 = vmul.f32 1.442695, %v2132_v26  ;;  %v6334_v4 = vpop.eup %4183  ;;  %v2166_v22 = vsub.f32 %v7733_v43, %v6262_v46 }
 0x3f7   : > { %4197 = vpow2.f32 %v2356_v30  ;;  %v2169_v30 = vsub.f32 %v7729_v9, %v6282_v36  ;;  %7731 = vst [vmem:[#allocation51_spill] sm:$0xff] %v6334_v4  ;;  %v2488_v36 = vadd.f32 %v6322_v10, %v6314_v2  ;;  %v6342_v48 = vpop.eup %4185  ;;  %v2344_v9 = vmul.f32 1.442695, %v2130_v21  ;;  %v7741_v21 = vld [vmem:[#allocation97_spill] sm:$0xff] }
 0x3f8   : > { %4199 = vpow2.f32 %v2358_v51  ;;  %v6318_v44 = vpop.xlane.xlu1 %2015  ;;  %7732 = vst [vmem:[#allocation57_spill] sm:$0xff] %v6342_v48  ;;  %v6346_v26 = vpop.eup %4187 }
 0x3f9   : > { %4201 = vpow2.f32 %v2238_v25  ;;  %v2131_v25 = vsub.f32 %v5810_v20, %v6240_v18  ;;  %7734 = vst [vmem:[#allocation55_spill] sm:$0xff] %v6346_v26  ;;  %v2422_v20 = vmul.f32 1.442695, %v2169_v30  ;;  %v6350_v18 = vpop.eup %4189 }
 0x3fa   : > { %4203 = vpow2.f32 %v2352_v28  ;;  %2492 = vadd.xlane.f32.xlu0 %v2491_v19  ;;  %v2511_v51 = vpop.xlane.xlu0 %2510  ;;  %v2420_v28 = vmul.f32 1.442695, %v2168_v37  ;;  %7736 = vst [vmem:[#allocation61_spill] sm:$0xff] %v6350_v18  ;;  %v6360_v30 = vpop.eup %4191 }
 0x3fb   : > { %4205 = vpow2.f32 %v2354_v14  ;;  %v7735_v14 = vld [vmem:[#allocation101_spill] sm:$0xff]  ;;  %v2346_v37 = vmul.f32 1.442695, %v2131_v25 }
 0x3fc   : > { %4207 = vrcp.f32 %v2511_v51  ;;  %v6338_v11 = vpop.xlane.xlu1 %1967  ;;  %v2167_v19 = vsub.f32 %v7735_v14, %v6262_v46  ;;  %v7738_v51 = vld [vmem:[#allocation129_spill] sm:$0xff]  ;;  %v2485_v46 = vadd.f32 %v6330_v24, %v6326_v42  ;;  %v2416_v14 = vmul.f32 1.442695, %v2166_v22 }
 0x3fd   : > { %4209 = vpow2.f32 %v2424_v38  ;;  %v2129_v43 = vsub.f32 %v7738_v51, %v6224_v40  ;;  %v2340_v42 = vmul.f32 1.442695, %v2128_v3  ;;  %v7744_v3 = vld [vmem:[#allocation90_spill] sm:$0xff] }
 0x3fe   : > { %4211 = vpow2.f32 %v2426_v50  ;;  %2489 = vadd.xlane.f32.xlu0 %v2488_v36  ;;  %v7739_v50 = vld [vmem:[#allocation95_spill] sm:$0xff]  ;;  %v2418_v40 = vmul.f32 1.442695, %v2167_v19 }
 0x3ff   : > { %4213 = vpow2.f32 %v2348_v13  ;;  %v2164_v36 = vsub.f32 %v7739_v50, %v6238_v35  ;;  %v2165_v13 = vsub.f32 %v7741_v21, %v6238_v35  ;;  %v2482_v50 = vadd.f32 %v6342_v48, %v6334_v4 }
 0x400   : > { %4215 = vpow2.f32 %v2350_v55  ;;  %v6356_v38 = vpop.xlane.xlu1 %2012  ;;  %v7742_v55 = vld [vmem:[#allocation126_spill] sm:$0xff]  ;;  %v2342_v2 = vmul.f32 1.442695, %v2129_v43 }
 0x401   : > { %4217 = vpow2.f32 %v2420_v28  ;;  %v2126_v51 = vsub.f32 %v7742_v55, %v6204_v62  ;;  %v7743_v28 = vld [vmem:[#allocation127_spill] sm:$0xff]  ;;  %v7745_v55 = vld [vmem:[#allocation93_spill] sm:$0xff] }
 0x402   : > { %v6364_v5 = vpop.eup %4193  ;;  %4219 = vpow2.f32 %v2422_v20  ;;  %2486 = vadd.xlane.f32.xlu0 %v2485_v46  ;;  %v2127_v24 = vsub.f32 %v7743_v28, %v6204_v62  ;;  %v2412_v46 = vmul.f32 1.442695, %v2164_v36  ;;  %v2163_v4 = vsub.f32 %v7745_v55, %v6214_v39 }
 0x403   : > { %7740 = vst [vmem:[#allocation59_spill] sm:$0xff] %v6364_v5  ;;  %v6368_v25 = vpop.eup %4195  ;;  %4221 = vpow2.f32 %v2344_v9  ;;  %v2162_v9 = vsub.f32 %v7744_v3, %v6214_v39  ;;  %v2414_v62 = vmul.f32 1.442695, %v2165_v13  ;;  %v2336_v48 = vmul.f32 1.442695, %v2126_v51  ;;  %v7747_v3 = vld [vmem:[#allocation125_spill] sm:$0xff] }
 0x404   : > { %v6374_v22 = vpop.eup %4197  ;;  %4223 = vpow2.f32 %v2346_v37  ;;  %v6378_v35 = vpop.xlane.xlu1 %1964  ;;  %v2569_v19 = vadd.f32 %v6368_v25, %v6364_v5  ;;  %v7746_v37 = vld [vmem:[#allocation124_spill] sm:$0xff]  ;;  %v2479_v36 = vadd.f32 %v6350_v18, %v6346_v26  ;;  %v2125_v5 = vsub.f32 %v7747_v3, %v6186_v32 }
 0x405   : > { %v6382_v20 = vpop.eup %4199  ;;  %4225 = vpow2.f32 %v2416_v14  ;;  %v2124_v28 = vsub.f32 %v7746_v37, %v6186_v32  ;;  %v2338_v39 = vmul.f32 1.442695, %v2127_v24  ;;  %v2408_v37 = vmul.f32 1.442695, %v2162_v9 }
 0x406   : > { %v6386_v21 = vpop.eup %4201  ;;  %4227 = vpow2.f32 %v2418_v40  ;;  %2570 = vadd.xlane.f32.xlu1 %v2569_v19  ;;  %2483 = vadd.xlane.f32.xlu0 %v2482_v50  ;;  %v2566_v40 = vadd.f32 %v6382_v20, %v6374_v22  ;;  %v7748_v19 = vld [vmem:[#allocation86_spill] sm:$0xff]  ;;  %v2410_v18 = vmul.f32 1.442695, %v2163_v4 }
 0x407   : > { %v6390_v43 = vpop.eup %4203  ;;  %4229 = vpow2.f32 %v2340_v42  ;;  %v2160_v51 = vsub.f32 %v7748_v19, %v6184_v6  ;;  %v7749_v42 = vld [vmem:[#allocation89_spill] sm:$0xff]  ;;  %v2332_v3 = vmul.f32 1.442695, %v2124_v28  ;;  %v2476_v4 = vadd.f32 %v6386_v21, %v6360_v30 }
 0x408   : > { %v6396_v14 = vpop.eup %4205  ;;  %4231 = vpow2.f32 %v2342_v2  ;;  %v6400_v13 = vpop.xlane.xlu1 %2009  ;;  %v2161_v55 = vsub.f32 %v7749_v42, %v6184_v6  ;;  %v2122_v6 = vsub.f32 %v5856_v0, %v6304_v47  ;;  %v2120_v19 = vsub.f32 %v5876_v31, %v6338_v11  ;;  %v7752_v31 = vld [vmem:[#allocation122_spill] sm:$0xff] }
 0x409   : > { %v4208_v50 = vpop.eup %4207  ;;  %4233 = vpow2.f32 %v2412_v46  ;;  %v2334_v46 = vmul.f32 1.442695, %v2125_v5 }
 0x40a   : > { %v6408_v26 = vpop.eup %4209  ;;  %4235 = vpow2.f32 %v2414_v62  ;;  %2567 = vadd.xlane.f32.xlu1 %v2566_v40  ;;  %2480 = vadd.xlane.f32.xlu0 %v2479_v36  ;;  %v6411_v32 = vmul.f32 %v4208_v50, %v5884_v59  ;;  %v6414_v2 = vmul.f32 %v4208_v50, %v5882_v49  ;;  %v2123_v59 = vsub.f32 %v5860_v12, %v6304_v47  ;;  %v7751_v12 = vld [vmem:[#allocation85_spill] sm:$0xff] }
 0x40b   : > { %v6416_v24 = vpop.eup %4211  ;;  %4237 = vpow2.f32 %v2336_v48  ;;  %v2563_v49 = vadd.f32 %v6396_v14, %v6390_v43  ;;  %v7750_v48 = vld [vmem:[#allocation82_spill] sm:$0xff]  ;;  %v2404_v36 = vmul.f32 1.442695, %v2160_v51  ;;  %v2159_v47 = vsub.f32 %v7751_v12, %v6156_v15 }
 0x40c   : > { %v6422_v9 = vpop.eup %4213  ;;  %4239 = vpow2.f32 %v2338_v39  ;;  %v6426_v62 = vpop.xlane.xlu1 %1961  ;;  %2867 = vst [vmem:[%s4992_s7 + $0x1b8] sm:$0xff] %v6411_v32  ;;  %2866 = vst [vmem:[%s4992_s7 + $0x1b0] sm:$0xff] %v6414_v2  ;;  %v2158_v28 = vsub.f32 %v7750_v48, %v6156_v15  ;;  %v2406_v39 = vmul.f32 1.442695, %v2161_v55  ;;  %v2328_v50 = vmul.f32 1.442695, %v2122_v6 }
 0x40d   : > { %v6434_v0 = vpop.eup %4215  ;;  %4241 = vpow2.f32 %v2408_v37  ;;  %v2617_v51 = vadd.f32 %v6416_v24, %v6408_v26  ;;  %v2330_v37 = vmul.f32 1.442695, %v2123_v59  ;;  %v2121_v15 = vsub.f32 %v5880_v16, %v6338_v11 }
 0x40e   : > { %v6438_v5 = vpop.eup %4217  ;;  %4243 = vpow2.f32 %v2410_v18  ;;  %2564 = vadd.xlane.f32.xlu1 %v2563_v49  ;;  %2477 = vadd.xlane.f32.xlu0 %v2476_v4  ;;  %v2560_v55 = vadd.f32 %v6434_v0, %v6422_v9  ;;  %v2400_v6 = vmul.f32 1.442695, %v2158_v28  ;;  %v2156_v4 = vsub.f32 %v7752_v31, %v6166_v7 }
 0x40f   : > { %v6442_v40 = vpop.eup %4219  ;;  %4245 = vpow2.f32 %v2332_v3  ;;  %v2402_v48 = vmul.f32 1.442695, %v2159_v47  ;;  %v2324_v11 = vmul.f32 1.442695, %v2120_v19  ;;  %v2118_v28 = vsub.f32 %v5902_v61, %v6378_v35 }
 0x410   : > { %v6448_v42 = vpop.eup %4221  ;;  %4247 = vpow2.f32 %v2334_v46  ;;  %v6452_v18 = vpop.xlane.xlu1 %2006  ;;  %v7753_v46 = vld [vmem:[#allocation123_spill] sm:$0xff]  ;;  %v2326_v47 = vmul.f32 1.442695, %v2121_v15  ;;  %v2396_v19 = vmul.f32 1.442695, %v2156_v4 }
 0x411   : > { %v6456_v3 = vpop.eup %4223  ;;  %4249 = vpow2.f32 %v2404_v36  ;;  %v2157_v59 = vsub.f32 %v7753_v46, %v6166_v7  ;;  %v2614_v36 = vadd.f32 %v6442_v40, %v6438_v5 }
 0x412   : > { %v6460_v49 = vpop.eup %4225  ;;  %4251 = vpow2.f32 %v2406_v39  ;;  %2561 = vadd.xlane.f32.xlu1 %v2560_v55  ;;  %2618 = vadd.xlane.f32.xlu0 %v2617_v51  ;;  %v2119_v39 = vsub.f32 %v5906_v52, %v6378_v35  ;;  %v2557_v51 = vadd.f32 %v6456_v3, %v6448_v42  ;;  %v2320_v35 = vmul.f32 1.442695, %v2118_v28 }
 0x413   : > { %v6464_v16 = vpop.eup %4227  ;;  %4253 = vpow2.f32 %v2328_v50  ;;  %v7754_v50 = vld [vmem:[#allocation120_spill] sm:$0xff]  ;;  %v2398_v46 = vmul.f32 1.442695, %v2157_v59 }
 0x414   : > { %v6470_v12 = vpop.eup %4229  ;;  %4255 = vpow2.f32 %v2330_v37  ;;  %v1959_v7 = vpop.xlane.xlu1 %1958  ;;  %v2154_v61 = vsub.f32 %v7754_v50, %v6146_v33  ;;  %v7756_v37 = vld [vmem:[#allocation121_spill] sm:$0xff]  ;;  %v2611_v50 = vadd.f32 %v6464_v16, %v6460_v49 }
 0x415   : > { %v6476_v55 = vpop.eup %4231  ;;  %4257 = vpow2.f32 %v2400_v6  ;;  %v2155_v15 = vsub.f32 %v7756_v37, %v6146_v33  ;;  %v2116_v6 = vsub.f32 %v5922_v1, %v6426_v62  ;;  %v2117_v33 = vsub.f32 %v5926_v23, %v6426_v62 }
 0x416   : > { %v6480_v31 = vpop.eup %4233  ;;  %4259 = vpow2.f32 %v2402_v48  ;;  %2558 = vadd.xlane.f32.xlu1 %v2557_v51  ;;  %2615 = vadd.xlane.f32.xlu0 %v2614_v36  ;;  %v2322_v48 = vmul.f32 1.442695, %v2119_v39  ;;  %v2554_v36 = vadd.f32 %v6476_v55, %v6470_v12  ;;  %v2392_v28 = vmul.f32 1.442695, %v2154_v61 }
 0x417   : > { %7755 = vst [vmem:[#allocation65_spill] sm:$0xff] %v6480_v31  ;;  %v6484_v52 = vpop.eup %4235  ;;  %4261 = vpow2.f32 %v2324_v11  ;;  %v2152_v1 = vsub.f32 %v5864_v29, %v6318_v44  ;;  %v2394_v37 = vmul.f32 1.442695, %v2155_v15  ;;  %v2316_v62 = vmul.f32 1.442695, %v2116_v6 }
 0x418   : > { %7757 = vst [vmem:[#allocation63_spill] sm:$0xff] %v6484_v52  ;;  %v6490_v4 = vpop.eup %4237  ;;  %4263 = vpow2.f32 %v2326_v47  ;;  %v6494_v59 = vpop.xlane.xlu1 %2003  ;;  %v2153_v47 = vsub.f32 %v5868_v53, %v6318_v44  ;;  %v2114_v39 = vsub.f32 %v5942_v58, %v1959_v7  ;;  %v2608_v61 = vadd.f32 %v6484_v52, %v6480_v31  ;;  %v7839_v31 = vld [vmem:[#allocation111_spill] sm:$0xff] }
 0x419   : > { %v6498_v11 = vpop.eup %4239  ;;  %4265 = vpow2.f32 %v2396_v19  ;;  %v2318_v29 = vmul.f32 1.442695, %v2117_v33  ;;  %v2115_v15 = vsub.f32 %v5946_v41, %v1959_v7  ;;  %v2150_v58 = vsub.f32 %v5890_v54, %v6356_v38 }
 0x41a   : > { %v6502_v51 = vpop.eup %4241  ;;  %4267 = vpow2.f32 %v2398_v46  ;;  %2555 = vadd.xlane.f32.xlu1 %v2554_v36  ;;  %2612 = vadd.xlane.f32.xlu0 %v2611_v50  ;;  %v2551_v53 = vadd.f32 %v6498_v11, %v6490_v4  ;;  %v2390_v50 = vmul.f32 1.442695, %v2153_v47  ;;  %v2312_v7 = vmul.f32 1.442695, %v2114_v39 }
 0x41b   : > { %7758 = vst [vmem:[#allocation69_spill] sm:$0xff] %v6502_v51  ;;  %v6506_v23 = vpop.eup %4243  ;;  %4269 = vpow2.f32 %v2320_v35  ;;  %v2388_v35 = vmul.f32 1.442695, %v2152_v1  ;;  %v2314_v54 = vmul.f32 1.442695, %v2115_v15 }
 0x41c   : > { %7759 = vst [vmem:[#allocation67_spill] sm:$0xff] %v6506_v23  ;;  %v6511_v19 = vpop.eup %4245  ;;  %4271 = vpow2.f32 %v2322_v48  ;;  %v1956_v46 = vpop.xlane.xlu1 %1955  ;;  %v2151_v48 = vsub.f32 %v5894_v56, %v6356_v38  ;;  %v2605_v36 = vadd.f32 %v6506_v23, %v6502_v51  ;;  %v2384_v47 = vmul.f32 1.442695, %v2150_v58  ;;  %v7835_v23 = vld [vmem:[#allocation109_spill] sm:$0xff] }
 0x41d   : > { %7760 = vst [vmem:[#allocation73_spill] sm:$0xff] %v6511_v19  ;;  %v6516_v44 = vpop.eup %4247  ;;  %4273 = vpow2.f32 %v2392_v28  ;;  %v2112_v33 = vsub.f32 %v5965_v8, %v1956_v46  ;;  %v2113_v1 = vsub.f32 %v5969_v63, %v1956_v46  ;;  %v7766_v8 = vld [vmem:[#allocation74_spill] sm:$0xff] }
 0x41e   : > { %7761 = vst [vmem:[#allocation71_spill] sm:$0xff] %v6516_v44  ;;  %v6520_v6 = vpop.eup %4249  ;;  %4275 = vpow2.f32 %v2394_v37  ;;  %2552 = vadd.xlane.f32.xlu1 %v2551_v53  ;;  %2609 = vadd.xlane.f32.xlu0 %v2608_v61  ;;  %v2548_v56 = vadd.f32 %v6516_v44, %v6511_v19  ;;  %v2386_v61 = vmul.f32 1.442695, %v2151_v48 }
 0x41f   : > { %7762 = vst [vmem:[#allocation105_spill] sm:$0xff] %v6520_v6  ;;  %v6524_v41 = vpop.eup %4251  ;;  %4277 = vpow2.f32 %v2316_v62  ;;  %v2148_v62 = vsub.f32 %v7766_v8, %v6400_v13  ;;  %v2308_v46 = vmul.f32 1.442695, %v2112_v33 }
 0x420   : > { %7763 = vst [vmem:[#allocation107_spill] sm:$0xff] %v6524_v41  ;;  %v6529_v28 = vpop.eup %4253  ;;  %4279 = vpow2.f32 %v2318_v29  ;;  %v6532_v37 = vpop.xlane.xlu1 %2000  ;;  %v7768_v29 = vld [vmem:[#allocation32_spill] sm:$0xff] }
 0x421   : > { %7764 = vst [vmem:[#allocation103_spill] sm:$0xff] %v6529_v28  ;;  %v6536_v38 = vpop.eup %4255  ;;  %4281 = vpow2.f32 %v2388_v35  ;;  %v2149_v15 = vsub.f32 %v7768_v29, %v6400_v13  ;;  %v2310_v35 = vmul.f32 1.442695, %v2113_v1  ;;  %v2380_v13 = vmul.f32 1.442695, %v2148_v62  ;;  %v7773_v29 = vld [vmem:[#allocation64_spill] sm:$0xff] }
 0x422   : > { %7765 = vst [vmem:[#allocation104_spill] sm:$0xff] %v6536_v38  ;;  %v6540_v39 = vpop.eup %4257  ;;  %4283 = vpow2.f32 %v2390_v50  ;;  %2549 = vadd.xlane.f32.xlu1 %v2548_v56  ;;  %2606 = vadd.xlane.f32.xlu0 %v2605_v36  ;;  %v2545_v8 = vadd.f32 %v6536_v38, %v6529_v28  ;;  %v2602_v50 = vadd.f32 %v6524_v41, %v6520_v6  ;;  %v7772_v36 = vld [vmem:[#allocation62_spill] sm:$0xff]  ;;  %v7775_v1 = vld [vmem:[#allocation75_spill] sm:$0xff]  ;;  %v7777_v6 = vld [vmem:[#allocation33_spill] sm:$0xff] }
 0x423   : > { %7767 = vst [vmem:[#allocation99_spill] sm:$0xff] %v6540_v39  ;;  %v6544_v63 = vpop.eup %4259  ;;  %4285 = vpow2.f32 %v2312_v7  ;;  %v2146_v51 = vsub.f32 %v7775_v1, %v6452_v18  ;;  %v2147_v41 = vsub.f32 %v7777_v6, %v6452_v18 }
 0x424   : > { %7769 = vst [vmem:[#allocation101_spill] sm:$0xff] %v6544_v63  ;;  %v6546_v53 = vpop.eup %4261  ;;  %4287 = vpow2.f32 %v2314_v54  ;;  %v1953_v58 = vpop.xlane.xlu1 %1952  ;;  %v2382_v54 = vmul.f32 1.442695, %v2149_v15  ;;  %v2599_v62 = vadd.f32 %v6544_v63, %v6540_v39 }
 0x425   : > { %7770 = vst [vmem:[#allocation128_spill] sm:$0xff] %v6546_v53  ;;  %v6552_v48 = vpop.eup %4263  ;;  %4289 = vpow2.f32 %v2384_v47  ;;  %v2110_v56 = vsub.f32 %v7772_v36, %v1953_v58  ;;  %v2111_v7 = vsub.f32 %v7773_v29, %v1953_v58  ;;  %v2376_v6 = vmul.f32 1.442695, %v2146_v51 }
 0x426   : > { %7771 = vst [vmem:[#allocation129_spill] sm:$0xff] %v6552_v48  ;;  %v6556_v33 = vpop.eup %4265  ;;  %4291 = vpow2.f32 %v2386_v61  ;;  %2546 = vadd.xlane.f32.xlu1 %v2545_v8  ;;  %2603 = vadd.xlane.f32.xlu0 %v2602_v50  ;;  %v7779_v61 = vld [vmem:[#allocation70_spill] sm:$0xff]  ;;  %v2542_v8 = vadd.f32 %v6552_v48, %v6546_v53 }
 0x427   : > { %7774 = vst [vmem:[#allocation95_spill] sm:$0xff] %v6556_v33  ;;  %v6560_v28 = vpop.eup %4267  ;;  %4293 = vpow2.f32 %v2308_v46  ;;  %v2304_v47 = vmul.f32 1.442695, %v2110_v56  ;;  %v2144_v15 = vsub.f32 %v7779_v61, %v6494_v59  ;;  %v2306_v36 = vmul.f32 1.442695, %v2111_v7  ;;  %v722_v7 = vld [vmem:[#allocation2 + $0x98] sm:$0xff] }
 0x428   : > { %7776 = vst [vmem:[#allocation97_spill] sm:$0xff] %v6560_v28  ;;  %v6566_v58 = vpop.eup %4269  ;;  %4295 = vpow2.f32 %v2310_v35  ;;  %v6570_v29 = vpop.xlane.xlu1 %1997  ;;  %v2378_v56 = vmul.f32 1.442695, %v2147_v41  ;;  %v2596_v35 = vadd.f32 %v6560_v28, %v6556_v33  ;;  %v7784_v61 = vld [vmem:[#allocation72_spill] sm:$0xff]  ;;  %3074 = vmatprep.mubr.f32.mxu1 %v722_v7  ;;  %v720_v33 = vld [vmem:[#allocation2 + $0x88] sm:$0xff]  ;;  %v7831_v53 = vld [vmem:[#allocation102_spill] sm:$0xff] }
 0x429   : > { %7778 = vst [vmem:[#allocation126_spill] sm:$0xff] %v6566_v58  ;;  %v6574_v50 = vpop.eup %4271  ;;  %4297 = vpow2.f32 %v2380_v13  ;;  %v2145_v39 = vsub.f32 %v7784_v61, %v6494_v59  ;;  %v2372_v13 = vmul.f32 1.442695, %v2144_v15  ;;  %v7786_v41 = vld [vmem:[#allocation76_spill] sm:$0xff]  ;;  %3004 = vmatprep.mubr.f32.mxu0 %v720_v33 }
 0x42a   : > { %7780 = vst [vmem:[#allocation127_spill] sm:$0xff] %v6574_v50  ;;  %v6576_v18 = vpop.eup %4273  ;;  %4299 = vpow2.f32 %v2382_v54  ;;  %2543 = vadd.xlane.f32.xlu1 %v2542_v8  ;;  %2600 = vadd.xlane.f32.xlu0 %v2599_v62  ;;  %v2539_v51 = vadd.f32 %v6574_v50, %v6566_v58  ;;  %v7787_v62 = vld [vmem:[#allocation77_spill] sm:$0xff] }
 0x42b   : > { %7781 = vst [vmem:[#allocation90_spill] sm:$0xff] %v6576_v18  ;;  %v6578_v46 = vpop.eup %4275  ;;  %4301 = vpow2.f32 %v2304_v47 }
 0x42c   : > { %7782 = vst [vmem:[#allocation93_spill] sm:$0xff] %v6578_v46  ;;  %v6582_v1 = vpop.eup %4277  ;;  %4303 = vpow2.f32 %v2306_v36  ;;  %v1950_v63 = vpop.xlane.xlu1 %1949  ;;  %v2593_v59 = vadd.f32 %v6578_v46, %v6576_v18  ;;  %v7790_v36 = vld [vmem:[#allocation66_spill] sm:$0xff] }
 0x42d   : > { %7783 = vst [vmem:[#allocation124_spill] sm:$0xff] %v6582_v1  ;;  %v6588_v54 = vpop.eup %4279  ;;  %v2108_v47 = vsub.f32 %v7786_v41, %v1950_v63  ;;  %v2109_v8 = vsub.f32 %v7787_v62, %v1950_v63  ;;  %4305 = vpow2.f32 %v2376_v6  ;;  %v2142_v7 = vsub.f32 %v7790_v36, %v6532_v37  ;;  %v7792_v6 = vld [vmem:[#allocation68_spill] sm:$0xff] }
 0x42e   : > { %7785 = vst [vmem:[#allocation125_spill] sm:$0xff] %v6588_v54  ;;  %v6592_v28 = vpop.eup %4281  ;;  %2540 = vadd.xlane.f32.xlu1 %v2539_v51  ;;  %2597 = vadd.xlane.f32.xlu0 %v2596_v35  ;;  %4307 = vpow2.f32 %v2378_v56  ;;  %v2374_v63 = vmul.f32 1.442695, %v2145_v39  ;;  %v2143_v51 = vsub.f32 %v7792_v6, %v6532_v37  ;;  %v2536_v62 = vadd.f32 %v6588_v54, %v6582_v1  ;;  %v7797_v37 = vld [vmem:[#allocation60_spill] sm:$0xff] }
 0x42f   : > { %7788 = vst [vmem:[#allocation86_spill] sm:$0xff] %v6592_v28  ;;  %v6596_v15 = vpop.eup %4283  ;;  %v2300_v61 = vmul.f32 1.442695, %v2108_v47  ;;  %v2302_v58 = vmul.f32 1.442695, %v2109_v8  ;;  %4309 = vpow2.f32 %v2372_v13  ;;  %v7795_v47 = vld [vmem:[#allocation58_spill] sm:$0xff]  ;;  %v2141_v13 = vsub.f32 %v7797_v37, %v6570_v29 }
 0x430   : > { %7789 = vst [vmem:[#allocation89_spill] sm:$0xff] %v6596_v15  ;;  %v6600_v41 = vpop.eup %4285  ;;  %v2448_v35 = vpop.xlane.xlu1 %2447  ;;  %v2140_v8 = vsub.f32 %v7795_v47, %v6570_v29  ;;  %v2368_v39 = vmul.f32 1.442695, %v2142_v7  ;;  %v2370_v6 = vmul.f32 1.442695, %v2143_v51  ;;  %v2590_v47 = vadd.f32 %v6596_v15, %v6592_v28  ;;  %v7825_v28 = vld [vmem:[#allocation46_spill] sm:$0xff] }
 0x431   : > { %7791 = vst [vmem:[#allocation82_spill] sm:$0xff] %v6600_v41  ;;  %v6606_v18 = vpop.eup %4287  ;;  %4311 = vpow2.f32 %v2300_v61  ;;  %v2366_v29 = vmul.f32 1.442695, %v2141_v13 }
 0x432   : > { %7793 = vst [vmem:[#allocation85_spill] sm:$0xff] %v6606_v18  ;;  %v6608_v56 = vpop.eup %4289  ;;  %4313 = vpow2.f32 %v2302_v58  ;;  %2537 = vadd.xlane.f32.xlu1 %v2536_v62  ;;  %2594 = vadd.xlane.f32.xlu0 %v2593_v59  ;;  %v2533_v61 = vadd.f32 %v6606_v18, %v6600_v41  ;;  %v2364_v62 = vmul.f32 1.442695, %v2140_v8  ;;  %v7827_v18 = vld [vmem:[#allocation98_spill] sm:$0xff] }
 0x433   : > { %7794 = vst [vmem:[#allocation122_spill] sm:$0xff] %v6608_v56  ;;  %v6612_v33 = vpop.eup %4291  ;;  %4315 = vrcp.f32 %v2448_v35 }
 0x434   : > { %7796 = vst [vmem:[#allocation123_spill] sm:$0xff] %v6612_v33  ;;  %v6616_v36 = vpop.eup %4293  ;;  %4317 = vpow2.f32 %v2374_v63  ;;  %v2587_v51 = vadd.f32 %v6612_v33, %v6608_v56 }
 0x435   : > { %7798 = vst [vmem:[#allocation120_spill] sm:$0xff] %v6616_v36  ;;  %v6622_v58 = vpop.eup %4295  ;;  %4319 = vpow2.f32 %v2368_v39 }
 0x436   : > { %7799 = vst [vmem:[#allocation121_spill] sm:$0xff] %v6622_v58  ;;  %v6624_v59 = vpop.eup %4297  ;;  %2534 = vadd.xlane.f32.xlu1 %v2533_v61  ;;  %2591 = vadd.xlane.f32.xlu0 %v2590_v47  ;;  %4321 = vpow2.f32 %v2370_v6  ;;  %v2530_v63 = vadd.f32 %v6622_v58, %v6616_v36  ;;  %v7823_v36 = vld [vmem:[#allocation94_spill] sm:$0xff] }
 0x437   : > { %7800 = vst [vmem:[#allocation74_spill] sm:$0xff] %v6624_v59  ;;  %v6626_v7 = vpop.eup %4299  ;;  %4323 = vpow2.f32 %v2364_v62 }
 0x438   : > { %7801 = vst [vmem:[#allocation32_spill] sm:$0xff] %v6626_v7  ;;  %v6628_v35 = vpop.eup %4301  ;;  %4325 = vpow2.f32 %v2366_v29  ;;  %v2584_v6 = vadd.f32 %v6626_v7, %v6624_v59  ;;  %v7810_v7 = vld [vmem:[#allocation56_spill] sm:$0xff] }
 0x439   : > { %7802 = vst [vmem:[#allocation62_spill] sm:$0xff] %v6628_v35  ;;  %v6634_v37 = vpop.eup %4303 }
 0x43a   : > { %7803 = vst [vmem:[#allocation64_spill] sm:$0xff] %v6634_v37  ;;  %2531 = vadd.xlane.f32.xlu1 %v2530_v63  ;;  %2588 = vadd.xlane.f32.xlu0 %v2587_v51  ;;  %v6636_v8 = vpop.eup %4305  ;;  %v2527_v13 = vadd.f32 %v6634_v37, %v6628_v35  ;;  %v7811_v37 = vld [vmem:[#allocation54_spill] sm:$0xff] }
 0x43b   : > { %7804 = vst [vmem:[#allocation75_spill] sm:$0xff] %v6636_v8  ;;  %v2463_v61 = vpop.xlane.xlu0 %2462  ;;  %v6638_v39 = vpop.eup %4307 }
 0x43c   : > { %7805 = vst [vmem:[#allocation33_spill] sm:$0xff] %v6638_v39  ;;  %4327 = vrcp.f32 %v2463_v61  ;;  %v6644_v47 = vpop.eup %4309  ;;  %v2581_v61 = vadd.f32 %v6638_v39, %v6636_v8 }
 0x43d   : > { %7806 = vst [vmem:[#allocation70_spill] sm:$0xff] %v6644_v47 }
 0x43e   : > { %v6646_v56 = vpop.eup %4311  ;;  %2528 = vadd.xlane.f32.xlu1 %v2527_v13  ;;  %2585 = vadd.xlane.f32.xlu0 %v2584_v6 }
 0x43f   : > { %7807 = vst [vmem:[#allocation72_spill] sm:$0xff] %v6646_v56  ;;  %v6648_v62 = vpop.eup %4313  ;;  %v2514_v29 = vpop.xlane.xlu0 %2513 }
 0x440   : > { %7808 = vst [vmem:[#allocation76_spill] sm:$0xff] %v6648_v62  ;;  %v4316_v63 = vpop.eup %4315  ;;  %4329 = vrcp.f32 %v2514_v29  ;;  %v2524_v51 = vadd.f32 %v6648_v62, %v6646_v56 }
 0x441   : > { %v6654_v59 = vpop.eup %4317  ;;  %v6657_v35 = vmul.f32 %v4316_v63, %v7810_v7  ;;  %v6660_v33 = vmul.f32 %v4316_v63, %v7811_v37 }
 0x442   : > { %7809 = vst [vmem:[#allocation77_spill] sm:$0xff] %v6654_v59  ;;  %2525 = vadd.xlane.f32.xlu1 %v2524_v51  ;;  %2582 = vadd.xlane.f32.xlu0 %v2581_v61  ;;  %v6666_v6 = vpop.eup %4319  ;;  %v2578_v29 = vadd.f32 %v6654_v59, %v6644_v47  ;;  %v7817_v47 = vld [vmem:[#allocation50_spill] sm:$0xff] }
 0x443   : > { %v2466_v13 = vpop.xlane.xlu0 %2465  ;;  %2825 = vst [vmem:[%s4992_s7 + $0x68] sm:$0xff] %v6657_v35  ;;  %2824 = vst [vmem:[%s4992_s7 + $0x60] sm:$0xff] %v6660_v33  ;;  %v6670_v7 = vpop.eup %4321 }
 0x444   : > { %7812 = vst [vmem:[#allocation66_spill] sm:$0xff] %v6666_v6  ;;  %4331 = vrcp.f32 %v2466_v13  ;;  %7813 = vst [vmem:[#allocation68_spill] sm:$0xff] %v6670_v7  ;;  %v6672_v37 = vpop.eup %4323  ;;  %v2575_v61 = vadd.f32 %v6670_v7, %v6666_v6  ;;  %v7816_v13 = vld [vmem:[#allocation52_spill] sm:$0xff] }
 0x445   : > { %7814 = vst [vmem:[#allocation58_spill] sm:$0xff] %v6672_v37  ;;  %v6674_v51 = vpop.eup %4325 }
 0x446   : > { %2579 = vadd.xlane.f32.xlu0 %v2578_v29  ;;  %7815 = vst [vmem:[#allocation60_spill] sm:$0xff] %v6674_v51  ;;  %v2572_v56 = vadd.f32 %v6674_v51, %v6672_v37  ;;  %v7821_v51 = vld [vmem:[#allocation91_spill] sm:$0xff] }
 0x447   : > { %v2517_v63 = vpop.xlane.xlu0 %2516 }
 0x448   : > { %4333 = vrcp.f32 %v2517_v63 }
 0x449   : > { %v4328_v8 = vpop.eup %4327 }
 0x44a   : > { %2576 = vadd.xlane.f32.xlu0 %v2575_v61  ;;  %v6679_v39 = vmul.f32 %v4328_v8, %v7816_v13  ;;  %v6682_v59 = vmul.f32 %v4328_v8, %v7817_v47  ;;  %v7818_v61 = vld [vmem:[#allocation45_spill] sm:$0xff]  ;;  %v7819_v13 = vld [vmem:[#allocation44_spill] sm:$0xff] }
 0x44b   : > { %v2469_v29 = vpop.xlane.xlu0 %2468 }
 0x44c   : > { %4335 = vrcp.f32 %v2469_v29  ;;  %2835 = vst [vmem:[%s4992_s7 + $0xb8] sm:$0xff] %v6679_v39  ;;  %2834 = vst [vmem:[%s4992_s7 + $0xb0] sm:$0xff] %v6682_v59  ;;  %v7820_v29 = vld [vmem:[#allocation92_spill] sm:$0xff] }
 0x44d   : > { %v4330_v63 = vpop.eup %4329 }
 0x44e   : > { %2573 = vadd.xlane.f32.xlu0 %v2572_v56  ;;  %v6691_v6 = vmul.f32 %v4330_v63, %v7818_v61  ;;  %v6694_v7 = vmul.f32 %v4330_v63, %v7819_v13  ;;  %v7822_v13 = vld [vmem:[#allocation96_spill] sm:$0xff] }
 0x44f   : > { %v2520_v8 = vpop.xlane.xlu0 %2519 }
 0x450   : > { %4337 = vrcp.f32 %v2520_v8  ;;  %2869 = vst [vmem:[%s4992_s7 + $0x1c8] sm:$0xff] %v6691_v6  ;;  %2868 = vst [vmem:[%s4992_s7 + $0x1c0] sm:$0xff] %v6694_v7 }
 0x451   : > { %v4332_v47 = vpop.eup %4331 }
 0x452   : > { %v6701_v37 = vmul.f32 %v4332_v47, %v7820_v29  ;;  %v6704_v56 = vmul.f32 %v4332_v47, %v7821_v51 }
 0x453   : > { %v2445_v61 = vpop.xlane.xlu1 %2444  ;;  %v2472_v62 = vpop.xlane.xlu0 %2471 }
 0x454   : > { %4339 = vrcp.f32 %v2445_v61  ;;  %2837 = vst [vmem:[%s4992_s7 + $0xc8] sm:$0xff] %v6701_v37  ;;  %2836 = vst [vmem:[%s4992_s7 + $0xc0] sm:$0xff] %v6704_v56  ;;  %v7824_v61 = vld [vmem:[#allocation47_spill] sm:$0xff] }
 0x455   : > { %v4334_v63 = vpop.eup %4333  ;;  %4341 = vrcp.f32 %v2472_v62 }
 0x456   : > { %v6711_v8 = vmul.f32 %v4334_v63, %v7822_v13  ;;  %v6714_v29 = vmul.f32 %v4334_v63, %v7823_v36  ;;  %v7826_v63 = vld [vmem:[#allocation100_spill] sm:$0xff] }
 0x457   : > { %v2442_v58 = vpop.xlane.xlu1 %2441  ;;  %v2523_v51 = vpop.xlane.xlu0 %2522 }
 0x458   : > { %4343 = vrcp.f32 %v2442_v58  ;;  %2871 = vst [vmem:[%s4992_s7 + $0x1d8] sm:$0xff] %v6711_v8  ;;  %2870 = vst [vmem:[%s4992_s7 + $0x1d0] sm:$0xff] %v6714_v29 }
 0x459   : > { %v4336_v47 = vpop.eup %4335  ;;  %4345 = vrcp.f32 %v2523_v51 }
 0x45a   : > { %v6721_v62 = vmul.f32 %v4336_v47, %v7824_v61  ;;  %v6724_v13 = vmul.f32 %v4336_v47, %v7825_v28  ;;  %v7828_v47 = vld [vmem:[#allocation110_spill] sm:$0xff] }
 0x45b   : > { %v2439_v15 = vpop.xlane.xlu1 %2438  ;;  %v2475_v36 = vpop.xlane.xlu0 %2474 }
 0x45c   : > { %4347 = vrcp.f32 %v2439_v15  ;;  %2839 = vst [vmem:[%s4992_s7 + $0xd8] sm:$0xff] %v6721_v62  ;;  %2838 = vst [vmem:[%s4992_s7 + $0xd0] sm:$0xff] %v6724_v13 }
 0x45d   : > { %v4338_v58 = vpop.eup %4337  ;;  %4349 = vrcp.f32 %v2475_v36  ;;  %v7829_v36 = vld [vmem:[#allocation49_spill] sm:$0xff] }
 0x45e   : > { %v2745_v41 = vmul.f32 %v4338_v58, %v7826_v63  ;;  %v2744_v51 = vmul.f32 %v4338_v58, %v7827_v18  ;;  %v7830_v58 = vld [vmem:[#allocation48_spill] sm:$0xff] }
 0x45f   : > { %v2436_v46 = vpop.xlane.xlu1 %2435  ;;  %v2508_v61 = vpop.xlane.xlu0 %2507 }
 0x460   : > { %4351 = vrcp.f32 %v2436_v46  ;;  %2873 = vst [vmem:[%s4992_s7 + $0x1e8] sm:$0xff] %v2745_v41  ;;  %2872 = vst [vmem:[%s4992_s7 + $0x1e0] sm:$0xff] %v2744_v51 }
 0x461   : > { %v4340_v28 = vpop.eup %4339  ;;  %4353 = vrcp.f32 %v2508_v61 }
 0x462   : > { %v4342_v15 = vpop.eup %4341  ;;  %v6735_v1 = vmul.f32 %v4340_v28, %v7828_v47  ;;  %v6738_v54 = vmul.f32 %v4340_v28, %v7829_v36  ;;  %v7832_v28 = vld [vmem:[#allocation112_spill] sm:$0xff] }
 0x463   : > { %v2433_v63 = vpop.xlane.xlu1 %2432  ;;  %v2460_v18 = vpop.xlane.xlu0 %2459  ;;  %v2713_v50 = vmul.f32 %v4342_v15, %v7830_v58  ;;  %v2712_v48 = vmul.f32 %v4342_v15, %v7831_v53  ;;  %v7833_v36 = vld [vmem:[#allocation108_spill] sm:$0xff] }
 0x464   : > { %4355 = vrcp.f32 %v2433_v63  ;;  %2823 = vst [vmem:[%s4992_s7 + $0x58] sm:$0xff] %v6735_v1  ;;  %2822 = vst [vmem:[%s4992_s7 + $0x50] sm:$0xff] %v6738_v54  ;;  %v7834_v63 = vld [vmem:[#allocation106_spill] sm:$0xff] }
 0x465   : > { %v4344_v46 = vpop.eup %4343  ;;  %4357 = vrcp.f32 %v2460_v18  ;;  %2841 = vst [vmem:[%s4992_s7 + $0xe8] sm:$0xff] %v2713_v50  ;;  %2840 = vst [vmem:[%s4992_s7 + $0xe0] sm:$0xff] %v2712_v48 }
 0x466   : > { %v4346_v61 = vpop.eup %4345  ;;  %v6749_v47 = vmul.f32 %v4344_v46, %v7832_v28  ;;  %v6752_v58 = vmul.f32 %v4344_v46, %v7833_v36  ;;  %v7836_v28 = vld [vmem:[#allocation114_spill] sm:$0xff] }
 0x467   : > { %v2430_v53 = vpop.xlane.xlu1 %2429  ;;  %v2505_v15 = vpop.xlane.xlu0 %2504  ;;  %v2747_v38 = vmul.f32 %v4346_v61, %v7834_v63  ;;  %v2746_v19 = vmul.f32 %v4346_v61, %v7835_v23  ;;  %v7837_v23 = vld [vmem:[#allocation43_spill] sm:$0xff]  ;;  %v7838_v63 = vld [vmem:[#allocation42_spill] sm:$0xff] }
 0x468   : > { %4359 = vrcp.f32 %v2430_v53  ;;  %2821 = vst [vmem:[%s4992_s7 + $0x48] sm:$0xff] %v6749_v47  ;;  %2820 = vst [vmem:[%s4992_s7 + $0x40] sm:$0xff] %v6752_v58 }
 0x469   : > { %v4348_v18 = vpop.eup %4347  ;;  %4361 = vrcp.f32 %v2505_v15  ;;  %2875 = vst [vmem:[%s4992_s7 + $0x1f8] sm:$0xff] %v2747_v38  ;;  %3010 = vmatprep.subr.mxu1 %v2747_v38  ;;  %2874 = vst [vmem:[%s4992_s7 + $0x1f0] sm:$0xff] %v2746_v19 }
 0x46a   : > { %v4350_v46 = vpop.eup %4349  ;;  %3011 = vmatpush1.xpose.msra.mxu1 %v2746_v19  ;;  %v6763_v36 = vmul.f32 %v4348_v18, %v7836_v28  ;;  %v6766_v61 = vmul.f32 %v4348_v18, %v7837_v23  ;;  %v7842_v28 = vld [vmem:[#allocation87_spill] sm:$0xff] }
 0x46b   : > { %3012 = vmatprep.subr.mxu1 %v2745_v41  ;;  %v2457_v53 = vpop.xlane.xlu0 %2456  ;;  %v2715_v44 = vmul.f32 %v4350_v46, %v7838_v63  ;;  %v2714_v52 = vmul.f32 %v4350_v46, %v7839_v31  ;;  %v7840_v41 = vld [vmem:[#allocation116_spill] sm:$0xff]  ;;  %v7845_v63 = vld [vmem:[#allocation41_spill] sm:$0xff] }
 0x46c   : > { %4363 = vrcp.f32 %v2457_v53  ;;  %2819 = vst [vmem:[%s4992_s7 + $0x38] sm:$0xff] %v6763_v36  ;;  %2818 = vst [vmem:[%s4992_s7 + $0x30] sm:$0xff] %v6766_v61  ;;  %v7841_v31 = vld [vmem:[#allocation88_spill] sm:$0xff]  ;;  %v7843_v53 = vld [vmem:[#allocation113_spill] sm:$0xff] }
 0x46d   : > { %v4352_v38 = vpop.eup %4351  ;;  %2843 = vst [vmem:[%s4992_s7 + $0xf8] sm:$0xff] %v2715_v44  ;;  %2940 = vmatprep.subr.mxu0 %v2715_v44  ;;  %2842 = vst [vmem:[%s4992_s7 + $0xf0] sm:$0xff] %v2714_v52 }
 0x46e   : > { %v4354_v19 = vpop.eup %4353  ;;  %2941 = vmatpush1.xpose.msra.mxu0 %v2714_v52  ;;  %3013 = vmatpush1.xpose.msra.mxu1 %v2744_v51  ;;  %v6777_v15 = vmul.f32 %v4352_v38, %v7840_v41  ;;  %v6780_v18 = vmul.f32 %v4352_v38, %v7841_v31  ;;  %v7846_v41 = vld [vmem:[#allocation40_spill] sm:$0xff] }
 0x46f   : > { %2942 = vmatprep.subr.mxu0 %v2713_v50  ;;  %3014 = vmatprep.subr.mxu1 %v6711_v8  ;;  %v2502_v46 = vpop.xlane.xlu0 %2501  ;;  %v2737_v23 = vmul.f32 %v4354_v19, %v7842_v28  ;;  %v2736_v44 = vmul.f32 %v4354_v19, %v7843_v53  ;;  %v7844_v8 = vld [vmem:[#allocation118_spill] sm:$0xff]  ;;  %v7849_v53 = vld [vmem:[#allocation84_spill] sm:$0xff] }
 0x470   : > { %4365 = vrcp.f32 %v2502_v46  ;;  %2817 = vst [vmem:[%s4992_s7 + $0x28] sm:$0xff] %v6777_v15  ;;  %2816 = vst [vmem:[%s4992_s7 + $0x20] sm:$0xff] %v6780_v18  ;;  %v7847_v46 = vld [vmem:[#allocation115_spill] sm:$0xff] }
 0x471   : > { %v4356_v52 = vpop.eup %4355  ;;  %2865 = vst [vmem:[%s4992_s7 + $0x1a8] sm:$0xff] %v2737_v23  ;;  %2864 = vst [vmem:[%s4992_s7 + $0x1a0] sm:$0xff] %v2736_v44 }
 0x472   : > { %v4358_v50 = vpop.eup %4357  ;;  %2943 = vmatpush1.xpose.msra.mxu0 %v2712_v48  ;;  %3015 = vmatpush1.xpose.msra.mxu1 %v6714_v29  ;;  %v6793_v51 = vmul.f32 %v4356_v52, %v7844_v8  ;;  %v6796_v38 = vmul.f32 %v4356_v52, %v7845_v63  ;;  %v7850_v8 = vld [vmem:[#allocation83_spill] sm:$0xff] }
 0x473   : > { %2944 = vmatprep.subr.mxu0 %v6721_v62  ;;  %3016 = vmatprep.subr.mxu1 %v6691_v6  ;;  %v2454_v19 = vpop.xlane.xlu0 %2453  ;;  %v2705_v31 = vmul.f32 %v4358_v50, %v7846_v41  ;;  %v2704_v28 = vmul.f32 %v4358_v50, %v7847_v46  ;;  %v7848_v6 = vld [vmem:[#allocation119_spill] sm:$0xff] }
 0x474   : > { %4367 = vrcp.f32 %v2454_v19  ;;  %2815 = vst [vmem:[%s4992_s7 + $0x18] sm:$0xff] %v6793_v51  ;;  %2814 = vst [vmem:[%s4992_s7 + $0x10] sm:$0xff] %v6796_v38  ;;  %v7851_v19 = vld [vmem:[#allocation117_spill] sm:$0xff] }
 0x475   : > { %v4360_v48 = vpop.eup %4359  ;;  %2833 = vst [vmem:[%s4992_s7 + $0xa8] sm:$0xff] %v2705_v31  ;;  %2832 = vst [vmem:[%s4992_s7 + $0xa0] sm:$0xff] %v2704_v28 }
 0x476   : > { %v4362_v29 = vpop.eup %4361  ;;  %2945 = vmatpush1.xpose.msra.mxu0 %v6724_v13  ;;  %3017 = vmatpush1.xpose.msra.mxu1 %v6694_v7  ;;  %v6811_v62 = vmul.f32 %v4360_v48, %v7848_v6  ;;  %v6814_v52 = vmul.f32 %v4360_v48, %v7849_v53  ;;  %v7853_v13 = vld [vmem:[#allocation38_spill] sm:$0xff] }
 0x477   : > { %2946 = vmatprep.subr.mxu0 %v6701_v37  ;;  %3018 = vmatprep.subr.mxu1 %v6411_v32  ;;  %v2499_v50 = vpop.xlane.xlu0 %2498  ;;  %v2735_v63 = vmul.f32 %v4362_v29, %v7850_v8  ;;  %v2734_v41 = vmul.f32 %v4362_v29, %v7851_v19  ;;  %v7852_v32 = vld [vmem:[#allocation39_spill] sm:$0xff]  ;;  %v7857_v19 = vld [vmem:[#allocation36_spill] sm:$0xff] }
 0x478   : > { %4369 = vrcp.f32 %v2499_v50  ;;  %2813 = vst [vmem:[%s4992_s7 + $0x8] sm:$0xff] %v6811_v62  ;;  %2812 = vst [vmem:[%s4992_s7] sm:$0xff] %v6814_v52 }
 0x479   : > { %v4364_v7 = vpop.eup %4363  ;;  %2863 = vst [vmem:[%s4992_s7 + $0x198] sm:$0xff] %v2735_v63  ;;  %2862 = vst [vmem:[%s4992_s7 + $0x190] sm:$0xff] %v2734_v41 }
 0x47a   : > { %2947 = vmatpush1.xpose.msra.mxu0 %v6704_v56  ;;  %3019 = vmatpush1.xpose.msra.mxu1 %v6414_v2  ;;  %v2703_v37 = vmul.f32 %v4364_v7, %v7852_v32  ;;  %v2702_v46 = vmul.f32 %v4364_v7, %v7853_v13  ;;  %v7854_v56 = vld [vmem:[#allocation81_spill] sm:$0xff]  ;;  %v7855_v2 = vld [vmem:[#allocation80_spill] sm:$0xff]  ;;  %v7859_v13 = vld [vmem:[#allocation79_spill] sm:$0xff] }
 0x47b   : > { %2948 = vmatprep.subr.mxu0 %v6679_v39  ;;  %3020 = vmatprep.subr.mxu1 %v2737_v23  ;;  %v2451_v48 = vpop.xlane.xlu0 %2450  ;;  %v7856_v23 = vld [vmem:[#allocation37_spill] sm:$0xff] }
 0x47c   : > { %4371 = vrcp.f32 %v2451_v48  ;;  %2831 = vst [vmem:[%s4992_s7 + $0x98] sm:$0xff] %v2703_v37  ;;  %2830 = vst [vmem:[%s4992_s7 + $0x90] sm:$0xff] %v2702_v46 }
 0x47d   : > { %v4366_v29 = vpop.eup %4365 }
 0x47e   : > { %2949 = vmatpush1.xpose.msra.mxu0 %v6682_v59  ;;  %3021 = vmatpush1.xpose.msra.mxu1 %v2736_v44  ;;  %v2733_v6 = vmul.f32 %v4366_v29, %v7854_v56  ;;  %v2732_v53 = vmul.f32 %v4366_v29, %v7855_v2 }
 0x47f   : > { %2950 = vmatprep.subr.mxu0 %v2705_v31  ;;  %3022 = vmatprep.subr.mxu1 %v2735_v63  ;;  %v2496_v50 = vpop.xlane.xlu0 %2495 }
 0x480   : > { %4373 = vrcp.f32 %v2496_v50  ;;  %2861 = vst [vmem:[%s4992_s7 + $0x188] sm:$0xff] %v2733_v6  ;;  %2860 = vst [vmem:[%s4992_s7 + $0x180] sm:$0xff] %v2732_v53 }
 0x481   : > { %v4368_v39 = vpop.eup %4367 }
 0x482   : > { %2951 = vmatpush1.xpose.msra.mxu0 %v2704_v28  ;;  %3023 = vmatpush1.xpose.msra.mxu1 %v2734_v41  ;;  %v2701_v8 = vmul.f32 %v4368_v39, %v7856_v23  ;;  %v2700_v59 = vmul.f32 %v4368_v39, %v7857_v19  ;;  %v7858_v28 = vld [vmem:[#allocation78_spill] sm:$0xff] }
 0x483   : > { %2952 = vmatprep.subr.mxu0 %v2703_v37  ;;  %3024 = vmatprep.subr.mxu1 %v2733_v6  ;;  %v2493_v44 = vpop.xlane.xlu0 %2492 }
 0x484   : > { %4375 = vrcp.f32 %v2493_v44  ;;  %2829 = vst [vmem:[%s4992_s7 + $0x88] sm:$0xff] %v2701_v8  ;;  %2828 = vst [vmem:[%s4992_s7 + $0x80] sm:$0xff] %v2700_v59 }
 0x485   : > { %v4370_v31 = vpop.eup %4369 }
 0x486   : > { %2953 = vmatpush1.xpose.msra.mxu0 %v2702_v46  ;;  %3025 = vmatpush1.xpose.msra.mxu1 %v2732_v53  ;;  %v2731_v63 = vmul.f32 %v4370_v31, %v6272_v34  ;;  %v2730_v41 = vmul.f32 %v4370_v31, %v7858_v28 }
 0x487   : > { %2954 = vmatprep.subr.mxu0 %v2701_v8  ;;  %v2490_v7 = vpop.xlane.xlu0 %2489 }
 0x488   : > { %4377 = vrcp.f32 %v2490_v7  ;;  %2859 = vst [vmem:[%s4992_s7 + $0x178] sm:$0xff] %v2731_v63  ;;  %3026 = vmatprep.subr.mxu1 %v2731_v63  ;;  %2858 = vst [vmem:[%s4992_s7 + $0x170] sm:$0xff] %v2730_v41  ;;  %v7863_v63 = vld [vmem:[#allocation59_spill] sm:$0xff]  ;;  %v7864_v7 = vld [vmem:[#allocation57_spill] sm:$0xff] }
 0x489   : > { %v4372_v32 = vpop.eup %4371 }
 0x48a   : > { %2955 = vmatpush1.xpose.msra.mxu0 %v2700_v59  ;;  %3027 = vmatpush1.xpose.msra.mxu1 %v2730_v41  ;;  %v2699_v37 = vmul.f32 %v4372_v32, %v6286_v27  ;;  %v2698_v46 = vmul.f32 %v4372_v32, %v7859_v13 }
 0x48b   : > { %v2487_v48 = vpop.xlane.xlu0 %2486 }
 0x48c   : > { %4379 = vrcp.f32 %v2487_v48  ;;  %2827 = vst [vmem:[%s4992_s7 + $0x78] sm:$0xff] %v2699_v37  ;;  %2956 = vmatprep.subr.mxu0 %v2699_v37  ;;  %2826 = vst [vmem:[%s4992_s7 + $0x70] sm:$0xff] %v2698_v46  ;;  %v7865_v37 = vld [vmem:[#allocation51_spill] sm:$0xff] }
 0x48d   : > { %v4374_v34 = vpop.eup %4373 }
 0x48e   : > { %2957 = vmatpush1.xpose.msra.mxu0 %v2698_v46  ;;  %v2729_v29 = vmul.f32 %v4374_v34, %v6294_v45  ;;  %v2728_v56 = vmul.f32 %v4374_v34, %v6289_v57 }
 0x48f   : > { %2958 = vmatprep.subr.mxu0 %v6657_v35  ;;  %v2571_v6 = vpop.xlane.xlu1 %2570  ;;  %v2484_v2 = vpop.xlane.xlu0 %2483 }
 0x490   : > { %4381 = vrcp.f32 %v2571_v6  ;;  %2857 = vst [vmem:[%s4992_s7 + $0x168] sm:$0xff] %v2729_v29  ;;  %3028 = vmatprep.subr.mxu1 %v2729_v29  ;;  %2856 = vst [vmem:[%s4992_s7 + $0x160] sm:$0xff] %v2728_v56  ;;  %v7866_v29 = vld [vmem:[#allocation61_spill] sm:$0xff]  ;;  %v7867_v6 = vld [vmem:[#allocation55_spill] sm:$0xff] }
 0x491   : > { %v4376_v27 = vpop.eup %4375  ;;  %4383 = vrcp.f32 %v2484_v2  ;;  %3029 = vmatpush1.xpose.msra.mxu1 %v2728_v56 }
 0x492   : > { %2959 = vmatpush1.xpose.msra.mxu0 %v6660_v33  ;;  %v2727_v53 = vmul.f32 %v4376_v27, %v6308_v60  ;;  %v2726_v45 = vmul.f32 %v4376_v27, %v6302_v17  ;;  %v7860_v60 = vld [vmem:[#allocation34_spill] sm:$0xff] }
 0x493   : > { %2960 = vmatprep.subr.mxu0 %v6735_v1  ;;  %v2568_v57 = vpop.xlane.xlu1 %2567  ;;  %v2481_v35 = vpop.xlane.xlu0 %2480 }
 0x494   : > { %4385 = vrcp.f32 %v2568_v57  ;;  %2855 = vst [vmem:[%s4992_s7 + $0x158] sm:$0xff] %v2727_v53  ;;  %3030 = vmatprep.subr.mxu1 %v2727_v53  ;;  %2854 = vst [vmem:[%s4992_s7 + $0x150] sm:$0xff] %v2726_v45 }
 0x495   : > { %v4378_v50 = vpop.eup %4377  ;;  %4387 = vrcp.f32 %v2481_v35  ;;  %3031 = vmatpush1.xpose.msra.mxu1 %v2726_v45 }
 0x496   : > { %2961 = vmatpush1.xpose.msra.mxu0 %v6738_v54  ;;  %v2725_v33 = vmul.f32 %v4378_v50, %v6322_v10  ;;  %v2724_v39 = vmul.f32 %v4378_v50, %v7860_v60  ;;  %v7861_v54 = vld [vmem:[#allocation53_spill] sm:$0xff]  ;;  %v7862_v10 = vld [vmem:[#allocation35_spill] sm:$0xff] }
 0x497   : > { %2962 = vmatprep.subr.mxu0 %v6749_v47  ;;  %v2565_v17 = vpop.xlane.xlu1 %2564  ;;  %v2478_v1 = vpop.xlane.xlu0 %2477 }
 0x498   : > { %4389 = vrcp.f32 %v2565_v17  ;;  %2853 = vst [vmem:[%s4992_s7 + $0x148] sm:$0xff] %v2725_v33  ;;  %3032 = vmatprep.subr.mxu1 %v2725_v33  ;;  %2852 = vst [vmem:[%s4992_s7 + $0x140] sm:$0xff] %v2724_v39  ;;  %v719_v33 = vld [vmem:[#allocation2 + $0x80] sm:$0xff] }
 0x499   : > { %v4380_v23 = vpop.eup %4379  ;;  %4391 = vrcp.f32 %v2478_v1  ;;  %3033 = vmatpush1.xpose.msra.mxu1 %v2724_v39 }
 0x49a   : > { %2963 = vmatpush1.xpose.msra.mxu0 %v6752_v58  ;;  %v2723_v8 = vmul.f32 %v4380_v23, %v7861_v54  ;;  %v2722_v19 = vmul.f32 %v4380_v23, %v7862_v10 }
 0x49b   : > { %2964 = vmatprep.subr.mxu0 %v6763_v36  ;;  %v2562_v47 = vpop.xlane.xlu1 %2561  ;;  %v2619_v59 = vpop.xlane.xlu0 %2618 }
 0x49c   : > { %4393 = vrcp.f32 %v2562_v47  ;;  %2851 = vst [vmem:[%s4992_s7 + $0x138] sm:$0xff] %v2723_v8  ;;  %3034 = vmatprep.subr.mxu1 %v2723_v8  ;;  %2850 = vst [vmem:[%s4992_s7 + $0x130] sm:$0xff] %v2722_v19 }
 0x49d   : > { %v4382_v44 = vpop.eup %4381  ;;  %4395 = vrcp.f32 %v2619_v59  ;;  %3035 = vmatpush1.xpose.msra.mxu1 %v2722_v19 }
 0x49e   : > { %v4384_v31 = vpop.eup %4383  ;;  %2965 = vmatpush1.xpose.msra.mxu0 %v6766_v61  ;;  %v2779_v58 = vmul.f32 %v4382_v44, %v6368_v25  ;;  %v6876_v36 = vmul.f32 %v4382_v44, %v7863_v63  ;;  %v7869_v63 = vld [vmem:[#allocation65_spill] sm:$0xff] }
 0x49f   : > { %2966 = vmatprep.subr.mxu0 %v6777_v15  ;;  %v2559_v28 = vpop.xlane.xlu1 %2558  ;;  %v2616_v41 = vpop.xlane.xlu0 %2615  ;;  %v2721_v32 = vmul.f32 %v4384_v31, %v7864_v7  ;;  %v2720_v13 = vmul.f32 %v4384_v31, %v7865_v37  ;;  %v7868_v31 = vld [vmem:[#allocation63_spill] sm:$0xff]  ;;  %v7871_v7 = vld [vmem:[#allocation73_spill] sm:$0xff] }
 0x4a0   : > { %4397 = vrcp.f32 %v2559_v28  ;;  %2907 = vst [vmem:[%s4992_s7 + $0x2f8] sm:$0xff] %v2779_v58  ;;  %2906 = vst [vmem:[%s4992_s7 + $0x2f0] sm:$0xff] %v6876_v36 }
 0x4a1   : > { %v4386_v46 = vpop.eup %4385  ;;  %4399 = vrcp.f32 %v2616_v41  ;;  %2849 = vst [vmem:[%s4992_s7 + $0x128] sm:$0xff] %v2721_v32  ;;  %3036 = vmatprep.subr.mxu1 %v2721_v32  ;;  %2848 = vst [vmem:[%s4992_s7 + $0x120] sm:$0xff] %v2720_v13 }
 0x4a2   : > { %v4388_v25 = vpop.eup %4387  ;;  %2967 = vmatpush1.xpose.msra.mxu0 %v6780_v18  ;;  %3037 = vmatpush1.xpose.msra.mxu1 %v2720_v13  ;;  %v6888_v61 = vmul.f32 %v4386_v46, %v6382_v20  ;;  %v6891_v15 = vmul.f32 %v4386_v46, %v6374_v22  ;;  %v7872_v46 = vld [vmem:[#allocation67_spill] sm:$0xff] }
 0x4a3   : > { %2968 = vmatprep.subr.mxu0 %v6793_v51  ;;  %v2556_v48 = vpop.xlane.xlu1 %2555  ;;  %v2613_v34 = vpop.xlane.xlu0 %2612  ;;  %v2719_v56 = vmul.f32 %v4388_v25, %v7866_v29  ;;  %v2718_v2 = vmul.f32 %v4388_v25, %v7867_v6  ;;  %v7874_v29 = vld [vmem:[#allocation104_spill] sm:$0xff]  ;;  %v7875_v6 = vld [vmem:[#allocation103_spill] sm:$0xff] }
 0x4a4   : > { %4401 = vrcp.f32 %v2556_v48  ;;  %2905 = vst [vmem:[%s4992_s7 + $0x2e8] sm:$0xff] %v6888_v61  ;;  %2904 = vst [vmem:[%s4992_s7 + $0x2e0] sm:$0xff] %v6891_v15 }
 0x4a5   : > { %v4390_v18 = vpop.eup %4389  ;;  %4403 = vrcp.f32 %v2613_v34  ;;  %2847 = vst [vmem:[%s4992_s7 + $0x118] sm:$0xff] %v2719_v56  ;;  %3038 = vmatprep.subr.mxu1 %v2719_v56  ;;  %2846 = vst [vmem:[%s4992_s7 + $0x110] sm:$0xff] %v2718_v2 }
 0x4a6   : > { %v4392_v22 = vpop.eup %4391  ;;  %2969 = vmatpush1.xpose.msra.mxu0 %v6796_v38  ;;  %3039 = vmatpush1.xpose.msra.mxu1 %v2718_v2  ;;  %v6904_v20 = vmul.f32 %v4390_v18, %v6396_v14  ;;  %v6907_v51 = vmul.f32 %v4390_v18, %v6390_v43  ;;  %v721_v14 = vld [vmem:[#allocation2 + $0x90] sm:$0xff] }
 0x4a7   : > { %2970 = vmatprep.subr.mxu0 %v6811_v62  ;;  %v2553_v27 = vpop.xlane.xlu1 %2552  ;;  %v2610_v53 = vpop.xlane.xlu0 %2609  ;;  %v2717_v45 = vmul.f32 %v4392_v22, %v6386_v21  ;;  %v2716_v57 = vmul.f32 %v4392_v22, %v6360_v30 }
 0x4a8   : > { %4405 = vrcp.f32 %v2553_v27  ;;  %2903 = vst [vmem:[%s4992_s7 + $0x2d8] sm:$0xff] %v6904_v20  ;;  %2902 = vst [vmem:[%s4992_s7 + $0x2d0] sm:$0xff] %v6907_v51  ;;  %v7877_v27 = vld [vmem:[#allocation105_spill] sm:$0xff] }
 0x4a9   : > { %v4394_v38 = vpop.eup %4393  ;;  %4407 = vrcp.f32 %v2610_v53  ;;  %2845 = vst [vmem:[%s4992_s7 + $0x108] sm:$0xff] %v2717_v45  ;;  %3040 = vmatprep.subr.mxu1 %v2717_v45  ;;  %2844 = vst [vmem:[%s4992_s7 + $0x100] sm:$0xff] %v2716_v57 }
 0x4aa   : > { %v4396_v43 = vpop.eup %4395  ;;  %2971 = vmatpush1.xpose.msra.mxu0 %v6814_v52  ;;  %3041 = vmatpush1.xpose.msra.mxu1 %v2716_v57  ;;  %v6920_v30 = vmul.f32 %v4394_v38, %v6434_v0  ;;  %v6923_v21 = vmul.f32 %v4394_v38, %v6422_v9  ;;  %v724_v52 = vld [vmem:[#allocation2 + $0xa8] sm:$0xff]  ;;  %v726_v9 = vld [vmem:[#allocation2 + $0xb8] sm:$0xff] }
 0x4ab   : > { %3080 = vmatprep.subr.mxu0 %v2779_v58  ;;  %v2550_v62 = vpop.xlane.xlu1 %2549  ;;  %v2607_v35 = vpop.xlane.xlu0 %2606  ;;  %v2811_v50 = vmul.f32 %v4396_v43, %v6416_v24  ;;  %v2810_v60 = vmul.f32 %v4396_v43, %v6408_v26  ;;  %v7878_v38 = vld [vmem:[#allocation129_spill] sm:$0xff] }
 0x4ac   : > { %4409 = vrcp.f32 %v2550_v62  ;;  %2901 = vst [vmem:[%s4992_s7 + $0x2c8] sm:$0xff] %v6920_v30  ;;  %2900 = vst [vmem:[%s4992_s7 + $0x2c0] sm:$0xff] %v6923_v21 }
 0x4ad   : > { %v4398_v0 = vpop.eup %4397  ;;  %4411 = vrcp.f32 %v2607_v35  ;;  %3075 = vmatmul.mubr.f32.vlgmr.msra.gmra.mxu1 %v721_v14  ;;  %2939 = vst [vmem:[%s4992_s7 + $0x3f8] sm:$0xff] %v2811_v50  ;;  %3150 = vmatprep.subr.mxu1 %v2811_v50  ;;  %2938 = vst [vmem:[%s4992_s7 + $0x3f0] sm:$0xff] %v2810_v60  ;;  %v7879_v14 = vld [vmem:[#allocation128_spill] sm:$0xff]  ;;  %v7880_v35 = vld [vmem:[#allocation101_spill] sm:$0xff] }
 0x4ae   : > { %v4400_v39 = vpop.eup %4399  ;;  %3005 = vmatmul.mubr.f32.vlgmr.msra.gmra.mxu0 %v719_v33  ;;  %3151 = vmatpush1.xpose.msra.mxu1 %v2810_v60  ;;  %v6934_v26 = vmul.f32 %v4398_v0, %v6456_v3  ;;  %v6937_v24 = vmul.f32 %v4398_v0, %v6448_v42  ;;  %v7881_v33 = vld [vmem:[#allocation99_spill] sm:$0xff] }
 0x4af   : > { %3081 = vmatpush1.xpose.msra.mxu0 %v6876_v36  ;;  %v2547_v17 = vpop.xlane.xlu1 %2546  ;;  %v2604_v1 = vpop.xlane.xlu0 %2603  ;;  %v2809_v23 = vmul.f32 %v4400_v39, %v6442_v40  ;;  %v2808_v54 = vmul.f32 %v4400_v39, %v6438_v5  ;;  %3144 = vmatprep.mubr.f32.mxu0 %v724_v52 }
 0x4b0   : > { %3082 = vmatprep.subr.mxu0 %v6888_v61  ;;  %4413 = vrcp.f32 %v2547_v17  ;;  %2899 = vst [vmem:[%s4992_s7 + $0x2b8] sm:$0xff] %v6934_v26  ;;  %2898 = vst [vmem:[%s4992_s7 + $0x2b0] sm:$0xff] %v6937_v24  ;;  %3214 = vmatprep.mubr.f32.mxu1 %v726_v9  ;;  %v7873_v61 = vld [vmem:[#allocation69_spill] sm:$0xff]  ;;  %v7882_v9 = vld [vmem:[#allocation127_spill] sm:$0xff] }
 0x4b1   : > { %v4402_v42 = vpop.eup %4401  ;;  %4415 = vrcp.f32 %v2604_v1  ;;  %2937 = vst [vmem:[%s4992_s7 + $0x3e8] sm:$0xff] %v2809_v23  ;;  %3152 = vmatprep.subr.mxu1 %v2809_v23  ;;  %2936 = vst [vmem:[%s4992_s7 + $0x3e0] sm:$0xff] %v2808_v54  ;;  %v7884_v23 = vld [vmem:[#allocation97_spill] sm:$0xff] }
 0x4b2   : > { %v4404_v40 = vpop.eup %4403  ;;  %3153 = vmatpush1.xpose.msra.mxu1 %v2808_v54  ;;  %v2769_v5 = vmul.f32 %v4402_v42, %v6476_v55  ;;  %v6951_v3 = vmul.f32 %v4402_v42, %v6470_v12  ;;  %v7885_v42 = vld [vmem:[#allocation95_spill] sm:$0xff] }
 0x4b3   : > { %3083 = vmatpush1.xpose.msra.mxu0 %v6891_v15  ;;  %v2544_v8 = vpop.xlane.xlu1 %2543  ;;  %v2601_v10 = vpop.xlane.xlu0 %2600  ;;  %v2807_v19 = vmul.f32 %v4404_v40, %v6464_v16  ;;  %v2806_v47 = vmul.f32 %v4404_v40, %v6460_v49 }
 0x4b4   : > { %3084 = vmatprep.subr.mxu0 %v6904_v20  ;;  %4417 = vrcp.f32 %v2544_v8  ;;  %2897 = vst [vmem:[%s4992_s7 + $0x2a8] sm:$0xff] %v2769_v5  ;;  %2896 = vst [vmem:[%s4992_s7 + $0x2a0] sm:$0xff] %v6951_v3  ;;  %v7876_v20 = vld [vmem:[#allocation107_spill] sm:$0xff]  ;;  %v7886_v8 = vld [vmem:[#allocation125_spill] sm:$0xff] }
 0x4b5   : > { %v4406_v59 = vpop.eup %4405  ;;  %4419 = vrcp.f32 %v2601_v10  ;;  %2935 = vst [vmem:[%s4992_s7 + $0x3d8] sm:$0xff] %v2807_v19  ;;  %3154 = vmatprep.subr.mxu1 %v2807_v19  ;;  %2934 = vst [vmem:[%s4992_s7 + $0x3d0] sm:$0xff] %v2806_v47  ;;  %v7887_v19 = vld [vmem:[#allocation124_spill] sm:$0xff] }
 0x4b6   : > { %v4408_v12 = vpop.eup %4407  ;;  %3155 = vmatpush1.xpose.msra.mxu1 %v2806_v47  ;;  %v2767_v16 = vmul.f32 %v4406_v59, %v6498_v11  ;;  %v6964_v49 = vmul.f32 %v4406_v59, %v6490_v4  ;;  %v7870_v11 = vld [vmem:[#allocation71_spill] sm:$0xff] }
 0x4b7   : > { %3085 = vmatpush1.xpose.msra.mxu0 %v6907_v51  ;;  %v2541_v55 = vpop.xlane.xlu1 %2540  ;;  %v2598_v44 = vpop.xlane.xlu0 %2597  ;;  %v2805_v58 = vmul.f32 %v4408_v12, %v7868_v31  ;;  %v2804_v36 = vmul.f32 %v4408_v12, %v7869_v63  ;;  %v7890_v63 = vld [vmem:[#allocation85_spill] sm:$0xff] }
 0x4b8   : > { %3086 = vmatprep.subr.mxu0 %v6920_v30  ;;  %4421 = vrcp.f32 %v2541_v55  ;;  %2895 = vst [vmem:[%s4992_s7 + $0x298] sm:$0xff] %v2767_v16  ;;  %2894 = vst [vmem:[%s4992_s7 + $0x290] sm:$0xff] %v6964_v49  ;;  %v7889_v55 = vld [vmem:[#allocation90_spill] sm:$0xff] }
 0x4b9   : > { %v4410_v28 = vpop.eup %4409  ;;  %4423 = vrcp.f32 %v2598_v44  ;;  %2933 = vst [vmem:[%s4992_s7 + $0x3c8] sm:$0xff] %v2805_v58  ;;  %3156 = vmatprep.subr.mxu1 %v2805_v58  ;;  %2932 = vst [vmem:[%s4992_s7 + $0x3c0] sm:$0xff] %v2804_v36 }
 0x4ba   : > { %v4412_v4 = vpop.eup %4411  ;;  %3157 = vmatpush1.xpose.msra.mxu1 %v2804_v36  ;;  %v2765_v41 = vmul.f32 %v4410_v28, %v7870_v11  ;;  %v6977_v32 = vmul.f32 %v4410_v28, %v7871_v7  ;;  %v7891_v28 = vld [vmem:[#allocation82_spill] sm:$0xff] }
 0x4bb   : > { %3087 = vmatpush1.xpose.msra.mxu0 %v6923_v21  ;;  %v2538_v37 = vpop.xlane.xlu1 %2537  ;;  %v2595_v13 = vpop.xlane.xlu0 %2594  ;;  %v2803_v25 = vmul.f32 %v4412_v4, %v7872_v46  ;;  %v2802_v15 = vmul.f32 %v4412_v4, %v7873_v61 }
 0x4bc   : > { %3088 = vmatprep.subr.mxu0 %v6934_v26  ;;  %4425 = vrcp.f32 %v2538_v37  ;;  %2893 = vst [vmem:[%s4992_s7 + $0x288] sm:$0xff] %v2765_v41  ;;  %2892 = vst [vmem:[%s4992_s7 + $0x280] sm:$0xff] %v6977_v32  ;;  %v7883_v26 = vld [vmem:[#allocation126_spill] sm:$0xff] }
 0x4bd   : > { %v4414_v48 = vpop.eup %4413  ;;  %4427 = vrcp.f32 %v2595_v13  ;;  %2931 = vst [vmem:[%s4992_s7 + $0x3b8] sm:$0xff] %v2803_v25  ;;  %3158 = vmatprep.subr.mxu1 %v2803_v25  ;;  %2930 = vst [vmem:[%s4992_s7 + $0x3b0] sm:$0xff] %v2802_v15  ;;  %v7894_v25 = vld [vmem:[#allocation121_spill] sm:$0xff] }
 0x4be   : > { %v4416_v34 = vpop.eup %4415  ;;  %3159 = vmatpush1.xpose.msra.mxu1 %v2802_v15  ;;  %v2763_v56 = vmul.f32 %v4414_v48, %v7874_v29  ;;  %v6990_v2 = vmul.f32 %v4414_v48, %v7875_v6  ;;  %v7895_v15 = vld [vmem:[#allocation120_spill] sm:$0xff]  ;;  %v7896_v29 = vld [vmem:[#allocation123_spill] sm:$0xff]  ;;  %v7897_v6 = vld [vmem:[#allocation122_spill] sm:$0xff] }
 0x4bf   : > { %3089 = vmatpush1.xpose.msra.mxu0 %v6937_v24  ;;  %v2535_v18 = vpop.xlane.xlu1 %2534  ;;  %v2592_v22 = vpop.xlane.xlu0 %2591  ;;  %v2801_v51 = vmul.f32 %v4416_v34, %v7876_v20  ;;  %v2800_v53 = vmul.f32 %v4416_v34, %v7877_v27  ;;  %v7898_v20 = vld [vmem:[#allocation64_spill] sm:$0xff]  ;;  %v7899_v27 = vld [vmem:[#allocation62_spill] sm:$0xff] }
 0x4c0   : > { %3090 = vmatprep.subr.mxu0 %v2769_v5  ;;  %4429 = vrcp.f32 %v2535_v18  ;;  %2891 = vst [vmem:[%s4992_s7 + $0x278] sm:$0xff] %v2763_v56  ;;  %2890 = vst [vmem:[%s4992_s7 + $0x270] sm:$0xff] %v6990_v2 }
 0x4c1   : > { %v4418_v45 = vpop.eup %4417  ;;  %4431 = vrcp.f32 %v2592_v22  ;;  %2929 = vst [vmem:[%s4992_s7 + $0x3a8] sm:$0xff] %v2801_v51  ;;  %3160 = vmatprep.subr.mxu1 %v2801_v51  ;;  %2928 = vst [vmem:[%s4992_s7 + $0x3a0] sm:$0xff] %v2800_v53 }
 0x4c2   : > { %v4420_v57 = vpop.eup %4419  ;;  %3161 = vmatpush1.xpose.msra.mxu1 %v2800_v53  ;;  %v2761_v43 = vmul.f32 %v4418_v45, %v7878_v38  ;;  %v7002_v30 = vmul.f32 %v4418_v45, %v7879_v14 }
 0x4c3   : > { %3091 = vmatpush1.xpose.msra.mxu0 %v6951_v3  ;;  %v2532_v21 = vpop.xlane.xlu1 %2531  ;;  %v2589_v62 = vpop.xlane.xlu0 %2588  ;;  %v2799_v50 = vmul.f32 %v4420_v57, %v7880_v35  ;;  %v2798_v60 = vmul.f32 %v4420_v57, %v7881_v33  ;;  %v7900_v57 = vld [vmem:[#allocation32_spill] sm:$0xff] }
 0x4c4   : > { %3092 = vmatprep.subr.mxu0 %v2767_v16  ;;  %4433 = vrcp.f32 %v2532_v21  ;;  %2889 = vst [vmem:[%s4992_s7 + $0x268] sm:$0xff] %v2761_v43  ;;  %2888 = vst [vmem:[%s4992_s7 + $0x260] sm:$0xff] %v7002_v30  ;;  %v7888_v16 = vld [vmem:[#allocation93_spill] sm:$0xff] }
 0x4c5   : > { %v4422_v52 = vpop.eup %4421  ;;  %4435 = vrcp.f32 %v2589_v62  ;;  %2927 = vst [vmem:[%s4992_s7 + $0x398] sm:$0xff] %v2799_v50  ;;  %3162 = vmatprep.subr.mxu1 %v2799_v50  ;;  %2926 = vst [vmem:[%s4992_s7 + $0x390] sm:$0xff] %v2798_v60  ;;  %v7902_v62 = vld [vmem:[#allocation76_spill] sm:$0xff] }
 0x4c6   : > { %v4424_v0 = vpop.eup %4423  ;;  %3163 = vmatpush1.xpose.msra.mxu1 %v2798_v60  ;;  %v2759_v39 = vmul.f32 %v4422_v52, %v7882_v9  ;;  %v7014_v24 = vmul.f32 %v4422_v52, %v7883_v26  ;;  %v7903_v50 = vld [vmem:[#allocation72_spill] sm:$0xff]  ;;  %v7904_v60 = vld [vmem:[#allocation33_spill] sm:$0xff] }
 0x4c7   : > { %3093 = vmatpush1.xpose.msra.mxu0 %v6964_v49  ;;  %v2529_v17 = vpop.xlane.xlu1 %2528  ;;  %v2586_v1 = vpop.xlane.xlu0 %2585  ;;  %v2797_v54 = vmul.f32 %v4424_v0, %v7884_v23  ;;  %v2796_v40 = vmul.f32 %v4424_v0, %v7885_v42  ;;  %v7905_v0 = vld [vmem:[#allocation75_spill] sm:$0xff]  ;;  %v7906_v26 = vld [vmem:[#allocation77_spill] sm:$0xff] }
 0x4c8   : > { %3094 = vmatprep.subr.mxu0 %v2765_v41  ;;  %4437 = vrcp.f32 %v2529_v17  ;;  %2887 = vst [vmem:[%s4992_s7 + $0x258] sm:$0xff] %v2759_v39  ;;  %2886 = vst [vmem:[%s4992_s7 + $0x250] sm:$0xff] %v7014_v24  ;;  %v7892_v41 = vld [vmem:[#allocation89_spill] sm:$0xff]  ;;  %v7907_v17 = vld [vmem:[#allocation70_spill] sm:$0xff] }
 0x4c9   : > { %v4426_v5 = vpop.eup %4425  ;;  %4439 = vrcp.f32 %v2586_v1  ;;  %2925 = vst [vmem:[%s4992_s7 + $0x388] sm:$0xff] %v2797_v54  ;;  %3164 = vmatprep.subr.mxu1 %v2797_v54  ;;  %2924 = vst [vmem:[%s4992_s7 + $0x380] sm:$0xff] %v2796_v40  ;;  %v7908_v54 = vld [vmem:[#allocation68_spill] sm:$0xff] }
 0x4ca   : > { %v4428_v3 = vpop.eup %4427  ;;  %3165 = vmatpush1.xpose.msra.mxu1 %v2796_v40  ;;  %v2757_v10 = vmul.f32 %v4426_v5, %v7886_v8  ;;  %v7026_v47 = vmul.f32 %v4426_v5, %v7887_v19  ;;  %v7909_v40 = vld [vmem:[#allocation66_spill] sm:$0xff]  ;;  %v7910_v8 = vld [vmem:[#allocation60_spill] sm:$0xff] }
 0x4cb   : > { %3095 = vmatpush1.xpose.msra.mxu0 %v6977_v32  ;;  %v2526_v59 = vpop.xlane.xlu1 %2525  ;;  %v2583_v12 = vpop.xlane.xlu0 %2582  ;;  %v2795_v49 = vmul.f32 %v4428_v3, %v7888_v16  ;;  %v2794_v44 = vmul.f32 %v4428_v3, %v7889_v55  ;;  %v7893_v32 = vld [vmem:[#allocation86_spill] sm:$0xff]  ;;  %v3220_v16 = vld [vmem:[%s7912_s11] sm:$0xff]  ;;  %s7924_s11 = sld [smem:[#allocation19_spill]] }
 0x4cc   : > { %3096 = vmatprep.subr.mxu0 %v2763_v56  ;;  %4441 = vrcp.f32 %v2526_v59  ;;  %2885 = vst [vmem:[%s4992_s7 + $0x248] sm:$0xff] %v2757_v10  ;;  %2884 = vst [vmem:[%s4992_s7 + $0x240] sm:$0xff] %v7026_v47  ;;  %v7911_v19 = vld [vmem:[#allocation58_spill] sm:$0xff]  ;;  %v7914_v55 = vld [vmem:[#allocation24_spill] sm:$0xff] }
 0x4cd   : > { %v4430_v31 = vpop.eup %4429  ;;  %4443 = vrcp.f32 %v2583_v12  ;;  %2923 = vst [vmem:[%s4992_s7 + $0x378] sm:$0xff] %v2795_v49  ;;  %3166 = vmatprep.subr.mxu1 %v2795_v49  ;;  %2922 = vst [vmem:[%s4992_s7 + $0x370] sm:$0xff] %v2794_v44  ;;  %v725_v59 = vld [vmem:[#allocation2 + $0xb0] sm:$0xff]  ;;  %v723_v12 = vld [vmem:[#allocation2 + $0xa0] sm:$0xff]  ;;  %v4644_v49 = vmov 0  }
 0x4ce   : > { %v4432_v58 = vpop.eup %4431  ;;  %3167 = vmatpush1.xpose.msra.mxu1 %v2794_v44  ;;  %v2755_v36 = vmul.f32 %v4430_v31, %v7890_v63  ;;  %v2754_v4 = vmul.f32 %v4430_v31, %v7891_v28  ;;  %4066 = vset.pattern.permute.xlu1 %v4644_v49  ;;  %v7915_v44 = vld [vmem:[#allocation25_spill] sm:$0xff]  ;;  %v7916_v31 = vld [vmem:[#allocation27_spill] sm:$0xff]  ;;  %v7918_v63 = vld [vmem:[#allocation28_spill] sm:$0xff] }
 0x4cf   : > { %3097 = vmatpush1.xpose.msra.mxu0 %v6990_v2  ;;  %v2580_v11 = vpop.xlane.xlu0 %2579  ;;  %v2793_v7 = vmul.f32 %v4432_v58, %v7892_v41  ;;  %v2792_v37 = vmul.f32 %v4432_v58, %v7893_v32  ;;  %4065 = vset.pattern.permute.xlu0 %v4644_v49  ;;  %v7917_v58 = vld [vmem:[#allocation26_spill] sm:$0xff] }
 0x4d0   : > { %3098 = vmatprep.subr.mxu0 %v2761_v43  ;;  %4445 = vrcp.f32 %v2580_v11  ;;  %2883 = vst [vmem:[%s4992_s7 + $0x238] sm:$0xff] %v2755_v36  ;;  %2882 = vst [vmem:[%s4992_s7 + $0x230] sm:$0xff] %v2754_v4  ;;  %v7901_v43 = vld [vmem:[#allocation74_spill] sm:$0xff]  ;;  %3224 = vperm.xlu1 %4066, %v7914_v55  }
 0x4d1   : > { %v4434_v13 = vpop.eup %4433  ;;  %2921 = vst [vmem:[%s4992_s7 + $0x368] sm:$0xff] %v2793_v7  ;;  %3168 = vmatprep.subr.mxu1 %v2793_v7  ;;  %2920 = vst [vmem:[%s4992_s7 + $0x360] sm:$0xff] %v2792_v37  ;;  %3229 = vperm.xlu0 %4065, %v7915_v44   ;;  %v7920_v28 = vld [vmem:[#allocation30_spill] sm:$0xff]  ;;  %s3867_s8 = sshll.u32 %s7924_s11, 3 }
 0x4d2   : > { %v4436_v46 = vpop.eup %4435  ;;  %3169 = vmatpush1.xpose.msra.mxu1 %v2792_v37  ;;  %v2753_v61 = vmul.f32 %v4434_v13, %v7894_v25  ;;  %v2752_v48 = vmul.f32 %v4434_v13, %v7895_v15  ;;  %v3316_v15 = vld [vmem:[%s7922_s6] sm:$0xff]  ;;  %s3564_s0 = sadd.s32 %s7491_s27, %s3867_s8  ;;  %s4507_s8 = scalar_lea.vmem %s7137_s16, 512 }
 0x4d3   : > { %3099 = vmatpush1.xpose.msra.mxu0 %v7002_v30  ;;  %v2577_v34 = vpop.xlane.xlu0 %2576  ;;  %v2791_v56 = vmul.f32 %v4436_v46, %v7896_v29  ;;  %v2790_v2 = vmul.f32 %v4436_v46, %v7897_v6  ;;  %s3868_s12 = sshll.u32 %s3564_s0, 7  ;;  %p4508_p6 = scmp.ne.s32.totalorder %s7137_s16, %s4507_s8 }
 0x4d4   : > { %3100 = vmatprep.subr.mxu0 %v2759_v39  ;;  %4447 = vrcp.f32 %v2577_v34  ;;  %2881 = vst [vmem:[%s4992_s7 + $0x228] sm:$0xff] %v2753_v61  ;;  %2880 = vst [vmem:[%s4992_s7 + $0x220] sm:$0xff] %v2752_v48  ;;  %3325 = vperm.xlu1 %4066, %v7916_v31   ;;  %s7135_s26 = scalar_lea.hbm %s7926_s5, %s3868_s12 }
 0x4d5   : > { %v4438_v18 = vpop.eup %4437  ;;  %2919 = vst [vmem:[%s4992_s7 + $0x358] sm:$0xff] %v2791_v56  ;;  %3170 = vmatprep.subr.mxu1 %v2791_v56  ;;  %2918 = vst [vmem:[%s4992_s7 + $0x350] sm:$0xff] %v2790_v2  ;;  %p4509_p7 = pnand %p4508_p6, %p7927_p10 }
 0x4d6   : > { %v4440_v22 = vpop.eup %4439  ;;  %3171 = vmatpush1.xpose.msra.mxu1 %v2790_v2  ;;  %v2751_v51 = vmul.f32 %v4438_v18, %v7898_v20  ;;  %v2750_v53 = vmul.f32 %v4438_v18, %v7899_v27  ;;  %v3317_v20 = vld [vmem:[%s7922_s6 + $0x8] sm:$0xff] }
 0x4d7   : > { %3101 = vmatpush1.xpose.msra.mxu0 %v7014_v24  ;;  %v2574_v45 = vpop.xlane.xlu0 %2573  ;;  %v2789_v38 = vmul.f32 %v4440_v22, %v7900_v57  ;;  %v2788_v14 = vmul.f32 %v4440_v22, %v7901_v43  ;;  %p4510_p0 = pneg %p4509_p7 }
 0x4d8   : > { %3102 = vmatprep.subr.mxu0 %v2757_v10  ;;  %4449 = vrcp.f32 %v2574_v45  ;;  %2879 = vst [vmem:[%s4992_s7 + $0x218] sm:$0xff] %v2751_v51  ;;  %2878 = vst [vmem:[%s4992_s7 + $0x210] sm:$0xff] %v2750_v53  ;;  %3320 = vperm.xlu1 %4066, %v7917_v58  }
 0x4d9   : > { %v4442_v30 = vpop.eup %4441  ;;  %2917 = vst [vmem:[%s4992_s7 + $0x348] sm:$0xff] %v2789_v38  ;;  %3172 = vmatprep.subr.mxu1 %v2789_v38  ;;  %2916 = vst [vmem:[%s4992_s7 + $0x340] sm:$0xff] %v2788_v14 }
 0x4da   : > { %v4444_v21 = vpop.eup %4443  ;;  %3173 = vmatpush1.xpose.msra.mxu1 %v2788_v14  ;;  %v2749_v35 = vmul.f32 %v4442_v30, %v7902_v62  ;;  %v2748_v33 = vmul.f32 %v4442_v30, %v7903_v50  ;;  %v3414_v62 = vld [vmem:[%s7923_s20 + $0x10] sm:$0xff] }
 0x4db   : > { %3103 = vmatpush1.xpose.msra.mxu0 %v7026_v47  ;;  %v2787_v52 = vmul.f32 %v4444_v21, %v7904_v60  ;;  %v2786_v9 = vmul.f32 %v4444_v21, %v7905_v0  ;;  %v3413_v21 = vld [vmem:[%s7923_s20 + $0x8] sm:$0xff]  ;;  %v3536_v0 = vld [vmem:[%s3534_s19 + $0x10] sm:$0xff] }
 0x4dc   : > { %3104 = vmatprep.subr.mxu0 %v2755_v36  ;;  %2877 = vst [vmem:[%s4992_s7 + $0x208] sm:$0xff] %v2749_v35  ;;  %2876 = vst [vmem:[%s4992_s7 + $0x200] sm:$0xff] %v2748_v33  ;;  %3418 = vperm.xlu1 %4066, %v7918_v63   ;;  %v7919_v36 = vld [vmem:[#allocation29_spill] sm:$0xff] }
 0x4dd   : > { %v4446_v39 = vpop.eup %4445  ;;  %2915 = vst [vmem:[%s4992_s7 + $0x338] sm:$0xff] %v2787_v52  ;;  %3174 = vmatprep.subr.mxu1 %v2787_v52  ;;  %2914 = vst [vmem:[%s4992_s7 + $0x330] sm:$0xff] %v2786_v9 }
 0x4de   : > { %3175 = vmatpush1.xpose.msra.mxu1 %v2786_v9  ;;  %v2785_v24 = vmul.f32 %v4446_v39, %v7906_v26  ;;  %v2784_v1 = vmul.f32 %v4446_v39, %v7907_v17  ;;  %v3535_v26 = vld [vmem:[%s3534_s19] sm:$0xff] }
 0x4df   : > { %3105 = vmatpush1.xpose.msra.mxu0 %v2754_v4  ;;  %v7921_v4 = vld [vmem:[#allocation31_spill] sm:$0xff] }
 0x4e0   : > { %3106 = vmatprep.subr.mxu0 %v2753_v61  ;;  %2913 = vst [vmem:[%s4992_s7 + $0x328] sm:$0xff] %v2785_v24  ;;  %3176 = vmatprep.subr.mxu1 %v2785_v24  ;;  %2912 = vst [vmem:[%s4992_s7 + $0x320] sm:$0xff] %v2784_v1  ;;  %v3221_v61 = vld [vmem:[%s7913_s24 + $0x8] sm:$0xff] }
 0x4e1   : > { %v4448_v23 = vpop.eup %4447  ;;  %3423 = vperm.xlu1 %4066, %v7919_v36  }
 0x4e2   : > { %3177 = vmatpush1.xpose.msra.mxu1 %v2784_v1  ;;  %v2783_v42 = vmul.f32 %v4448_v23, %v7908_v54  ;;  %v2782_v5 = vmul.f32 %v4448_v23, %v7909_v40  ;;  %v3538_v54 = vld [vmem:[%s3534_s19 + $0x30] sm:$0xff] }
 0x4e3   : > { %3107 = vmatpush1.xpose.msra.mxu0 %v2752_v48 }
 0x4e4   : > { %3108 = vmatprep.subr.mxu0 %v2751_v51  ;;  %2911 = vst [vmem:[%s4992_s7 + $0x318] sm:$0xff] %v2783_v42  ;;  %3178 = vmatprep.subr.mxu1 %v2783_v42  ;;  %2910 = vst [vmem:[%s4992_s7 + $0x310] sm:$0xff] %v2782_v5  ;;  %v3412_v51 = vld [vmem:[%s7923_s20] sm:$0xff] }
 0x4e5   : > { %v4450_v3 = vpop.eup %4449  ;;  %3428 = vperm.xlu1 %4066, %v7920_v28  }
 0x4e6   : > { %3179 = vmatpush1.xpose.msra.mxu1 %v2782_v5  ;;  %v2781_v10 = vmul.f32 %v4450_v3, %v7910_v8  ;;  %v2780_v47 = vmul.f32 %v4450_v3, %v7911_v19  ;;  %v3537_v3 = vld [vmem:[%s3534_s19 + $0x20] sm:$0xff]  ;;  %s4645_s19 = smov [#allocation8]  }
 0x4e7   : > { %3109 = vmatpush1.xpose.msra.mxu0 %v2750_v53  ;;  %s4511_s0 = sshll.u32 %s4645_s19, 4  ;;  %s4512_s0 = int_to_ptr.vmem [resolvable:$false] %s4511_s0 }
 0x4e8   : > { %3110 = vmatprep.subr.mxu0 %v2749_v35  ;;  %2909 = vst [vmem:[%s4992_s7 + $0x308] sm:$0xff] %v2781_v10  ;;  %3180 = vmatprep.subr.mxu1 %v2781_v10  ;;  %2908 = vst [vmem:[%s4992_s7 + $0x300] sm:$0xff] %v2780_v47  ;;  %v3415_v35 = vld [vmem:[%s7923_s20 + $0x18] sm:$0xff]  ;;  %s4513_s30 = scalar_lea.vmem %s4512_s0, 1024  ;;  %p4514_p9 = scmp.lt.s32.totalorder %s7137_s16, %s4512_s0 }
 0x4e9   : > { %3433 = vperm.xlu1 %4066, %v7921_v4   ;;  %p4515_p1 = scmp.lt.s32.totalorder %s4513_s30, %s4507_s8 }
 0x4ea   : > { %3181 = vmatpush1.xpose.msra.mxu1 %v2780_v47 }
 0x4eb   : > { %3111 = vmatpush1.xpose.msra.mxu0 %v2748_v33  ;;  %p4516_p12 = por %p4515_p1, %p4514_p9 }
 0x4ed   : > { %3215 = vmatmul.mubr.f32.vlgmr.msra.gmra.mxu1 %v725_v59  ;;  %p4517_p13 = pnand %p4516_p12, %p4510_p0 }
 0x4ee   : > { %3145 = vmatmul.mubr.f32.vlgmr.msra.gmra.mxu0 %v723_v12  ;;  %3909 = vmatprep.mubr.msk.f32.mxu1 %vm3328_vm3, %v3316_v15 }
 0x4ef   : > { %3902 = vmatprep.mubr.msk.f32.mxu0 %vm3232_vm2, %v3220_v16 }
 0x54b   : > { %v3225_v56 = vpop.permute.xlu1 %3224 }
 0x54c   : > { %v3230_v48 = vpop.permute.xlu0 %3229 }
 0x54f   : > { %v3326_v27 = vpop.permute.xlu1 %3325 }
 0x553   : > { %v3321_v57 = vpop.permute.xlu1 %3320 }
 0x557   : > { %v3419_v50 = vpop.permute.xlu1 %3418 }
 0x55c   : > { %v3424_v33 = vpop.permute.xlu1 %3423 }
 0x560   : > { %v3429_v60 = vpop.permute.xlu1 %3428 }
 0x564   : > { %v3434_v1 = vpop.permute.xlu1 %3433 }
 0x56d   : > { %v3076_v11 = vpop.f32.mrf.mxu1 }
 0x56e   : > { %v3006_v41 = vpop.f32.mrf.mxu0 }
 0x56f   : > { %v3078_v7 = vpop.f32.mrf.mxu1 }
 0x570   : > { %v3008_v32 = vpop.f32.mrf.mxu0 }
 0x5ad   : > { %v3216_v37 = vpop.f32.mrf.mxu1 }
 0x5ae   : > { %v3146_v13 = vpop.f32.mrf.mxu0  ;;  %3894 = vmatprep.subr.mxu0 %v3216_v37 }
 0x5af   : > { %v3218_v46 = vpop.f32.mrf.mxu1  ;;  %3895 = vmatpush3.msra.mxu0 %v3216_v37 }
 0x5b0   : > { %v3148_v25 = vpop.f32.mrf.mxu0  ;;  %3896 = vmatprep.subr.mxu0 %v3146_v13 }
 0x5b1   : > { %3897 = vmatpush3.msra.mxu0 %v3146_v13 }
 0x5b2   : > { %3898 = vmatprep.subr.mxu0 %v3076_v11 }
 0x5b3   : > { %3899 = vmatpush3.msra.mxu0 %v3076_v11 }
 0x5b4   : > { %3900 = vmatprep.subr.mxu0 %v3006_v41 }
 0x5b5   : > { %3901 = vmatpush3.msra.mxu0 %v3006_v41 }
 0x5b6   : > { %3903 = vmatmul.mubr.msk.f32.vlgmr.msra.gmra.mxu0 %vm3232_vm2, %v3221_v61 }
 0x676   : > { %v3904_v34 = vpop.f32.mrf.mxu0 }
 0x677   : > { %v3311_v29 = vadd.f32 %v3904_v34, %v3230_v48 }
 0x678   : > { %v3305_v6 = vpop.f32.mrf.mxu0 }
 0x679   : > { %v3315_v2 = vmax.f32 %v3311_v29, 0.0  ;;  %v3306_v18 = vadd.f32 %v3305_v6, %v3225_v56 }
 0x67b   : > { %v3314_v22 = vmax.f32 %v3306_v18, 0.0  ;;  %3905 = vmatprep.subr.mxu1 %v3315_v2 }
 0x67c   : > { %3906 = vmatpush3.msra.mxu1 %v3315_v2 }
 0x67d   : > { %3907 = vmatprep.subr.mxu1 %v3314_v22 }
 0x67e   : > { %3908 = vmatpush3.msra.mxu1 %v3314_v22 }
 0x67f   : > { %3910 = vmatmul.mubr.msk.f32.vlgmr.msra.gmra.mxu1 %vm3328_vm3, %v3317_v20 }
 0x680   : > { %3916 = vmatprep.mubr.msk.f32.mxu1 %vm3328_vm3, %v3412_v51 }
 0x73f   : > { %v3911_v53 = vpop.f32.mrf.mxu1 }
 0x740   : > { %v3407_v45 = vadd.f32 %v3911_v53, %v3326_v27 }
 0x741   : > { %v3401_v38 = vpop.f32.mrf.mxu1 }
 0x742   : > { %v3411_v43 = vmax.f32 %v3407_v45, 0.0  ;;  %v3402_v14 = vadd.f32 %v3401_v38, %v3321_v57 }
 0x744   : > { %v3410_v30 = vmax.f32 %v3402_v14, 0.0  ;;  %3912 = vmatprep.subr.mxu1 %v3411_v43 }
 0x745   : > { %3913 = vmatpush3.msra.mxu1 %v3411_v43 }
 0x746   : > { %3914 = vmatprep.subr.mxu1 %v3410_v30 }
 0x747   : > { %3915 = vmatpush3.msra.mxu1 %v3410_v30 }
 0x748   : > { %3917 = vmatmul.mubr.msk.f32.vlgmr.msra.gmra.mxu1 %vm3328_vm3, %v3413_v21 }
 0x749   : > { %3919 = vmatprep.mubr.msk.f32.mxu1 %vm3328_vm3, %v3414_v62 }
 0x74c   : > { %3920 = vmatmul.mubr.msk.f32.gmra.mxu1 %vm3328_vm3, %v3415_v35 }
 0x808   : > { %v3918_v52 = vpop.f32.mrf.mxu1 }
 0x809   : > { %v3520_v9 = vadd.f32 %v3918_v52, %v3424_v33 }
 0x80a   : > { %v3514_v39 = vpop.f32.mrf.mxu1 }
 0x80b   : > { %v3540_v24 = vadd.f32 %v3536_v0, %v3520_v9  ;;  %v3515_v17 = vadd.f32 %v3514_v39, %v3419_v50 }
 0x80c   : > { %v3921_v23 = vpop.f32.mrf.mxu1 }
 0x80d   : > { %3544 = vst [vmem:[%s4990_s23 + $0x8] sm:$0xff] %v3540_v24  ;;  %v3539_v42 = vadd.f32 %v3535_v26, %v3515_v17  ;;  %v3530_v40 = vadd.f32 %v3921_v23, %v3434_v1 }
 0x80e   : > { %v3524_v5 = vpop.f32.mrf.mxu1 }
 0x80f   : > { %3543 = vst [vmem:[%s4990_s23] sm:$0xff] %v3539_v42  ;;  %v3542_v8 = vadd.f32 %v3538_v54, %v3530_v40  ;;  %v3525_v10 = vadd.f32 %v3524_v5, %v3429_v60 }
 0x811   : > { %3546 = vst [vmem:[%s4990_s23 + $0x18] sm:$0xff] %v3542_v8  ;;  %v3541_v19 = vadd.f32 %v3537_v3, %v3525_v10 }
 0x813   : > { %3545 = vst [vmem:[%s4990_s23 + $0x10] sm:$0xff] %v3541_v19 }
 0x814   : > { %4520 = shalt.err (!%p4517_p13)
}
 0x815   : > { %s4521_s23 = scalar_lea.hbm %s7135_s26, 512  ;;  %s4525_s19 = scalar_lea.hbm %s7926_s5, 2048 }
 0x816   : > { %p4522_p8 = scmp.ne.s32.totalorder %s7135_s26, %s4521_s23  ;;  %p4526_p3 = scmp.lt.s32.totalorder %s7135_s26, %s7926_s5 }
 0x817   : > { %p4527_p11 = scmp.lt.s32.totalorder %s4525_s19, %s4521_s23 }
 0x818   : > { %p4523_p2 = pnand %p4522_p8, %p7927_p10 }
 0x819   : > { %p4528_p5 = por %p4527_p11, %p4526_p3 }
 0x81a   : > { %p4524_p4 = pneg %p4523_p2 }
 0x81c   : > { %p4529_p6 = pnand %p4528_p5, %p4524_p4 }
 0x81e   : > { %4532 = shalt.err (!%p4529_p6)
}
 0x81f   : > { %s4646_s8 = smov 128   ;;  %s4647_s0 = smov 256  }
 0x820   : > { %s4648_s30 = smov 8   ;;  %s7928_s3 = scalar_lea.sflag [#allocation5], %s4880_s22 }
 0x821   : > { %3934 = dma.vmem_to_hbm [thread:$0]  (%p7927_p10), %s7137_s16, 512, %s7135_s26, %s7928_s3, %s4646_s8, %s4647_s0, %s4648_s30  }
 0x822   : > { %s3553_s12 = scalar_lea.sflag [#allocation10], %s4880_s22 }
 0x823   : > { %s3877_s1 = sshll.u32 %s7491_s27, 5  ;;  %s3871_s2 = sshll.u32 %s7924_s11, 8 }
 0x824   : > { %s3583_s23 = sadd.s32 %s3877_s1, %s3871_s2  ;;  %s3596_s17 = sshll.u32 %s4992_s7, 4  ;;  %s3597_s17 = int_to_ptr.vmem [resolvable:$true] %s3596_s17 }
 0x825   : > { %s3872_s19 = sshll.u32 %s3583_s23, 7  ;;  %s7929_s3 = sld [smem:[#allocation138_spill]] }
 0x826   : > { %s4649_s16 = smov 4096   ;;  %s4650_s26 = smov 8192  }
 0x827   : > { %3935 = sst [smem:[#allocation12]] (%p7927_p10), %s4649_s16  ;;  %s4651_s8 = smov 16  }
 0x828   : > { %3936 = sst [smem:[#allocation12 + $0x1]] (%p7927_p10), %s4650_s26  ;;  %s4652_s27 = smov 256  }
 0x829   : > { %3937 = sst [smem:[#allocation12 + $0x2]] (%p7927_p10), %s4651_s8  ;;  %s4653_s7 = smov 131072  }
 0x82a   : > { %3938 = sst [smem:[#allocation12 + $0x3]] (%p7927_p10), %s4652_s27  ;;  %s4654_s11 = smov 0  }
 0x82b   : > { %s3585_s22 = scalar_lea.hbm %s7929_s3, %s3872_s19  ;;  %3939 = sst [smem:[#allocation12 + $0x4]] (%p7927_p10), %s4652_s27 }
 0x82c   : > { %3940 = sst [smem:[#allocation12 + $0x5]] (%p7927_p10), %s4651_s8 }
 0x82d   : > { %3941 = dma.general (%p7927_p10), %s3597_s17, 16384, %s3585_s22, %s3553_s12, %s4653_s7, [#allocation12], %s4654_s11, 0  }
 0x82e PF: > { %s7930_s4 = sld [smem:[#allocation17_spill]]  ;;  %p3959_p7 = scmp.ge.s32.totalorder %s4635_s15, 2 }
 0x82f   : > { %s7931_s5 = sld [smem:[#allocation23_spill]] }
 0x834   : > { %s3624_s0 = sand.u32 1, %s7930_s4  }
 0x835   : > { %p7932_p0 = scmp.ne.s32.totalorder %s7931_s5, 0  ;;  %s3625_s30 = scalar_lea.sflag [#allocation5], %s3624_s0 }
 0x837   : > { %p3952_p9 = pnand %p3959_p7, %p7932_p0 }
 0x839   : > { %p3953_p1 = pneg %p3952_p9 }
 0x83b   : > { %4586 = dma.done.wait (%p3953_p1), %s3625_s30, 512  }
 0x83c   : > { %4588 = vsyncadd (%p3953_p1), %s3625_s30, 4294966784  ;;  %s3634_s1 = scalar_lea.sflag [#allocation10], %s3624_s0 }
 0x83d   : > { %4590 = dma.done.wait (%p3953_p1), %s3634_s1, 16384  }
 0x83e   : > { %4592 = vsyncadd (%p3953_p1), %s3634_s1, 4294950912  ;;  %s31_s15 = sadd.s32 1, %s4635_s15   ;;  %s7933_s18 = sld [smem:[#allocation20_spill]] }
 0x83f   : > { %p28_p12 = scmp.ge.s32.totalorder %s31_s15, 6   ;;  %s7934_s2 = sld [smem:[#allocation21_spill]] }
 0x840   : > { %s7935_s27 = smov %s4599_s28  ;;  %s7936_s28 = smov %s4603_s29 }
 0x841   : > { %s7937_s29 = smov %s4848_s25  ;;  %s7938_s30 = smov %s4611_s9 }
 0x842   : > { %s7939_s9 = smov %s4615_s10  ;;  %s7940_s10 = smov %s4845_s21 }
 0x843   : > { %s7941_s11 = smov %s4627_s13  ;;  %s7942_s12 = smov %s4631_s14 }
 0x844   : > { %s7943_s13 = smov %s7933_s18  ;;  %30 = sbr.rel (!%p28_p12) target bundleno = 23 (0x17), region = 136 }
 0x845   : > { %s7944_s14 = smov %s7934_s2 }
 0x849   :  { %3639 = vsyncpa [#allocation4], 1 }
 0x84a   :  { %3641 = vsyncpa [#allocation4 + $0x1], 1 }
 0x84b   :  { %3642 = vsyncpa [#allocation7], 1 }
 0x84c   :  { %3644 = vsyncpa [#allocation7 + $0x1], 1 }
 0x84d   :  { %3645 = vsyncpa [#allocation5], 1 }
 0x84e   :  { %3647 = vsyncpa [#allocation5 + $0x1], 1 }
 0x84f   :  { %3648 = vsyncpa [#allocation10], 1 }
 0x850   :  { %3650 = vsyncpa [#allocation10 + $0x1], 1 }

</bundles_post_ra>
